<compile_context>
chip_gen: v5e
topology: v5e:2x2
jax: 0.10.0
libtpu: 0.0.40
codegen_flags: <defaults>
</compile_context>

<pallas_src>
import functools

import jax
import jax.numpy as jnp
from jax.experimental import pallas as pl
from jax.experimental.pallas import tpu as pltpu

EPS = 1e-5


def _vmem_limit_bytes():
    """Per-generation VMEM budget: ~3/4 of physical, capped, >= 32 MiB."""
    try:
        cap = int(pltpu.get_tpu_info().vmem_capacity_bytes)
    except Exception:
        cap = 64 * 1024 * 1024
    return max(32 * 1024 * 1024, min(cap * 3 // 4, 96 * 1024 * 1024))


# ---------------------------------------------------------------------------
# Stage 1: conv1 (3x3, stride s) [+ fused 1x1 projection shortcut]
#          9 per-tap accumulating MXU matmuls, no im2col scratch.
#          Emits raw (pre-BN) activations in bf16 + per-image f32 [sum,sumsq].
# ---------------------------------------------------------------------------
def make_stage1_kernel(s, Ho, Wo, Cin, P, has_proj):
    def kernel(*refs):
        if has_proj:
            xph_ref, w1_ref, wc_ref, y1_ref, st1_ref, sc_ref, sts_ref = refs
        else:
            xph_ref, w1_ref, y1_ref, st1_ref = refs

        acc = jnp.zeros((Ho * Wo, P), jnp.float32)
        sc = None
        for kh in range(3):
            for kw in range(3):
                ph = (kh % s) * s + (kw % s)
                ro, co = kh // s, kw // s
                tap = xph_ref[ph, ro:ro + Ho, co:co + Wo, :]        # (Ho,Wo,Cin) bf16
                tap = tap.reshape(Ho * Wo, Cin)
                t = 3 * kh + kw
                if has_proj and t == 4:
                    # conv1's stride-s center tap IS the 1x1 shortcut's input
                    # sampling: one wider (Cin, 2P) matmul fills the MXU
                    # output columns and avoids a second gather + drain.
                    r = jnp.dot(tap, wc_ref[...],
                                preferred_element_type=jnp.float32)  # (Ho*Wo, 2P)
                    acc = acc + r[:, :P]
                    sc = r[:, P:]
                else:
                    w_chunk = w1_ref[t * Cin:(t + 1) * Cin, :]
                    acc = acc + jnp.dot(tap, w_chunk,
                                        preferred_element_type=jnp.float32)

        # One lane-dense (2, P) stats store: [sum ; sumsq], f32.
        st1_ref[0] = jnp.concatenate(
            [jnp.sum(acc, axis=0, keepdims=True),
             jnp.sum(acc * acc, axis=0, keepdims=True)], axis=0)
        y1_ref[0] = acc.astype(jnp.bfloat16)

        if has_proj:
            sts_ref[0] = jnp.concatenate(
                [jnp.sum(sc, axis=0, keepdims=True),
                 jnp.sum(sc * sc, axis=0, keepdims=True)], axis=0)
            sc_ref[0] = sc.astype(jnp.bfloat16)

    return kernel


# ---------------------------------------------------------------------------
# Stage 2: BN1 affine + ReLU (f32), conv2 (3x3, stride 1) as 9 per-tap
#          accumulating matmuls over a bf16 padded scratch.
# ---------------------------------------------------------------------------
def make_stage2_kernel(Ho, Wo, P):
    def kernel(y1_ref, g1_ref, b1_ref, w2_ref, y2_ref, st2_ref, pad_ref):
        # BN1 affine + ReLU in f32; bf16 only at the conv operand.
        y1n = jnp.maximum(
            y1_ref[0].astype(jnp.float32) * g1_ref[...] + b1_ref[...], 0.0)
        img = y1n.reshape(Ho, Wo, P).astype(jnp.bfloat16)

        # Single full lane-dense padded store (no 1-wide column writes).
        # Rebuilt every grid step -> safe under "parallel"/megacore semantics.
        zc = jnp.zeros((Ho, 1, P), jnp.bfloat16)
        zr = jnp.zeros((1, Wo + 2, P), jnp.bfloat16)
        pad_ref[...] = jnp.concatenate(
            [zr, jnp.concatenate([zc, img, zc], axis=1), zr], axis=0)

        acc = jnp.zeros((Ho * Wo, P), jnp.float32)
        for kh in range(3):
            for kw in range(3):
                tap = pad_ref[kh:kh + Ho, kw:kw + Wo, :].reshape(Ho * Wo, P)
                t = 3 * kh + kw
                acc = acc + jnp.dot(tap, w2_ref[t * P:(t + 1) * P, :],
                                    preferred_element_type=jnp.float32)

        st2_ref[0] = jnp.concatenate(
            [jnp.sum(acc, axis=0, keepdims=True),
             jnp.sum(acc * acc, axis=0, keepdims=True)], axis=0)
        y2_ref[0] = acc.astype(jnp.bfloat16)

    return kernel


# ---------------------------------------------------------------------------
# Stage 3: BN2 affine + shortcut (BN affine or identity) + add + ReLU,
#          flattened to (N*Ho*Wo, P) with coarse row tiles.
# ---------------------------------------------------------------------------
def make_stage3_kernel(has_proj):
    def kernel(*refs):
        if has_proj:
            y2_ref, sc_ref, g2_ref, b2_ref, gs_ref, bs_ref, o_ref = refs
            shortcut = sc_ref[...].astype(jnp.float32) * gs_ref[...] + bs_ref[...]
        else:
            y2_ref, sc_ref, g2_ref, b2_ref, o_ref = refs
            shortcut = sc_ref[...].astype(jnp.float32)
        o_ref[...] = jnp.maximum(
            y2_ref[...].astype(jnp.float32) * g2_ref[...] + b2_ref[...] + shortcut,
            0.0)

    return kernel


# ---------------------------------------------------------------------------
# Wrapper glue
# ---------------------------------------------------------------------------
def _bn_affine(stats, gamma, beta, count, eps=EPS):
    """Per-image [sum, sumsq] partials -> per-channel (scale, shift) rows."""
    tot = jnp.sum(stats, axis=0)                      # (2, P)
    mean = tot[0] / count
    # TODO(synk): single-pass E[x^2]-E[x]^2 in f32 can cancel for very large
    # N*Ho*Wo / large activations; a Welford / two-pass reduction is safer.
    var = jnp.maximum(tot[1] / count - mean * mean, 0.0)
    scale = gamma * jax.lax.rsqrt(var + eps)
    shift = beta - mean * scale
    return scale.reshape(1, -1), shift.reshape(1, -1)


def _phase_decompose(xpad, s, Hp, Wp):
    """(N,H+2,W+2,C) -> (N*s*s, Hp, Wp, C) stride-phase slabs so every conv
    tap becomes a contiguous static in-kernel slice."""
    N, C = xpad.shape[0], xpad.shape[-1]
    slabs = []
    for p in range(s):
        for q in range(s):
            ph = xpad[:, p::s, q::s, :][:, :Hp, :Wp, :]
            dh, dw = Hp - ph.shape[1], Wp - ph.shape[2]
            if dh or dw:
                ph = jnp.pad(ph, ((0, 0), (0, dh), (0, dw), (0, 0)))
            slabs.append(ph.reshape(N, 1, Hp, Wp, C))
    return jnp.concatenate(slabs, axis=1).reshape(N * s * s, Hp, Wp, C)


def _row_tile(total):
    for cand in (1024, 512, 256, 128, 64, 32, 16, 8):
        if total % cand == 0:
            return cand
    return total


@functools.partial(jax.jit, static_argnums=(2,))
def basic_block_forward(x_nchw, params, stride):
    w1 = params["conv1_w"]                            # (P, Cin, 3, 3)
    w2 = params["conv2_w"]                            # (P, P, 3, 3)
    P, Cin = int(w1.shape[0]), int(w1.shape[1])
    N, _, H, W = x_nchw.shape
    s = int(stride)
    Ho = (H - 1) // s + 1
    Wo = (W - 1) // s + 1
    R = N * Ho * Wo
    has_proj = (s != 1) or (Cin != P)

    # TODO(synk): chained blocks should keep activations NHWC end-to-end; the
    # entry/exit layout passes exist only because the module contract is NCHW.
    x = jnp.transpose(x_nchw, (0, 2, 3, 1)).astype(jnp.float32)   # NHWC f32
    xb = x.astype(jnp.bfloat16)                                   # MXU operand
    xpad = jnp.pad(xb, ((0, 0), (1, 1), (1, 1), (0, 0)))
    off = 2 // s
    Hp, Wp = Ho + off, Wo + off
    if s == 1:
        xph = xpad                                    # identity decomposition
    else:
        xph = _phase_decompose(xpad, s, Hp, Wp)       # (N*s*s, Hp, Wp, Cin)

    # Weight matrices for the per-tap matmuls (bf16 MXU operands).
    w1_mat = jnp.transpose(w1, (2, 3, 1, 0)).reshape(9 * Cin, P).astype(jnp.bfloat16)
    w2_mat = jnp.transpose(w2, (2, 3, 1, 0)).reshape(9 * P, P).astype(jnp.bfloat16)

    cparams = pltpu.CompilerParams(
        dimension_semantics=("parallel",),
        vmem_limit_bytes=_vmem_limit_bytes())

    xph_spec = pl.BlockSpec((s * s, Hp, Wp, Cin), lambda n: (n, 0, 0, 0))
    w1_spec = pl.BlockSpec((9 * Cin, P), lambda n: (0, 0))
    w2_spec = pl.BlockSpec((9 * P, P), lambda n: (0, 0))
    vec_spec = pl.BlockSpec((1, P), lambda n: (0, 0))
    act_spec = pl.BlockSpec((1, Ho * Wo, P), lambda n: (n, 0, 0))
    st_spec = pl.BlockSpec((1, 2, P), lambda n: (n, 0, 0))

    act_shape = jax.ShapeDtypeStruct((N, Ho * Wo, P), jnp.bfloat16)
    st_shape = jax.ShapeDtypeStruct((N, 2, P), jnp.float32)

    # ---- stage 1: conv1 (+ fused shortcut conv) raw + BN partial sums ------
    k1 = make_stage1_kernel(s, Ho, Wo, Cin, P, has_proj)
    if has_proj:
        ws_mat = jnp.transpose(params["sc_w"][:, :, 0, 0]).astype(jnp.bfloat16)
        wc_mat = jnp.concatenate([w1_mat[4 * Cin:5 * Cin, :], ws_mat], axis=1)
        wc_spec = pl.BlockSpec((Cin, 2 * P), lambda n: (0, 0))
        y1_raw, st1, sc_raw, sts = pl.pallas_call(
            k1, grid=(N,),
            in_specs=[xph_spec, w1_spec, wc_spec],
            out_specs=(act_spec, st_spec, act_spec, st_spec),
            out_shape=(act_shape, st_shape, act_shape, st_shape),
            compiler_params=cparams,
        )(xph, w1_mat, wc_mat)
        sc_flat = sc_raw.reshape(R, P)
    else:
        y1_raw, st1 = pl.pallas_call(
            k1, grid=(N,),
            in_specs=[xph_spec, w1_spec],
            out_specs=(act_spec, st_spec),
            out_shape=(act_shape, st_shape),
            compiler_params=cparams,
        )(xph, w1_mat)
        sc_flat = x.reshape(R, P)                     # identity shortcut, exact f32
        sts = None

    g1, b1 = _bn_affine(st1, params["bn1_g"], params["bn1_b"], R)

    # ---- stage 2: BN1 + ReLU + conv2 raw + BN2 partial sums -----------------
    k2 = make_stage2_kernel(Ho, Wo, P)
    y2_raw, st2 = pl.pallas_call(
        k2, grid=(N,),
        in_specs=[act_spec, vec_spec, vec_spec, w2_spec],
        out_specs=(act_spec, st_spec),
        out_shape=(act_shape, st_shape),
        scratch_shapes=[pltpu.VMEM((Ho + 2, Wo + 2, P), jnp.bfloat16)],
        compiler_params=cparams,
    )(y1_raw, g1, b1, w2_mat)

    g2, b2 = _bn_affine(st2, params["bn2_g"], params["bn2_b"], R)

    # ---- stage 3: BN2 + shortcut + add + ReLU (flattened, coarse tiles) -----
    k3 = make_stage3_kernel(has_proj)
    TR = _row_tile(R)
    row_spec = pl.BlockSpec((TR, P), lambda i: (i, 0))
    vec3_spec = pl.BlockSpec((1, P), lambda i: (0, 0))
    y2_flat = y2_raw.reshape(R, P)

    if has_proj:
        gs, bs = _bn_affine(sts, params["bn_s_g"], params["bn_s_b"], R)
        ins = (y2_flat, sc_flat, g2, b2, gs, bs)
        in_specs = [row_spec, row_spec, vec3_spec, vec3_spec, vec3_spec, vec3_spec]
    else:
        ins = (y2_flat, sc_flat, g2, b2)
        in_specs = [row_spec, row_spec, vec3_spec, vec3_spec]

    out_flat = pl.pallas_call(
        k3, grid=(R // TR,),
        in_specs=in_specs,
        out_specs=row_spec,
        out_shape=jax.ShapeDtypeStruct((R, P), jnp.float32),
        compiler_params=cparams,
    )(*ins)

    # TODO(synk): if the consumer accepts NHWC, return out_flat.reshape(
    # N, Ho, Wo, P) directly and skip this extra HBM transpose pass.
    return out_flat.reshape(N, Ho, Wo, P).transpose(0, 3, 1, 2)    # NCHW


# ---------------- pure-JAX reference (for correctness check) ----------------
def ref_forward(x, params, stride, eps=EPS):
    HI = jax.lax.Precision.HIGHEST

    def conv(x, w, s, pad):
        return jax.lax.conv_general_dilated(
            x, w, (s, s), [(pad, pad), (pad, pad)],
            dimension_numbers=("NCHW", "OIHW", "NCHW"), precision=HI)

    def bn(y, g, b):
        m = jnp.mean(y, axis=(0, 2, 3), keepdims=True)
        v = jnp.mean((y - m) ** 2, axis=(0, 2, 3), keepdims=True)
        return (y - m) * jax.lax.rsqrt(v + eps) * g.reshape(1, -1, 1, 1) \
            + b.reshape(1, -1, 1, 1)

    P, Cin = params["conv1_w"].shape[:2]
    out = jax.nn.relu(bn(conv(x, params["conv1_w"], stride, 1),
                         params["bn1_g"], params["bn1_b"]))
    out = bn(conv(out, params["conv2_w"], 1, 1),
             params["bn2_g"], params["bn2_b"])
    if stride != 1 or Cin != P:
        sc = bn(conv(x, params["sc_w"], stride, 0),
                params["bn_s_g"], params["bn_s_b"])
    else:
        sc = x
    return jax.nn.relu(out + sc)


def init_params(key, in_planes, planes, stride):
    ks = jax.random.split(key, 8)
    p = {
        "conv1_w": 0.1 * jax.random.normal(ks[0], (planes, in_planes, 3, 3), jnp.float32),
        "bn1_g": 1.0 + 0.1 * jax.random.normal(ks[1], (planes,), jnp.float32),
        "bn1_b": 0.1 * jax.random.normal(ks[2], (planes,), jnp.float32),
        "conv2_w": 0.1 * jax.random.normal(ks[3], (planes, planes, 3, 3), jnp.float32),
        "bn2_g": 1.0 + 0.1 * jax.random.normal(ks[4], (planes,), jnp.float32),
        "bn2_b": 0.1 * jax.random.normal(ks[5], (planes,), jnp.float32),
    }
    if stride != 1 or in_planes != planes:
        p["sc_w"] = 0.1 * jax.random.normal(ks[6], (planes, in_planes, 1, 1), jnp.float32)
        p["bn_s_g"] = 1.0 + 0.1 * jax.random.normal(ks[7], (planes,), jnp.float32)
        p["bn_s_b"] = jnp.zeros((planes,), jnp.float32)
    return p


if __name__ == "__main__":
    key = jax.random.PRNGKey(0)
    kx, kp1, kp2 = jax.random.split(key, 3)

    # Case 1: projection shortcut (stride=2, in_planes != planes)
    x1 = jax.random.normal(kx, (2, 4, 16, 16), jnp.float32)
    p1 = init_params(kp1, 4, 8, 2)
    y1 = jax.block_until_ready(basic_block_forward(x1, p1, 2))
    r1 = ref_forward(x1, p1, 2)
    assert y1.shape == (2, 8, 8, 8)
    # tolerance accounts for the bf16 MXU / bf16 inter-stage path vs f32 ref
    assert jnp.allclose(y1, r1, atol=5e-2, rtol=5e-2), (
        "projection case mismatch: max abs err %e"
        % float(jnp.max(jnp.abs(y1 - r1))))

    # Case 2: identity shortcut (stride=1, in_planes == planes)
    x2 = jax.random.normal(kx, (2, 8, 16, 16), jnp.float32)
    p2 = init_params(kp2, 8, 8, 1)
    y2 = jax.block_until_ready(basic_block_forward(x2, p2, 1))
    r2 = ref_forward(x2, p2, 1)
    assert y2.shape == (2, 8, 16, 16)
    assert jnp.allclose(y2, r2, atol=5e-2, rtol=5e-2), (
        "identity case mismatch: max abs err %e"
        % float(jnp.max(jnp.abs(y2 - r2))))

    print("KERNEL_OK")
</pallas_src>

<mosaic_0001>
module attributes {stable_mosaic.version = 11 : i64} {
  func.func @kernel(%arg0: i32, %arg1: memref<4x9x9x4xbf16, #tpu.memory_space<vmem>>, %arg2: memref<36x8xbf16, #tpu.memory_space<vmem>>, %arg3: memref<4x16xbf16, #tpu.memory_space<vmem>>, %arg4: memref<1x64x8xbf16, #tpu.memory_space<vmem>>, %arg5: memref<1x2x8xf32, #tpu.memory_space<vmem>>, %arg6: memref<1x64x8xbf16, #tpu.memory_space<vmem>>, %arg7: memref<1x2x8xf32, #tpu.memory_space<vmem>>) attributes {dimension_semantics = [#tpu.dimension_semantics<parallel>], iteration_bounds = array<i64: 2>, scalar_prefetch = 0 : i64, scratch_operands = 0 : i64, tpu.core_type = #tpu.core_type<tc>, window_params = [{transform_indices = @transform_0, window_bounds = array<i64: 4, 9, 9, 4>}, {pipeline_mode = #tpu.pipeline_mode<synchronous>, transform_indices = @transform_1, window_bounds = array<i64: 36, 8>}, {pipeline_mode = #tpu.pipeline_mode<synchronous>, transform_indices = @transform_2, window_bounds = array<i64: 4, 16>}, {transform_indices = @transform_3, window_bounds = array<i64: 1, 64, 8>}, {transform_indices = @transform_4, window_bounds = array<i64: 1, 2, 8>}, {transform_indices = @transform_5, window_bounds = array<i64: 1, 64, 8>}, {transform_indices = @transform_6, window_bounds = array<i64: 1, 2, 8>}]} {
    %cst = arith.constant 0.000000e+00 : f32
    %0 = vector.broadcast %cst : f32 to vector<64x8xf32>
    %c0 = arith.constant 0 : index
    %c0_0 = arith.constant 0 : index
    %c0_1 = arith.constant 0 : index
    %c0_2 = arith.constant 0 : index
    %1 = vector.load %arg1[%c0, %c0_0, %c0_1, %c0_2] : memref<4x9x9x4xbf16, #tpu.memory_space<vmem>>, vector<1x8x8x4xbf16>
    %2 = vector.shape_cast %1 : vector<1x8x8x4xbf16> to vector<8x8x4xbf16>
    %3 = vector.shape_cast %2 : vector<8x8x4xbf16> to vector<64x4xbf16>
    %c0_3 = arith.constant 0 : index
    %c0_4 = arith.constant 0 : index
    %4 = vector.load %arg2[%c0_3, %c0_4] : memref<36x8xbf16, #tpu.memory_space<vmem>>, vector<4x8xbf16>
    %cst_5 = arith.constant dense<0.000000e+00> : vector<64x8xf32>
    %5 = tpu.matmul %3, %4, %cst_5 {dimension_numbers = #tpu.dot_dimension_numbers<[1], [0], [0], [1], [0, 0, 1, 1], [], []>} : vector<64x4xbf16>, vector<4x8xbf16>, vector<64x8xf32> -> vector<64x8xf32>
    %6 = arith.addf %0, %5 : vector<64x8xf32>
    %c1 = arith.constant 1 : index
    %c0_6 = arith.constant 0 : index
    %c0_7 = arith.constant 0 : index
    %c0_8 = arith.constant 0 : index
    %7 = vector.load %arg1[%c1, %c0_6, %c0_7, %c0_8] : memref<4x9x9x4xbf16, #tpu.memory_space<vmem>>, vector<1x8x8x4xbf16>
    %8 = vector.shape_cast %7 : vector<1x8x8x4xbf16> to vector<8x8x4xbf16>
    %9 = vector.shape_cast %8 : vector<8x8x4xbf16> to vector<64x4xbf16>
    %c4 = arith.constant 4 : index
    %c0_9 = arith.constant 0 : index
    %10 = vector.load %arg2[%c4, %c0_9] : memref<36x8xbf16, #tpu.memory_space<vmem>>, vector<4x8xbf16>
    %cst_10 = arith.constant dense<0.000000e+00> : vector<64x8xf32>
    %11 = tpu.matmul %9, %10, %cst_10 {dimension_numbers = #tpu.dot_dimension_numbers<[1], [0], [0], [1], [0, 0, 1, 1], [], []>} : vector<64x4xbf16>, vector<4x8xbf16>, vector<64x8xf32> -> vector<64x8xf32>
    %12 = arith.addf %6, %11 : vector<64x8xf32>
    %c0_11 = arith.constant 0 : index
    %c0_12 = arith.constant 0 : index
    %c1_13 = arith.constant 1 : index
    %c0_14 = arith.constant 0 : index
    %13 = vector.load %arg1[%c0_11, %c0_12, %c1_13, %c0_14] : memref<4x9x9x4xbf16, #tpu.memory_space<vmem>>, vector<1x8x8x4xbf16>
    %14 = vector.shape_cast %13 : vector<1x8x8x4xbf16> to vector<8x8x4xbf16>
    %15 = vector.shape_cast %14 : vector<8x8x4xbf16> to vector<64x4xbf16>
    %c8 = arith.constant 8 : index
    %c0_15 = arith.constant 0 : index
    %16 = vector.load %arg2[%c8, %c0_15] : memref<36x8xbf16, #tpu.memory_space<vmem>>, vector<4x8xbf16>
    %cst_16 = arith.constant dense<0.000000e+00> : vector<64x8xf32>
    %17 = tpu.matmul %15, %16, %cst_16 {dimension_numbers = #tpu.dot_dimension_numbers<[1], [0], [0], [1], [0, 0, 1, 1], [], []>} : vector<64x4xbf16>, vector<4x8xbf16>, vector<64x8xf32> -> vector<64x8xf32>
    %18 = arith.addf %12, %17 : vector<64x8xf32>
    %c2 = arith.constant 2 : index
    %c0_17 = arith.constant 0 : index
    %c0_18 = arith.constant 0 : index
    %c0_19 = arith.constant 0 : index
    %19 = vector.load %arg1[%c2, %c0_17, %c0_18, %c0_19] : memref<4x9x9x4xbf16, #tpu.memory_space<vmem>>, vector<1x8x8x4xbf16>
    %20 = vector.shape_cast %19 : vector<1x8x8x4xbf16> to vector<8x8x4xbf16>
    %21 = vector.shape_cast %20 : vector<8x8x4xbf16> to vector<64x4xbf16>
    %c12 = arith.constant 12 : index
    %c0_20 = arith.constant 0 : index
    %22 = vector.load %arg2[%c12, %c0_20] : memref<36x8xbf16, #tpu.memory_space<vmem>>, vector<4x8xbf16>
    %cst_21 = arith.constant dense<0.000000e+00> : vector<64x8xf32>
    %23 = tpu.matmul %21, %22, %cst_21 {dimension_numbers = #tpu.dot_dimension_numbers<[1], [0], [0], [1], [0, 0, 1, 1], [], []>} : vector<64x4xbf16>, vector<4x8xbf16>, vector<64x8xf32> -> vector<64x8xf32>
    %24 = arith.addf %18, %23 : vector<64x8xf32>
    %c3 = arith.constant 3 : index
    %c0_22 = arith.constant 0 : index
    %c0_23 = arith.constant 0 : index
    %c0_24 = arith.constant 0 : index
    %25 = vector.load %arg1[%c3, %c0_22, %c0_23, %c0_24] : memref<4x9x9x4xbf16, #tpu.memory_space<vmem>>, vector<1x8x8x4xbf16>
    %26 = vector.shape_cast %25 : vector<1x8x8x4xbf16> to vector<8x8x4xbf16>
    %27 = vector.shape_cast %26 : vector<8x8x4xbf16> to vector<64x4xbf16>
    %c0_25 = arith.constant 0 : index
    %c0_26 = arith.constant 0 : index
    %28 = vector.load %arg3[%c0_25, %c0_26] : memref<4x16xbf16, #tpu.memory_space<vmem>>, vector<4x16xbf16>
    %cst_27 = arith.constant dense<0.000000e+00> : vector<64x16xf32>
    %29 = tpu.matmul %27, %28, %cst_27 {dimension_numbers = #tpu.dot_dimension_numbers<[1], [0], [0], [1], [0, 0, 1, 1], [], []>} : vector<64x4xbf16>, vector<4x16xbf16>, vector<64x16xf32> -> vector<64x16xf32>
    %30 = vector.extract_strided_slice %29 {offsets = [0, 0], sizes = [64, 8], strides = [1, 1]} : vector<64x16xf32> to vector<64x8xf32>
    %31 = arith.addf %24, %30 : vector<64x8xf32>
    %32 = vector.extract_strided_slice %29 {offsets = [0, 8], sizes = [64, 8], strides = [1, 1]} : vector<64x16xf32> to vector<64x8xf32>
    %c2_28 = arith.constant 2 : index
    %c0_29 = arith.constant 0 : index
    %c1_30 = arith.constant 1 : index
    %c0_31 = arith.constant 0 : index
    %33 = vector.load %arg1[%c2_28, %c0_29, %c1_30, %c0_31] : memref<4x9x9x4xbf16, #tpu.memory_space<vmem>>, vector<1x8x8x4xbf16>
    %34 = vector.shape_cast %33 : vector<1x8x8x4xbf16> to vector<8x8x4xbf16>
    %35 = vector.shape_cast %34 : vector<8x8x4xbf16> to vector<64x4xbf16>
    %c20 = arith.constant 20 : index
    %c0_32 = arith.constant 0 : index
    %36 = vector.load %arg2[%c20, %c0_32] : memref<36x8xbf16, #tpu.memory_space<vmem>>, vector<4x8xbf16>
    %cst_33 = arith.constant dense<0.000000e+00> : vector<64x8xf32>
    %37 = tpu.matmul %35, %36, %cst_33 {dimension_numbers = #tpu.dot_dimension_numbers<[1], [0], [0], [1], [0, 0, 1, 1], [], []>} : vector<64x4xbf16>, vector<4x8xbf16>, vector<64x8xf32> -> vector<64x8xf32>
    %38 = arith.addf %31, %37 : vector<64x8xf32>
    %c0_34 = arith.constant 0 : index
    %c1_35 = arith.constant 1 : index
    %c0_36 = arith.constant 0 : index
    %c0_37 = arith.constant 0 : index
    %39 = vector.load %arg1[%c0_34, %c1_35, %c0_36, %c0_37] : memref<4x9x9x4xbf16, #tpu.memory_space<vmem>>, vector<1x8x8x4xbf16>
    %40 = vector.shape_cast %39 : vector<1x8x8x4xbf16> to vector<8x8x4xbf16>
    %41 = vector.shape_cast %40 : vector<8x8x4xbf16> to vector<64x4xbf16>
    %c24 = arith.constant 24 : index
    %c0_38 = arith.constant 0 : index
    %42 = vector.load %arg2[%c24, %c0_38] : memref<36x8xbf16, #tpu.memory_space<vmem>>, vector<4x8xbf16>
    %cst_39 = arith.constant dense<0.000000e+00> : vector<64x8xf32>
    %43 = tpu.matmul %41, %42, %cst_39 {dimension_numbers = #tpu.dot_dimension_numbers<[1], [0], [0], [1], [0, 0, 1, 1], [], []>} : vector<64x4xbf16>, vector<4x8xbf16>, vector<64x8xf32> -> vector<64x8xf32>
    %44 = arith.addf %38, %43 : vector<64x8xf32>
    %c1_40 = arith.constant 1 : index
    %c1_41 = arith.constant 1 : index
    %c0_42 = arith.constant 0 : index
    %c0_43 = arith.constant 0 : index
    %45 = vector.load %arg1[%c1_40, %c1_41, %c0_42, %c0_43] : memref<4x9x9x4xbf16, #tpu.memory_space<vmem>>, vector<1x8x8x4xbf16>
    %46 = vector.shape_cast %45 : vector<1x8x8x4xbf16> to vector<8x8x4xbf16>
    %47 = vector.shape_cast %46 : vector<8x8x4xbf16> to vector<64x4xbf16>
    %c28 = arith.constant 28 : index
    %c0_44 = arith.constant 0 : index
    %48 = vector.load %arg2[%c28, %c0_44] : memref<36x8xbf16, #tpu.memory_space<vmem>>, vector<4x8xbf16>
    %cst_45 = arith.constant dense<0.000000e+00> : vector<64x8xf32>
    %49 = tpu.matmul %47, %48, %cst_45 {dimension_numbers = #tpu.dot_dimension_numbers<[1], [0], [0], [1], [0, 0, 1, 1], [], []>} : vector<64x4xbf16>, vector<4x8xbf16>, vector<64x8xf32> -> vector<64x8xf32>
    %50 = arith.addf %44, %49 : vector<64x8xf32>
    %c0_46 = arith.constant 0 : index
    %c1_47 = arith.constant 1 : index
    %c1_48 = arith.constant 1 : index
    %c0_49 = arith.constant 0 : index
    %51 = vector.load %arg1[%c0_46, %c1_47, %c1_48, %c0_49] : memref<4x9x9x4xbf16, #tpu.memory_space<vmem>>, vector<1x8x8x4xbf16>
    %52 = vector.shape_cast %51 : vector<1x8x8x4xbf16> to vector<8x8x4xbf16>
    %53 = vector.shape_cast %52 : vector<8x8x4xbf16> to vector<64x4xbf16>
    %c32 = arith.constant 32 : index
    %c0_50 = arith.constant 0 : index
    %54 = vector.load %arg2[%c32, %c0_50] : memref<36x8xbf16, #tpu.memory_space<vmem>>, vector<4x8xbf16>
    %cst_51 = arith.constant dense<0.000000e+00> : vector<64x8xf32>
    %55 = tpu.matmul %53, %54, %cst_51 {dimension_numbers = #tpu.dot_dimension_numbers<[1], [0], [0], [1], [0, 0, 1, 1], [], []>} : vector<64x4xbf16>, vector<4x8xbf16>, vector<64x8xf32> -> vector<64x8xf32>
    %56 = arith.addf %50, %55 : vector<64x8xf32>
    %cst_52 = arith.constant dense<0.000000e+00> : vector<8xf32>
    %57 = vector.multi_reduction <add>, %56, %cst_52 [0] : vector<64x8xf32> to vector<8xf32>
    %58 = vector.shape_cast %57 : vector<8xf32> to vector<1x8xf32>
    %59 = arith.mulf %56, %56 : vector<64x8xf32>
    %cst_53 = arith.constant dense<0.000000e+00> : vector<8xf32>
    %60 = vector.multi_reduction <add>, %59, %cst_53 [0] : vector<64x8xf32> to vector<8xf32>
    %61 = vector.shape_cast %60 : vector<8xf32> to vector<1x8xf32>
    %62 = tpu.concatenate %58, %61 in 0 : vector<1x8xf32>, vector<1x8xf32> -> vector<2x8xf32>
    %c0_54 = arith.constant 0 : index
    %c0_55 = arith.constant 0 : index
    %c0_56 = arith.constant 0 : index
    %63 = vector.load %arg5[%c0_54, %c0_55, %c0_56] : memref<1x2x8xf32, #tpu.memory_space<vmem>>, vector<1x2x8xf32>
    %64 = vector.shape_cast %63 : vector<1x2x8xf32> to vector<2x8xf32>
    %65 = vector.shape_cast %62 : vector<2x8xf32> to vector<1x2x8xf32>
    tpu.vector_store %arg5[%c0_54, %c0_55, %c0_56], %65 {strides = array<i32>} : memref<1x2x8xf32, #tpu.memory_space<vmem>>, vector<1x2x8xf32>,
    %66 = arith.truncf %56 : vector<64x8xf32> to vector<64x8xbf16>
    %c0_57 = arith.constant 0 : index
    %c0_58 = arith.constant 0 : index
    %c0_59 = arith.constant 0 : index
    %67 = vector.load %arg4[%c0_57, %c0_58, %c0_59] : memref<1x64x8xbf16, #tpu.memory_space<vmem>>, vector<1x64x8xbf16>
    %68 = vector.shape_cast %67 : vector<1x64x8xbf16> to vector<64x8xbf16>
    %69 = vector.shape_cast %66 : vector<64x8xbf16> to vector<1x64x8xbf16>
    tpu.vector_store %arg4[%c0_57, %c0_58, %c0_59], %69 {strides = array<i32>} : memref<1x64x8xbf16, #tpu.memory_space<vmem>>, vector<1x64x8xbf16>,
    %cst_60 = arith.constant dense<0.000000e+00> : vector<8xf32>
    %70 = vector.multi_reduction <add>, %32, %cst_60 [0] : vector<64x8xf32> to vector<8xf32>
    %71 = vector.shape_cast %70 : vector<8xf32> to vector<1x8xf32>
    %72 = arith.mulf %32, %32 : vector<64x8xf32>
    %cst_61 = arith.constant dense<0.000000e+00> : vector<8xf32>
    %73 = vector.multi_reduction <add>, %72, %cst_61 [0] : vector<64x8xf32> to vector<8xf32>
    %74 = vector.shape_cast %73 : vector<8xf32> to vector<1x8xf32>
    %75 = tpu.concatenate %71, %74 in 0 : vector<1x8xf32>, vector<1x8xf32> -> vector<2x8xf32>
    %c0_62 = arith.constant 0 : index
    %c0_63 = arith.constant 0 : index
    %c0_64 = arith.constant 0 : index
    %76 = vector.load %arg7[%c0_62, %c0_63, %c0_64] : memref<1x2x8xf32, #tpu.memory_space<vmem>>, vector<1x2x8xf32>
    %77 = vector.shape_cast %76 : vector<1x2x8xf32> to vector<2x8xf32>
    %78 = vector.shape_cast %75 : vector<2x8xf32> to vector<1x2x8xf32>
    tpu.vector_store %arg7[%c0_62, %c0_63, %c0_64], %78 {strides = array<i32>} : memref<1x2x8xf32, #tpu.memory_space<vmem>>, vector<1x2x8xf32>,
    %79 = arith.truncf %32 : vector<64x8xf32> to vector<64x8xbf16>
    %c0_65 = arith.constant 0 : index
    %c0_66 = arith.constant 0 : index
    %c0_67 = arith.constant 0 : index
    %80 = vector.load %arg6[%c0_65, %c0_66, %c0_67] : memref<1x64x8xbf16, #tpu.memory_space<vmem>>, vector<1x64x8xbf16>
    %81 = vector.shape_cast %80 : vector<1x64x8xbf16> to vector<64x8xbf16>
    %82 = vector.shape_cast %79 : vector<64x8xbf16> to vector<1x64x8xbf16>
    tpu.vector_store %arg6[%c0_65, %c0_66, %c0_67], %82 {strides = array<i32>} : memref<1x64x8xbf16, #tpu.memory_space<vmem>>, vector<1x64x8xbf16>,
    return
  }
  func.func @transform_0(%arg0: i32) -> (i32, i32, i32, i32) {
    %c0_i32 = arith.constant 0 : i32
    %c0_i32_0 = arith.constant 0 : i32
    %c0_i32_1 = arith.constant 0 : i32
    %c0_i32_2 = arith.constant 0 : i32
    return %arg0, %c0_i32, %c0_i32_0, %c0_i32_1 : i32, i32, i32, i32
  }
  func.func @transform_1(%arg0: i32) -> (i32, i32) {
    %c0_i32 = arith.constant 0 : i32
    %c0_i32_0 = arith.constant 0 : i32
    %c0_i32_1 = arith.constant 0 : i32
    return %c0_i32, %c0_i32_0 : i32, i32
  }
  func.func @transform_2(%arg0: i32) -> (i32, i32) {
    %c0_i32 = arith.constant 0 : i32
    %c0_i32_0 = arith.constant 0 : i32
    %c0_i32_1 = arith.constant 0 : i32
    return %c0_i32, %c0_i32_0 : i32, i32
  }
  func.func @transform_3(%arg0: i32) -> (i32, i32, i32) {
    %c0_i32 = arith.constant 0 : i32
    %c0_i32_0 = arith.constant 0 : i32
    %c0_i32_1 = arith.constant 0 : i32
    return %arg0, %c0_i32, %c0_i32_0 : i32, i32, i32
  }
  func.func @transform_4(%arg0: i32) -> (i32, i32, i32) {
    %c0_i32 = arith.constant 0 : i32
    %c0_i32_0 = arith.constant 0 : i32
    %c0_i32_1 = arith.constant 0 : i32
    return %arg0, %c0_i32, %c0_i32_0 : i32, i32, i32
  }
  func.func @transform_5(%arg0: i32) -> (i32, i32, i32) {
    %c0_i32 = arith.constant 0 : i32
    %c0_i32_0 = arith.constant 0 : i32
    %c0_i32_1 = arith.constant 0 : i32
    return %arg0, %c0_i32, %c0_i32_0 : i32, i32, i32
  }
  func.func @transform_6(%arg0: i32) -> (i32, i32, i32) {
    %c0_i32 = arith.constant 0 : i32
    %c0_i32_0 = arith.constant 0 : i32
    %c0_i32_1 = arith.constant 0 : i32
    return %arg0, %c0_i32, %c0_i32_0 : i32, i32, i32
  }
}

module attributes {stable_mosaic.version = 11 : i64} {
  func.func @kernel(%arg0: i32, %arg1: memref<1x64x8xbf16, #tpu.memory_space<vmem>>, %arg2: memref<1x8xf32, #tpu.memory_space<vmem>>, %arg3: memref<1x8xf32, #tpu.memory_space<vmem>>, %arg4: memref<72x8xbf16, #tpu.memory_space<vmem>>, %arg5: memref<1x64x8xbf16, #tpu.memory_space<vmem>>, %arg6: memref<1x2x8xf32, #tpu.memory_space<vmem>>, %arg7: memref<10x10x8xbf16, #tpu.memory_space<vmem>>) attributes {dimension_semantics = [#tpu.dimension_semantics<parallel>], iteration_bounds = array<i64: 2>, scalar_prefetch = 0 : i64, scratch_operands = 1 : i64, tpu.core_type = #tpu.core_type<tc>, window_params = [{transform_indices = @transform_0, window_bounds = array<i64: 1, 64, 8>}, {pipeline_mode = #tpu.pipeline_mode<synchronous>, transform_indices = @transform_1, window_bounds = array<i64: 1, 8>}, {pipeline_mode = #tpu.pipeline_mode<synchronous>, transform_indices = @transform_2, window_bounds = array<i64: 1, 8>}, {pipeline_mode = #tpu.pipeline_mode<synchronous>, transform_indices = @transform_3, window_bounds = array<i64: 72, 8>}, {transform_indices = @transform_4, window_bounds = array<i64: 1, 64, 8>}, {transform_indices = @transform_5, window_bounds = array<i64: 1, 2, 8>}]} {
    %c0 = arith.constant 0 : index
    %c0_0 = arith.constant 0 : index
    %c0_1 = arith.constant 0 : index
    %0 = vector.load %arg1[%c0, %c0_0, %c0_1] : memref<1x64x8xbf16, #tpu.memory_space<vmem>>, vector<1x64x8xbf16>
    %1 = vector.shape_cast %0 : vector<1x64x8xbf16> to vector<64x8xbf16>
    %2 = arith.extf %1 : vector<64x8xbf16> to vector<64x8xf32>
    %c0_2 = arith.constant 0 : index
    %c0_3 = arith.constant 0 : index
    %3 = vector.load %arg2[%c0_2, %c0_3] : memref<1x8xf32, #tpu.memory_space<vmem>>, vector<1x8xf32>
    %4 = vector.broadcast %3 : vector<1x8xf32> to vector<64x8xf32>
    %5 = arith.mulf %2, %4 : vector<64x8xf32>
    %c0_4 = arith.constant 0 : index
    %c0_5 = arith.constant 0 : index
    %6 = vector.load %arg3[%c0_4, %c0_5] : memref<1x8xf32, #tpu.memory_space<vmem>>, vector<1x8xf32>
    %7 = vector.broadcast %6 : vector<1x8xf32> to vector<64x8xf32>
    %8 = arith.addf %5, %7 : vector<64x8xf32>
    %cst = arith.constant 0.000000e+00 : f32
    %9 = vector.broadcast %cst : f32 to vector<64x8xf32>
    %10 = arith.maximumf %8, %9 : vector<64x8xf32>
    %11 = vector.shape_cast %10 : vector<64x8xf32> to vector<8x8x8xf32>
    %12 = arith.truncf %11 : vector<8x8x8xf32> to vector<8x8x8xbf16>
    %cst_6 = arith.constant 0.000000e+00 : bf16
    %13 = vector.broadcast %cst_6 : bf16 to vector<8x1x8xbf16>
    %cst_7 = arith.constant 0.000000e+00 : bf16
    %14 = vector.broadcast %cst_7 : bf16 to vector<1x10x8xbf16>
    %15 = tpu.concatenate %13, %12, %13 in 1 : vector<8x1x8xbf16>, vector<8x8x8xbf16>, vector<8x1x8xbf16> -> vector<8x10x8xbf16>
    %16 = tpu.concatenate %14, %15, %14 in 0 : vector<1x10x8xbf16>, vector<8x10x8xbf16>, vector<1x10x8xbf16> -> vector<10x10x8xbf16>
    %c0_8 = arith.constant 0 : index
    %c0_9 = arith.constant 0 : index
    %c0_10 = arith.constant 0 : index
    %17 = vector.load %arg7[%c0_8, %c0_9, %c0_10] : memref<10x10x8xbf16, #tpu.memory_space<vmem>>, vector<10x10x8xbf16>
    tpu.vector_store %arg7[%c0_8, %c0_9, %c0_10], %16 {strides = array<i32>} : memref<10x10x8xbf16, #tpu.memory_space<vmem>>, vector<10x10x8xbf16>,
    %cst_11 = arith.constant 0.000000e+00 : f32
    %18 = vector.broadcast %cst_11 : f32 to vector<64x8xf32>
    %c0_12 = arith.constant 0 : index
    %c0_13 = arith.constant 0 : index
    %c0_14 = arith.constant 0 : index
    %19 = vector.load %arg7[%c0_12, %c0_13, %c0_14] : memref<10x10x8xbf16, #tpu.memory_space<vmem>>, vector<8x8x8xbf16>
    %20 = vector.shape_cast %19 : vector<8x8x8xbf16> to vector<64x8xbf16>
    %c0_15 = arith.constant 0 : index
    %c0_16 = arith.constant 0 : index
    %21 = vector.load %arg4[%c0_15, %c0_16] : memref<72x8xbf16, #tpu.memory_space<vmem>>, vector<8x8xbf16>
    %cst_17 = arith.constant dense<0.000000e+00> : vector<64x8xf32>
    %22 = tpu.matmul %20, %21, %cst_17 {dimension_numbers = #tpu.dot_dimension_numbers<[1], [0], [0], [1], [0, 0, 1, 1], [], []>} : vector<64x8xbf16>, vector<8x8xbf16>, vector<64x8xf32> -> vector<64x8xf32>
    %23 = arith.addf %18, %22 : vector<64x8xf32>
    %c0_18 = arith.constant 0 : index
    %c1 = arith.constant 1 : index
    %c0_19 = arith.constant 0 : index
    %24 = vector.load %arg7[%c0_18, %c1, %c0_19] : memref<10x10x8xbf16, #tpu.memory_space<vmem>>, vector<8x8x8xbf16>
    %25 = vector.shape_cast %24 : vector<8x8x8xbf16> to vector<64x8xbf16>
    %c8 = arith.constant 8 : index
    %c0_20 = arith.constant 0 : index
    %26 = vector.load %arg4[%c8, %c0_20] : memref<72x8xbf16, #tpu.memory_space<vmem>>, vector<8x8xbf16>
    %cst_21 = arith.constant dense<0.000000e+00> : vector<64x8xf32>
    %27 = tpu.matmul %25, %26, %cst_21 {dimension_numbers = #tpu.dot_dimension_numbers<[1], [0], [0], [1], [0, 0, 1, 1], [], []>} : vector<64x8xbf16>, vector<8x8xbf16>, vector<64x8xf32> -> vector<64x8xf32>
    %28 = arith.addf %23, %27 : vector<64x8xf32>
    %c0_22 = arith.constant 0 : index
    %c2 = arith.constant 2 : index
    %c0_23 = arith.constant 0 : index
    %29 = vector.load %arg7[%c0_22, %c2, %c0_23] : memref<10x10x8xbf16, #tpu.memory_space<vmem>>, vector<8x8x8xbf16>
    %30 = vector.shape_cast %29 : vector<8x8x8xbf16> to vector<64x8xbf16>
    %c16 = arith.constant 16 : index
    %c0_24 = arith.constant 0 : index
    %31 = vector.load %arg4[%c16, %c0_24] : memref<72x8xbf16, #tpu.memory_space<vmem>>, vector<8x8xbf16>
    %cst_25 = arith.constant dense<0.000000e+00> : vector<64x8xf32>
    %32 = tpu.matmul %30, %31, %cst_25 {dimension_numbers = #tpu.dot_dimension_numbers<[1], [0], [0], [1], [0, 0, 1, 1], [], []>} : vector<64x8xbf16>, vector<8x8xbf16>, vector<64x8xf32> -> vector<64x8xf32>
    %33 = arith.addf %28, %32 : vector<64x8xf32>
    %c1_26 = arith.constant 1 : index
    %c0_27 = arith.constant 0 : index
    %c0_28 = arith.constant 0 : index
    %34 = vector.load %arg7[%c1_26, %c0_27, %c0_28] : memref<10x10x8xbf16, #tpu.memory_space<vmem>>, vector<8x8x8xbf16>
    %35 = vector.shape_cast %34 : vector<8x8x8xbf16> to vector<64x8xbf16>
    %c24 = arith.constant 24 : index
    %c0_29 = arith.constant 0 : index
    %36 = vector.load %arg4[%c24, %c0_29] : memref<72x8xbf16, #tpu.memory_space<vmem>>, vector<8x8xbf16>
    %cst_30 = arith.constant dense<0.000000e+00> : vector<64x8xf32>
    %37 = tpu.matmul %35, %36, %cst_30 {dimension_numbers = #tpu.dot_dimension_numbers<[1], [0], [0], [1], [0, 0, 1, 1], [], []>} : vector<64x8xbf16>, vector<8x8xbf16>, vector<64x8xf32> -> vector<64x8xf32>
    %38 = arith.addf %33, %37 : vector<64x8xf32>
    %c1_31 = arith.constant 1 : index
    %c1_32 = arith.constant 1 : index
    %c0_33 = arith.constant 0 : index
    %39 = vector.load %arg7[%c1_31, %c1_32, %c0_33] : memref<10x10x8xbf16, #tpu.memory_space<vmem>>, vector<8x8x8xbf16>
    %40 = vector.shape_cast %39 : vector<8x8x8xbf16> to vector<64x8xbf16>
    %c32 = arith.constant 32 : index
    %c0_34 = arith.constant 0 : index
    %41 = vector.load %arg4[%c32, %c0_34] : memref<72x8xbf16, #tpu.memory_space<vmem>>, vector<8x8xbf16>
    %cst_35 = arith.constant dense<0.000000e+00> : vector<64x8xf32>
    %42 = tpu.matmul %40, %41, %cst_35 {dimension_numbers = #tpu.dot_dimension_numbers<[1], [0], [0], [1], [0, 0, 1, 1], [], []>} : vector<64x8xbf16>, vector<8x8xbf16>, vector<64x8xf32> -> vector<64x8xf32>
    %43 = arith.addf %38, %42 : vector<64x8xf32>
    %c1_36 = arith.constant 1 : index
    %c2_37 = arith.constant 2 : index
    %c0_38 = arith.constant 0 : index
    %44 = vector.load %arg7[%c1_36, %c2_37, %c0_38] : memref<10x10x8xbf16, #tpu.memory_space<vmem>>, vector<8x8x8xbf16>
    %45 = vector.shape_cast %44 : vector<8x8x8xbf16> to vector<64x8xbf16>
    %c40 = arith.constant 40 : index
    %c0_39 = arith.constant 0 : index
    %46 = vector.load %arg4[%c40, %c0_39] : memref<72x8xbf16, #tpu.memory_space<vmem>>, vector<8x8xbf16>
    %cst_40 = arith.constant dense<0.000000e+00> : vector<64x8xf32>
    %47 = tpu.matmul %45, %46, %cst_40 {dimension_numbers = #tpu.dot_dimension_numbers<[1], [0], [0], [1], [0, 0, 1, 1], [], []>} : vector<64x8xbf16>, vector<8x8xbf16>, vector<64x8xf32> -> vector<64x8xf32>
    %48 = arith.addf %43, %47 : vector<64x8xf32>
    %c2_41 = arith.constant 2 : index
    %c0_42 = arith.constant 0 : index
    %c0_43 = arith.constant 0 : index
    %49 = vector.load %arg7[%c2_41, %c0_42, %c0_43] : memref<10x10x8xbf16, #tpu.memory_space<vmem>>, vector<8x8x8xbf16>
    %50 = vector.shape_cast %49 : vector<8x8x8xbf16> to vector<64x8xbf16>
    %c48 = arith.constant 48 : index
    %c0_44 = arith.constant 0 : index
    %51 = vector.load %arg4[%c48, %c0_44] : memref<72x8xbf16, #tpu.memory_space<vmem>>, vector<8x8xbf16>
    %cst_45 = arith.constant dense<0.000000e+00> : vector<64x8xf32>
    %52 = tpu.matmul %50, %51, %cst_45 {dimension_numbers = #tpu.dot_dimension_numbers<[1], [0], [0], [1], [0, 0, 1, 1], [], []>} : vector<64x8xbf16>, vector<8x8xbf16>, vector<64x8xf32> -> vector<64x8xf32>
    %53 = arith.addf %48, %52 : vector<64x8xf32>
    %c2_46 = arith.constant 2 : index
    %c1_47 = arith.constant 1 : index
    %c0_48 = arith.constant 0 : index
    %54 = vector.load %arg7[%c2_46, %c1_47, %c0_48] : memref<10x10x8xbf16, #tpu.memory_space<vmem>>, vector<8x8x8xbf16>
    %55 = vector.shape_cast %54 : vector<8x8x8xbf16> to vector<64x8xbf16>
    %c56 = arith.constant 56 : index
    %c0_49 = arith.constant 0 : index
    %56 = vector.load %arg4[%c56, %c0_49] : memref<72x8xbf16, #tpu.memory_space<vmem>>, vector<8x8xbf16>
    %cst_50 = arith.constant dense<0.000000e+00> : vector<64x8xf32>
    %57 = tpu.matmul %55, %56, %cst_50 {dimension_numbers = #tpu.dot_dimension_numbers<[1], [0], [0], [1], [0, 0, 1, 1], [], []>} : vector<64x8xbf16>, vector<8x8xbf16>, vector<64x8xf32> -> vector<64x8xf32>
    %58 = arith.addf %53, %57 : vector<64x8xf32>
    %c2_51 = arith.constant 2 : index
    %c2_52 = arith.constant 2 : index
    %c0_53 = arith.constant 0 : index
    %59 = vector.load %arg7[%c2_51, %c2_52, %c0_53] : memref<10x10x8xbf16, #tpu.memory_space<vmem>>, vector<8x8x8xbf16>
    %60 = vector.shape_cast %59 : vector<8x8x8xbf16> to vector<64x8xbf16>
    %c64 = arith.constant 64 : index
    %c0_54 = arith.constant 0 : index
    %61 = vector.load %arg4[%c64, %c0_54] : memref<72x8xbf16, #tpu.memory_space<vmem>>, vector<8x8xbf16>
    %cst_55 = arith.constant dense<0.000000e+00> : vector<64x8xf32>
    %62 = tpu.matmul %60, %61, %cst_55 {dimension_numbers = #tpu.dot_dimension_numbers<[1], [0], [0], [1], [0, 0, 1, 1], [], []>} : vector<64x8xbf16>, vector<8x8xbf16>, vector<64x8xf32> -> vector<64x8xf32>
    %63 = arith.addf %58, %62 : vector<64x8xf32>
    %cst_56 = arith.constant dense<0.000000e+00> : vector<8xf32>
    %64 = vector.multi_reduction <add>, %63, %cst_56 [0] : vector<64x8xf32> to vector<8xf32>
    %65 = vector.shape_cast %64 : vector<8xf32> to vector<1x8xf32>
    %66 = arith.mulf %63, %63 : vector<64x8xf32>
    %cst_57 = arith.constant dense<0.000000e+00> : vector<8xf32>
    %67 = vector.multi_reduction <add>, %66, %cst_57 [0] : vector<64x8xf32> to vector<8xf32>
    %68 = vector.shape_cast %67 : vector<8xf32> to vector<1x8xf32>
    %69 = tpu.concatenate %65, %68 in 0 : vector<1x8xf32>, vector<1x8xf32> -> vector<2x8xf32>
    %c0_58 = arith.constant 0 : index
    %c0_59 = arith.constant 0 : index
    %c0_60 = arith.constant 0 : index
    %70 = vector.load %arg6[%c0_58, %c0_59, %c0_60] : memref<1x2x8xf32, #tpu.memory_space<vmem>>, vector<1x2x8xf32>
    %71 = vector.shape_cast %70 : vector<1x2x8xf32> to vector<2x8xf32>
    %72 = vector.shape_cast %69 : vector<2x8xf32> to vector<1x2x8xf32>
    tpu.vector_store %arg6[%c0_58, %c0_59, %c0_60], %72 {strides = array<i32>} : memref<1x2x8xf32, #tpu.memory_space<vmem>>, vector<1x2x8xf32>,
    %73 = arith.truncf %63 : vector<64x8xf32> to vector<64x8xbf16>
    %c0_61 = arith.constant 0 : index
    %c0_62 = arith.constant 0 : index
    %c0_63 = arith.constant 0 : index
    %74 = vector.load %arg5[%c0_61, %c0_62, %c0_63] : memref<1x64x8xbf16, #tpu.memory_space<vmem>>, vector<1x64x8xbf16>
    %75 = vector.shape_cast %74 : vector<1x64x8xbf16> to vector<64x8xbf16>
    %76 = vector.shape_cast %73 : vector<64x8xbf16> to vector<1x64x8xbf16>
    tpu.vector_store %arg5[%c0_61, %c0_62, %c0_63], %76 {strides = array<i32>} : memref<1x64x8xbf16, #tpu.memory_space<vmem>>, vector<1x64x8xbf16>,
    return
  }
  func.func @transform_0(%arg0: i32) -> (i32, i32, i32) {
    %c0_i32 = arith.constant 0 : i32
    %c0_i32_0 = arith.constant 0 : i32
    %c0_i32_1 = arith.constant 0 : i32
    return %arg0, %c0_i32, %c0_i32_0 : i32, i32, i32
  }
  func.func @transform_1(%arg0: i32) -> (i32, i32) {
    %c0_i32 = arith.constant 0 : i32
    %c0_i32_0 = arith.constant 0 : i32
    %c0_i32_1 = arith.constant 0 : i32
    return %c0_i32, %c0_i32_0 : i32, i32
  }
  func.func @transform_2(%arg0: i32) -> (i32, i32) {
    %c0_i32 = arith.constant 0 : i32
    %c0_i32_0 = arith.constant 0 : i32
    %c0_i32_1 = arith.constant 0 : i32
    return %c0_i32, %c0_i32_0 : i32, i32
  }
  func.func @transform_3(%arg0: i32) -> (i32, i32) {
    %c0_i32 = arith.constant 0 : i32
    %c0_i32_0 = arith.constant 0 : i32
    %c0_i32_1 = arith.constant 0 : i32
    return %c0_i32, %c0_i32_0 : i32, i32
  }
  func.func @transform_4(%arg0: i32) -> (i32, i32, i32) {
    %c0_i32 = arith.constant 0 : i32
    %c0_i32_0 = arith.constant 0 : i32
    %c0_i32_1 = arith.constant 0 : i32
    return %arg0, %c0_i32, %c0_i32_0 : i32, i32, i32
  }
  func.func @transform_5(%arg0: i32) -> (i32, i32, i32) {
    %c0_i32 = arith.constant 0 : i32
    %c0_i32_0 = arith.constant 0 : i32
    %c0_i32_1 = arith.constant 0 : i32
    return %arg0, %c0_i32, %c0_i32_0 : i32, i32, i32
  }
}

module attributes {stable_mosaic.version = 11 : i64} {
  func.func @kernel(%arg0: i32, %arg1: memref<128x8xbf16, #tpu.memory_space<vmem>>, %arg2: memref<128x8xbf16, #tpu.memory_space<vmem>>, %arg3: memref<1x8xf32, #tpu.memory_space<vmem>>, %arg4: memref<1x8xf32, #tpu.memory_space<vmem>>, %arg5: memref<1x8xf32, #tpu.memory_space<vmem>>, %arg6: memref<1x8xf32, #tpu.memory_space<vmem>>, %arg7: memref<128x8xf32, #tpu.memory_space<vmem>>) attributes {dimension_semantics = [#tpu.dimension_semantics<parallel>], iteration_bounds = array<i64: 1>, scalar_prefetch = 0 : i64, scratch_operands = 0 : i64, tpu.core_type = #tpu.core_type<tc>, window_params = [{transform_indices = @transform_0, window_bounds = array<i64: 128, 8>}, {transform_indices = @transform_1, window_bounds = array<i64: 128, 8>}, {pipeline_mode = #tpu.pipeline_mode<synchronous>, transform_indices = @transform_2, window_bounds = array<i64: 1, 8>}, {pipeline_mode = #tpu.pipeline_mode<synchronous>, transform_indices = @transform_3, window_bounds = array<i64: 1, 8>}, {pipeline_mode = #tpu.pipeline_mode<synchronous>, transform_indices = @transform_4, window_bounds = array<i64: 1, 8>}, {pipeline_mode = #tpu.pipeline_mode<synchronous>, transform_indices = @transform_5, window_bounds = array<i64: 1, 8>}, {transform_indices = @transform_6, window_bounds = array<i64: 128, 8>}]} {
    %c0 = arith.constant 0 : index
    %c0_0 = arith.constant 0 : index
    %0 = vector.load %arg2[%c0, %c0_0] : memref<128x8xbf16, #tpu.memory_space<vmem>>, vector<128x8xbf16>
    %1 = arith.extf %0 : vector<128x8xbf16> to vector<128x8xf32>
    %c0_1 = arith.constant 0 : index
    %c0_2 = arith.constant 0 : index
    %2 = vector.load %arg5[%c0_1, %c0_2] : memref<1x8xf32, #tpu.memory_space<vmem>>, vector<1x8xf32>
    %3 = vector.broadcast %2 : vector<1x8xf32> to vector<128x8xf32>
    %4 = arith.mulf %1, %3 : vector<128x8xf32>
    %c0_3 = arith.constant 0 : index
    %c0_4 = arith.constant 0 : index
    %5 = vector.load %arg6[%c0_3, %c0_4] : memref<1x8xf32, #tpu.memory_space<vmem>>, vector<1x8xf32>
    %6 = vector.broadcast %5 : vector<1x8xf32> to vector<128x8xf32>
    %7 = arith.addf %4, %6 : vector<128x8xf32>
    %c0_5 = arith.constant 0 : index
    %c0_6 = arith.constant 0 : index
    %8 = vector.load %arg1[%c0_5, %c0_6] : memref<128x8xbf16, #tpu.memory_space<vmem>>, vector<128x8xbf16>
    %9 = arith.extf %8 : vector<128x8xbf16> to vector<128x8xf32>
    %c0_7 = arith.constant 0 : index
    %c0_8 = arith.constant 0 : index
    %10 = vector.load %arg3[%c0_7, %c0_8] : memref<1x8xf32, #tpu.memory_space<vmem>>, vector<1x8xf32>
    %11 = vector.broadcast %10 : vector<1x8xf32> to vector<128x8xf32>
    %12 = arith.mulf %9, %11 : vector<128x8xf32>
    %c0_9 = arith.constant 0 : index
    %c0_10 = arith.constant 0 : index
    %13 = vector.load %arg4[%c0_9, %c0_10] : memref<1x8xf32, #tpu.memory_space<vmem>>, vector<1x8xf32>
    %14 = vector.broadcast %13 : vector<1x8xf32> to vector<128x8xf32>
    %15 = arith.addf %12, %14 : vector<128x8xf32>
    %16 = arith.addf %15, %7 : vector<128x8xf32>
    %cst = arith.constant 0.000000e+00 : f32
    %17 = vector.broadcast %cst : f32 to vector<128x8xf32>
    %18 = arith.maximumf %16, %17 : vector<128x8xf32>
    %c0_11 = arith.constant 0 : index
    %c0_12 = arith.constant 0 : index
    %19 = vector.load %arg7[%c0_11, %c0_12] : memref<128x8xf32, #tpu.memory_space<vmem>>, vector<128x8xf32>
    tpu.vector_store %arg7[%c0_11, %c0_12], %18 {strides = array<i32>} : memref<128x8xf32, #tpu.memory_space<vmem>>, vector<128x8xf32>,
    return
  }
  func.func @transform_0(%arg0: i32) -> (i32, i32) {
    %c0_i32 = arith.constant 0 : i32
    %c0_i32_0 = arith.constant 0 : i32
    return %arg0, %c0_i32 : i32, i32
  }
  func.func @transform_1(%arg0: i32) -> (i32, i32) {
    %c0_i32 = arith.constant 0 : i32
    %c0_i32_0 = arith.constant 0 : i32
    return %arg0, %c0_i32 : i32, i32
  }
  func.func @transform_2(%arg0: i32) -> (i32, i32) {
    %c0_i32 = arith.constant 0 : i32
    %c0_i32_0 = arith.constant 0 : i32
    %c0_i32_1 = arith.constant 0 : i32
    return %c0_i32, %c0_i32_0 : i32, i32
  }
  func.func @transform_3(%arg0: i32) -> (i32, i32) {
    %c0_i32 = arith.constant 0 : i32
    %c0_i32_0 = arith.constant 0 : i32
    %c0_i32_1 = arith.constant 0 : i32
    return %c0_i32, %c0_i32_0 : i32, i32
  }
  func.func @transform_4(%arg0: i32) -> (i32, i32) {
    %c0_i32 = arith.constant 0 : i32
    %c0_i32_0 = arith.constant 0 : i32
    %c0_i32_1 = arith.constant 0 : i32
    return %c0_i32, %c0_i32_0 : i32, i32
  }
  func.func @transform_5(%arg0: i32) -> (i32, i32) {
    %c0_i32 = arith.constant 0 : i32
    %c0_i32_0 = arith.constant 0 : i32
    %c0_i32_1 = arith.constant 0 : i32
    return %c0_i32, %c0_i32_0 : i32, i32
  }
  func.func @transform_6(%arg0: i32) -> (i32, i32) {
    %c0_i32 = arith.constant 0 : i32
    %c0_i32_0 = arith.constant 0 : i32
    return %arg0, %c0_i32 : i32, i32
  }
}

</mosaic_0001>

<bundles_post_ra>
// kernel: basic_block_forward.5
= control target key start
LH: loop header
LB: loop body
LE: loop exit
PB: predicated region body
PF: predicated region fallthrough
CT: control target
= control target key end

     0   :  { %vm199_vm0 = vcmask 64512   ;;  %s533_s0 = inlined_call_operand.vmem [shape: bf16[128,8], index: 0, kind: input, shape index: {}]   ;;  %s534_s1 = inlined_call_operand.vmem [shape: bf16[128,8], index: 1, kind: input, shape index: {}]   ;;  %s535_s2 = inlined_call_operand.vmem [shape: f32[1,8], index: 2, kind: input, shape index: {}]   ;;  %s536_s4 = inlined_call_operand.vmem [shape: f32[1,8], index: 4, kind: input, shape index: {}]   ;;  %s537_s5 = inlined_call_operand.vmem [shape: f32[1,8], index: 5, kind: input, shape index: {}]   ;;  %s538_s3 = inlined_call_operand.vmem [shape: f32[1,8], index: 3, kind: input, shape index: {}]   ;;  %s539_s6 = inlined_call_operand.vmem [shape: f32[128,8], index: 6, kind: output, shape index: {}]  }
   0x1   :  { %v221_v0 = vld [vmem:[%s534_s1] sm:$0xff]   ;;  %v284_v12 = vld [vmem:[%s534_s1 + $0x8] sm:$0xff]   ;;  %v285_v18 = vld [vmem:[%s534_s1 + $0x10] sm:$0xff]  }
   0x2   :  { %v343_v1 = vld [vmem:[%s536_s4] ss:$0 sm:$0xff]  ;;  %v222_v2 = vunpack.c.l.bf16 %v221_v0  ;;  %v223_v5 = vunpack.c.h.bf16 %v221_v0  ;;  %v291_v13 = vld [vmem:[%s533_s0 + $0x8] sm:$0xff]   ;;  %v226_v16 = vunpack.c.l.bf16 %v284_v12  ;;  %v292_v19 = vld [vmem:[%s533_s0 + $0x10] sm:$0xff]   ;;  %v227_v22 = vunpack.c.h.bf16 %v284_v12 }
   0x3   :  { %v348_v3 = vld [vmem:[%s537_s5] ss:$0 sm:$0xff]  ;;  %v258_v17 = vunpack.c.l.bf16 %v291_v13  ;;  %v259_v23 = vunpack.c.h.bf16 %v291_v13  ;;  %v230_v30 = vunpack.c.l.bf16 %v285_v18  ;;  %v262_v31 = vunpack.c.l.bf16 %v292_v19  ;;  %v286_v40 = vld [vmem:[%s534_s1 + $0x18] sm:$0xff]   ;;  %v288_v12 = vld [vmem:[%s534_s1 + $0x28] sm:$0xff]  }
   0x4   :  { %v253_v4 = vld [vmem:[%s533_s0] sm:$0xff]   ;;  %v59_v9 = vmul.f32 %v343_v1, %v222_v2  ;;  %v60_v11 = vmul.f32 %v343_v1, %v223_v5  ;;  %v61_v26 = vmul.f32 %v343_v1, %v226_v16  ;;  %v62_v28 = vmul.f32 %v343_v1, %v227_v22  ;;  %v293_v41 = vld [vmem:[%s533_s0 + $0x18] sm:$0xff]  }
   0x5   :  { %v254_v6 = vunpack.c.l.bf16 %v253_v4  ;;  %v356_v7 = vld [vmem:[%s535_s2] ss:$0 sm:$0xff]  ;;  %v255_v8 = vunpack.c.h.bf16 %v253_v4  ;;  %v63_v38 = vmul.f32 %v343_v1, %v230_v30  ;;  %v231_v45 = vunpack.c.h.bf16 %v285_v18  ;;  %v289_v30 = vld [vmem:[%s534_s1 + $0x30] sm:$0xff]  }
   0x6   :  { %v362_v10 = vld [vmem:[%s538_s3] ss:$0 sm:$0xff]  ;;  %v79_v20 = vadd.f32 %v348_v3, %v59_v9  ;;  %v80_v21 = vadd.f32 %v348_v3, %v60_v11  ;;  %v133_v27 = vmul.f32 %v356_v7, %v258_v17  ;;  %v134_v29 = vmul.f32 %v356_v7, %v259_v23 }
   0x7   :  { %v131_v14 = vmul.f32 %v356_v7, %v254_v6  ;;  %v132_v15 = vmul.f32 %v356_v7, %v255_v8  ;;  %v81_v34 = vadd.f32 %v348_v3, %v61_v26  ;;  %v82_v36 = vadd.f32 %v348_v3, %v62_v28  ;;  %v287_v54 = vld [vmem:[%s534_s1 + $0x20] sm:$0xff]  }
   0x8   :  { %v153_v35 = vadd.f32 %v362_v10, %v133_v27  ;;  %v154_v37 = vadd.f32 %v362_v10, %v134_v29  ;;  %v135_v39 = vmul.f32 %v356_v7, %v262_v31  ;;  %v83_v47 = vadd.f32 %v348_v3, %v63_v38  ;;  %v294_v59 = vld [vmem:[%s533_s0 + $0x20] sm:$0xff]  }
   0x9   :  { %v151_v24 = vadd.f32 %v362_v10, %v131_v14  ;;  %v152_v25 = vadd.f32 %v362_v10, %v132_v15  ;;  %v263_v49 = vunpack.c.h.bf16 %v292_v19  ;;  %v64_v51 = vmul.f32 %v343_v1, %v231_v45 }
   0xa   :  { %v169_v44 = vadd.f32 %v153_v35, %v81_v34  ;;  %v170_v46 = vadd.f32 %v154_v37, %v82_v36  ;;  %v155_v48 = vadd.f32 %v362_v10, %v135_v39  ;;  %v234_v52 = vunpack.c.l.bf16 %v286_v40  ;;  %v296_v35 = vld [vmem:[%s533_s0 + $0x30] sm:$0xff]  }
   0xb   :  { %v167_v32 = vadd.f32 %v151_v24, %v79_v20  ;;  %v168_v33 = vadd.f32 %v152_v25, %v80_v21  ;;  %v266_v53 = vunpack.c.l.bf16 %v293_v41  ;;  %v136_v57 = vmul.f32 %v356_v7, %v263_v49  ;;  %v295_v21 = vld [vmem:[%s533_s0 + $0x28] sm:$0xff]  }
   0xc   :  { %v185_v50 = vmax.f32 %v169_v44, 0.0  ;;  %v186_v55 = vmax.f32 %v170_v46, 0.0  ;;  %v171_v56 = vadd.f32 %v155_v48, %v83_v47  ;;  %v235_v58 = vunpack.c.h.bf16 %v286_v40  ;;  %v290_v48 = vld [vmem:[%s534_s1 + $0x38] sm:$0xff]  }
   0xd   :  { %v183_v42 = vmax.f32 %v167_v32, 0.0  ;;  %v184_v43 = vmax.f32 %v168_v33, 0.0  ;;  %v84_v60 = vadd.f32 %v348_v3, %v64_v51  ;;  %v65_v61 = vmul.f32 %v343_v1, %v234_v52 }
   0xe   :  { %202 = vst.msk [vmem:[%s539_s6 + $0x10] sm:$0xff] %vm199_vm0, %v185_v50  ;;  %v137_v62 = vmul.f32 %v356_v7, %v266_v53  ;;  %v267_v63 = vunpack.c.h.bf16 %v293_v41  ;;  %v187_v0 = vmax.f32 %v171_v56, 0.0  ;;  %v156_v2 = vadd.f32 %v362_v10, %v136_v57  ;;  %v297_v53 = vld [vmem:[%s533_s0 + $0x38] sm:$0xff]  }
   0xf   :  { %200 = vst.msk [vmem:[%s539_s6] sm:$0xff] %vm199_vm0, %v183_v42  ;;  %v66_v4 = vmul.f32 %v343_v1, %v235_v58  ;;  %v238_v5 = vunpack.c.l.bf16 %v287_v54  ;;  %v85_v6 = vadd.f32 %v348_v3, %v65_v61  ;;  %v270_v11 = vunpack.c.l.bf16 %v294_v59 }
  0x10   :  { %201 = vst.msk [vmem:[%s539_s6 + $0x8] sm:$0xff] %vm199_vm0, %v184_v43  ;;  %v157_v8 = vadd.f32 %v362_v10, %v137_v62  ;;  %v138_v9 = vmul.f32 %v356_v7, %v267_v63  ;;  %v172_v13 = vadd.f32 %v156_v2, %v84_v60  ;;  %v239_v16 = vunpack.c.h.bf16 %v287_v54 }
  0x11   :  { %203 = vst.msk [vmem:[%s539_s6 + $0x18] sm:$0xff] %vm199_vm0, %v186_v55  ;;  %v86_v14 = vadd.f32 %v348_v3, %v66_v4  ;;  %v67_v15 = vmul.f32 %v343_v1, %v238_v5  ;;  %v139_v19 = vmul.f32 %v356_v7, %v270_v11  ;;  %v271_v20 = vunpack.c.h.bf16 %v294_v59 }
  0x12   :  { %204 = vst.msk [vmem:[%s539_s6 + $0x20] sm:$0xff] %vm199_vm0, %v187_v0  ;;  %v173_v17 = vadd.f32 %v157_v8, %v85_v6  ;;  %v158_v18 = vadd.f32 %v362_v10, %v138_v9  ;;  %v188_v22 = vmax.f32 %v172_v13, 0.0  ;;  %v68_v24 = vmul.f32 %v343_v1, %v239_v16 }
  0x13   :  { %v87_v23 = vadd.f32 %v348_v3, %v67_v15  ;;  %v242_v25 = vunpack.c.l.bf16 %v288_v12  ;;  %v159_v28 = vadd.f32 %v362_v10, %v139_v19  ;;  %v140_v29 = vmul.f32 %v356_v7, %v271_v20 }
  0x14   :  { %v189_v26 = vmax.f32 %v173_v17, 0.0  ;;  %v174_v27 = vadd.f32 %v158_v18, %v86_v14  ;;  %205 = vst.msk [vmem:[%s539_s6 + $0x28] sm:$0xff] %vm199_vm0, %v188_v22  ;;  %v88_v31 = vadd.f32 %v348_v3, %v68_v24  ;;  %v274_v33 = vunpack.c.l.bf16 %v295_v21 }
  0x15   :  { %v69_v32 = vmul.f32 %v343_v1, %v242_v25  ;;  %v243_v34 = vunpack.c.h.bf16 %v288_v12  ;;  %v175_v37 = vadd.f32 %v159_v28, %v87_v23  ;;  %v160_v38 = vadd.f32 %v362_v10, %v140_v29 }
  0x16   :  { %206 = vst.msk [vmem:[%s539_s6 + $0x30] sm:$0xff] %vm199_vm0, %v189_v26  ;;  %v190_v36 = vmax.f32 %v174_v27, 0.0  ;;  %v275_v39 = vunpack.c.h.bf16 %v295_v21  ;;  %v141_v41 = vmul.f32 %v356_v7, %v274_v33  ;;  %v246_v43 = vunpack.c.l.bf16 %v289_v30 }
  0x17   :  { %v89_v40 = vadd.f32 %v348_v3, %v69_v32  ;;  %v70_v42 = vmul.f32 %v343_v1, %v243_v34  ;;  %v191_v44 = vmax.f32 %v175_v37, 0.0  ;;  %v176_v45 = vadd.f32 %v160_v38, %v88_v31 }
  0x18   :  { %207 = vst.msk [vmem:[%s539_s6 + $0x38] sm:$0xff] %vm199_vm0, %v190_v36  ;;  %v142_v46 = vmul.f32 %v356_v7, %v275_v39  ;;  %v278_v47 = vunpack.c.l.bf16 %v296_v35  ;;  %v161_v49 = vadd.f32 %v362_v10, %v141_v41  ;;  %v71_v51 = vmul.f32 %v343_v1, %v246_v43 }
  0x19   :  { %v90_v50 = vadd.f32 %v348_v3, %v70_v42  ;;  %v247_v52 = vunpack.c.h.bf16 %v289_v30  ;;  %208 = vst.msk [vmem:[%s539_s6 + $0x40] sm:$0xff] %vm199_vm0, %v191_v44  ;;  %v192_v54 = vmax.f32 %v176_v45, 0.0  ;;  %v279_v57 = vunpack.c.h.bf16 %v296_v35 }
  0x1a   :  { %v162_v55 = vadd.f32 %v362_v10, %v142_v46  ;;  %v143_v56 = vmul.f32 %v356_v7, %v278_v47  ;;  %v177_v58 = vadd.f32 %v161_v49, %v89_v40  ;;  %v91_v59 = vadd.f32 %v348_v3, %v71_v51 }
  0x1b   :  { %v72_v60 = vmul.f32 %v343_v1, %v247_v52  ;;  %v250_v61 = vunpack.c.l.bf16 %v290_v48  ;;  %209 = vst.msk [vmem:[%s539_s6 + $0x48] sm:$0xff] %vm199_vm0, %v192_v54  ;;  %v144_v0 = vmul.f32 %v356_v7, %v279_v57  ;;  %v282_v2 = vunpack.c.l.bf16 %v297_v53 }
  0x1c   :  { %v178_v62 = vadd.f32 %v162_v55, %v90_v50  ;;  %v163_v63 = vadd.f32 %v362_v10, %v143_v56  ;;  %v193_v4 = vmax.f32 %v177_v58, 0.0  ;;  %v251_v8 = vunpack.c.h.bf16 %v290_v48 }
  0x1d   :  { %v92_v5 = vadd.f32 %v348_v3, %v72_v60  ;;  %v73_v6 = vmul.f32 %v343_v1, %v250_v61  ;;  %v164_v12 = vadd.f32 %v362_v10, %v144_v0  ;;  %v145_v13 = vmul.f32 %v356_v7, %v282_v2 }
  0x1e   :  { %v194_v9 = vmax.f32 %v178_v62, 0.0  ;;  %v179_v11 = vadd.f32 %v163_v63, %v91_v59  ;;  %210 = vst.msk [vmem:[%s539_s6 + $0x50] sm:$0xff] %vm199_vm0, %v193_v4  ;;  %v74_v15 = vmul.f32 %v343_v1, %v251_v8  ;;  %v283_v16 = vunpack.c.h.bf16 %v297_v53 }
  0x1f   :  { %v93_v14 = vadd.f32 %v348_v3, %v73_v6  ;;  %v180_v18 = vadd.f32 %v164_v12, %v92_v5  ;;  %v165_v19 = vadd.f32 %v362_v10, %v145_v13 }
  0x20   :  { %211 = vst.msk [vmem:[%s539_s6 + $0x58] sm:$0xff] %vm199_vm0, %v194_v9  ;;  %v195_v17 = vmax.f32 %v179_v11, 0.0  ;;  %v94_v20 = vadd.f32 %v348_v3, %v74_v15  ;;  %v146_v21 = vmul.f32 %v356_v7, %v283_v16 }
  0x21   :  { %v196_v1 = vmax.f32 %v180_v18, 0.0  ;;  %v181_v22 = vadd.f32 %v165_v19, %v93_v14 }
  0x22   :  { %212 = vst.msk [vmem:[%s539_s6 + $0x60] sm:$0xff] %vm199_vm0, %v195_v17  ;;  %v166_v23 = vadd.f32 %v362_v10, %v146_v21 }
  0x23   :  { %213 = vst.msk [vmem:[%s539_s6 + $0x68] sm:$0xff] %vm199_vm0, %v196_v1  ;;  %v197_v24 = vmax.f32 %v181_v22, 0.0 }
  0x24   :  { %v182_v25 = vadd.f32 %v166_v23, %v94_v20 }
  0x25   :  { %214 = vst.msk [vmem:[%s539_s6 + $0x70] sm:$0xff] %vm199_vm0, %v197_v24 }
  0x26   :  { %v198_v3 = vmax.f32 %v182_v25, 0.0 }
  0x28   :  { %215 = vst.msk [vmem:[%s539_s6 + $0x78] sm:$0xff] %vm199_vm0, %v198_v3 }

// kernel: basic_block_forward.3
= control target key start
LH: loop header
LB: loop body
LE: loop exit
PB: predicated region body
PF: predicated region fallthrough
CT: control target
= control target key end

     0   :  { %s1995_s21 = smov 0   ;;  %s2376_s0 = inlined_call_operand.vmem [shape: bf16[8,9,9,4], index: 0, kind: input, shape index: {}]   ;;  %s2377_s1 = inlined_call_operand.vmem [shape: bf16[36,8], index: 1, kind: input, shape index: {}]   ;;  %s2378_s2 = inlined_call_operand.vmem [shape: bf16[4,16], index: 2, kind: input, shape index: {}]   ;;  %s2379_s3 = inlined_call_operand.vmem [shape: bf16[2,64,8], index: 3, kind: output, shape index: {0}]   ;;  %s2380_s4 = inlined_call_operand.vmem [shape: f32[2,2,8], index: 4, kind: output, shape index: {1}]   ;;  %s2381_s5 = inlined_call_operand.vmem [shape: bf16[2,64,8], index: 5, kind: output, shape index: {2}]   ;;  %s2382_s6 = inlined_call_operand.vmem [shape: f32[2,2,8], index: 6, kind: output, shape index: {3}]  }
   0x1 LB: > { %s2001_s22 = sadd.s32 4294967295, %s1957_s21   ;;  %p1697_p0 = scmp.ge.s32.totalorder %s1957_s21, 1  ;;  %s1957_s21 = sphi %s1995_s21, %s17_s21  }
   0x2   : > { %p221_p1 = scmp.lt.s32.totalorder %s1957_s21, 3 }
   0x4   : > { %p222_p2 = pnand %p1697_p0, %p221_p1 }
   0x5   : > { %s1698_s25 = sshll.u32 (!%p222_p2), %s2001_s22, 2  ;;  %s1959_s24 = smov (!%p222_p2), 120  }
   0x6   : > { %225 = sbr.rel (%p222_p2) target bundleno = 362 (0x16a), region = 32  ;;  %p266_p3 = scmp.lt.s32.totalorder (!%p222_p2), %s1698_s25, 7 }
   0x7   : > { %p272_p4 = scmp.lt.s32.totalorder (!%p222_p2), %s2001_s22, 1 }
   0xb   : > { %v309_v0 = vld [vmem:[%s2377_s1] sm:$0xc]  ;;  %v649_v2 = vld [vmem:[%s2377_s1 + $0x4] sm:$0xc]  ;;  %s2386_s25 = smov (!%p266_p3, %s1698_s25), 7  ;;  %vm347_vm0 = vcmask 1041408  }
   0xc   : > { %v331_v1 = vunpack.c.l.b16 %v309_v0  ;;  %v735_v4 = vld [vmem:[%s2378_s2] sm:$0x3]  ;;  %v671_v5 = vunpack.c.l.b16 %v649_v2  ;;  %v575_v7 = vld [vmem:[%s2377_s1 + $0x4] sm:$0x3]  ;;  %s1941_s10 = smul.u32 72, %s2386_s25  ;;  %vm334_vm1 = vcmask 31744  }
   0xd   : > { %v299_v6 = vld [vmem:[%s2377_s1] sm:$0x3]  ;;  %v769_v10 = vsel %vm347_vm0, %v735_v4, 0  ;;  %v601_v13 = vsel %vm347_vm0, %v575_v7, 0  ;;  %vm460_vm2 = vsmask.f32 3328 }
   0xe   : > { %v332_v3 = vpack.c.b16 %v331_v1, %v331_v1  ;;  %v672_v9 = vpack.c.b16 %v671_v5, %v671_v5  ;;  %s2026_s13 = scalar_lea.vmem %s2376_s0, %s1941_s10  ;;  %v413_v12 = vsel %vm347_vm0, %v299_v6, 0  ;;  %vm461_vm3 = vsmask.f32 7440  ;;  %s2388_s22 = smov (!%p272_p4, %s2001_s22), 1 }
   0xf   : > { %v1716_v15 = vld [vmem:[%s2026_s13 + $0x48] sm:$0xf]  ;;  %v1918_v16 = vld [vmem:[%s2026_s13 + $0x4c] sm:$0xf0]  ;;  %v1720_v17 = vld [vmem:[%s2026_s13 + $0x58] sm:$0xf] }
  0x10   : > { %v333_v8 = vrot.slane %v332_v3, 2  ;;  %v673_v14 = vrot.slane %v672_v9, 2  ;;  %v1717_v18 = vor.u32 %v1918_v16, %v1716_v15  ;;  %v1919_v19 = vld [vmem:[%s2026_s13 + $0x5c] sm:$0xf0]  ;;  %v1724_v20 = vld [vmem:[%s2026_s13 + $0x68] sm:$0xf]  ;;  %vm2049_vm4 = vmor %vm460_vm2, %vm461_vm3 }
  0x11   : > { %v1920_v21 = vld [vmem:[%s2026_s13 + $0x6c] sm:$0xf0]  ;;  %v1721_v22 = vor.u32 %v1919_v19, %v1720_v17  ;;  %v1728_v24 = vld [vmem:[%s2026_s13 + $0x78] sm:$0xf]  ;;  %v1921_v25 = vld [vmem:[%s2026_s13 + $0x7c] sm:$0xf0] }
  0x12   : > { %v349_v11 = vsel %vm347_vm0, %v333_v8, 0  ;;  %v1725_v23 = vor.u32 %v1920_v21, %v1724_v20  ;;  %v1729_v26 = vor.u32 %v1921_v25, %v1728_v24  ;;  %v687_v27 = vsel %vm347_vm0, %v673_v14, 0  ;;  %v444_v28 = vld [vmem:[%s2026_s13] sm:$0xf]  ;;  %v445_v29 = vld [vmem:[%s2026_s13 + $0x4] sm:$0x1] }
  0x13   : > { %358 = vmatpush.bf16.msra.mxu0 %v349_v11  ;;  %1938 = vmatpush.bf16.msra.mxu1 %v349_v11  ;;  %v446_v30 = vld [vmem:[%s2026_s13 + $0x8] sm:$0xf]  ;;  %v447_v31 = vld [vmem:[%s2026_s13 + $0xc] sm:$0x1]  ;;  %v464_v32 = vshrl.u32 %v444_v28, 16  ;;  %v467_v33 = vshll.u32 %v444_v28, 16 }
  0x14   : > { %1939 = vmatpush.bf16.msra.mxu2 %v349_v11  ;;  %1940 = vmatpush.bf16.msra.mxu3 %v349_v11  ;;  %v473_v34 = vshll.u32 %v445_v29, 16  ;;  %v478_v35 = vshrl.u32 %v446_v30, 16  ;;  %v481_v36 = vshll.u32 %v446_v30, 16  ;;  %v487_v37 = vshll.u32 %v447_v31, 16  ;;  %v448_v44 = vld [vmem:[%s2026_s13 + $0x10] sm:$0xf] }
  0x15   : > { %v466_v38 = vrot.slane %v464_v32, 4  ;;  %v469_v39 = vrot.slane %v467_v33, 5  ;;  %v450_v45 = vld [vmem:[%s2026_s13 + $0x18] sm:$0xf]  ;;  %v492_v49 = vshrl.u32 %v448_v44, 16  ;;  %v495_v50 = vshll.u32 %v448_v44, 16 }
  0x16   : > { %1730 = vmatmul.msk.bf16.vlgmr.msra.gmra.mxu0 %vm334_vm1, %v1717_v18  ;;  %1731 = vmatmul.msk.bf16.vlgmr.msra.gmra.mxu1 %vm334_vm1, %v1721_v22  ;;  %v480_v40 = vrot.slane %v478_v35, 4  ;;  %v483_v41 = vrot.slane %v481_v36, 5  ;;  %v475_v43 = vrot.slane %v473_v34, 5  ;;  %v489_v48 = vrot.slane %v487_v37, 5  ;;  %v1736_v51 = vld [vmem:[%s2026_s13] sm:$0xf] }
  0x17   : > { %778 = vmatpush.bf16.msrb.mxu0 %v769_v10  ;;  %422 = vmatpush.bf16.msrb.mxu1 %v413_v12  ;;  %v470_v42 = vor.u32 %v469_v39, %v466_v38  ;;  %v1914_v52 = vld [vmem:[%s2026_s13 + $0x4] sm:$0xf0]  ;;  %v1796_v54 = vld [vmem:[%s2026_s13 + $0xd8] sm:$0xf]  ;;  %v506_v55 = vshrl.u32 %v450_v45, 16  ;;  %v509_v56 = vshll.u32 %v450_v45, 16 }
  0x18   : > { %610 = vmatpush.bf16.msrb.mxu2 %v601_v13  ;;  %1733 = vmatmul.msk.bf16.vlgmr.msra.gmra.mxu3 %vm334_vm1, %v1729_v26  ;;  %v484_v47 = vor.u32 %v483_v41, %v480_v40  ;;  %v1926_v58 = vld [vmem:[%s2026_s13 + $0xdc] sm:$0xf0]  ;;  %v449_v59 = vld [vmem:[%s2026_s13 + $0x14] sm:$0x1]  ;;  %v494_v60 = vrot.slane %v492_v49, 4  ;;  %v497_v63 = vrot.slane %v495_v50, 5  ;;  %v1737_v8 = vor.u32 %v1914_v52, %v1736_v51 }
  0x19   : > { %1732 = vmatmul.msk.bf16.vlgmr.msra.gmra.mxu2 %vm334_vm1, %v1725_v23  ;;  %696 = vmatpush.bf16.msrb.mxu3 %v687_v27  ;;  %v471_v53 = vrot.slane %v470_v42, 4  ;;  %v451_v62 = vld [vmem:[%s2026_s13 + $0x1c] sm:$0x1]  ;;  %v508_v0 = vrot.slane %v506_v55, 4  ;;  %v511_v1 = vrot.slane %v509_v56, 5  ;;  %v1797_v7 = vor.u32 %v1926_v58, %v1796_v54  ;;  %s1912_s25 = sshll.u32 %s2388_s22, 5 }
  0x1a   : > { %v485_v57 = vrot.slane %v484_v47, 4  ;;  %v1768_v4 = vld [vmem:[%s2026_s13 + $0x90] sm:$0xf]  ;;  %v1922_v5 = vld [vmem:[%s2026_s13 + $0x94] sm:$0xf0]  ;;  %v501_v9 = vshll.u32 %v449_v59, 16  ;;  %v498_v13 = vor.u32 %v497_v63, %v494_v60  ;;  %s2298_s28 = scalar_lea.vmem %s2379_s3, %s1912_s25  ;;  %s2333_s7 = scalar_lea.vmem %s2381_s5, %s1912_s25 }
  0x1b   : > { %v476_v61 = vsel %vm2049_vm4, %v471_v53, %v475_v43  ;;  %v515_v10 = vshll.u32 %v451_v62, 16  ;;  %v1769_v12 = vor.u32 %v1922_v5, %v1768_v4  ;;  %v512_v14 = vor.u32 %v511_v1, %v508_v0  ;;  %v452_v17 = vld [vmem:[%s2026_s13 + $0x20] sm:$0xf]  ;;  %v454_v20 = vld [vmem:[%s2026_s13 + $0x28] sm:$0xf]  ;;  %s1702_s8 = sshll.u32 %s2388_s22, 1 }
  0x1c   : > { %v490_v2 = vsel %vm2049_vm4, %v485_v57, %v489_v48  ;;  %v576_v3 = vunpack.c.l.b16 %v476_v61  ;;  %v503_v15 = vrot.slane %v501_v9, 5  ;;  %v499_v18 = vrot.slane %v498_v13, 4  ;;  %v1014_v21 = vld [vmem:[%s2377_s1 + $0xc] sm:$0x3]  ;;  %v1740_v29 = vld [vmem:[%s2026_s13 + $0x10] sm:$0xf]  ;;  %s280_s11 = scalar_lea.vmem %s2380_s4, %s1702_s8 }
  0x1d   : > { %v577_v6 = vunpack.c.l.b16 %v490_v2  ;;  %v517_v16 = vrot.slane %v515_v10, 5  ;;  %v513_v19 = vrot.slane %v512_v14, 4  ;;  %v1048_v22 = vsel %vm347_vm0, %v1014_v21, 0  ;;  %v1915_v30 = vld [vmem:[%s2026_s13 + $0x14] sm:$0xf0] }
  0x1e   : > { %v520_v23 = vshrl.u32 %v452_v17, 16  ;;  %v523_v24 = vshll.u32 %v452_v17, 16  ;;  %1057 = vmatpush.bf16.msra.mxu2 %v1048_v22  ;;  %v534_v25 = vshrl.u32 %v454_v20, 16  ;;  %v537_v26 = vshll.u32 %v454_v20, 16  ;;  %v1800_v31 = vld [vmem:[%s2026_s13 + $0xe8] sm:$0xf] }
  0x1f   : > { %v584_v11 = vpack.c.b16 %v577_v6, %v576_v3  ;;  %v504_v27 = vsel %vm2049_vm4, %v499_v18, %v503_v15  ;;  %v518_v28 = vsel %vm2049_vm4, %v513_v19, %v517_v16  ;;  %v1927_v36 = vld [vmem:[%s2026_s13 + $0xec] sm:$0xf0]  ;;  %v453_v37 = vld [vmem:[%s2026_s13 + $0x24] sm:$0x1]  ;;  %v455_v40 = vld [vmem:[%s2026_s13 + $0x2c] sm:$0x1]  ;;  %v1741_v43 = vor.u32 %v1915_v30, %v1740_v29 }
  0x20   : > { %v522_v32 = vrot.slane %v520_v23, 4  ;;  %v525_v33 = vrot.slane %v523_v24, 5  ;;  %v578_v34 = vunpack.c.l.b16 %v504_v27  ;;  %v579_v35 = vunpack.c.l.b16 %v518_v28  ;;  %v1772_v41 = vld [vmem:[%s2026_s13 + $0xa0] sm:$0xf]  ;;  %v1923_v42 = vld [vmem:[%s2026_s13 + $0xa4] sm:$0xf0] }
  0x21   : > { %v536_v38 = vrot.slane %v534_v25, 4  ;;  %v539_v39 = vrot.slane %v537_v26, 5  ;;  %v1801_v44 = vor.u32 %v1927_v36, %v1800_v31  ;;  %v529_v45 = vshll.u32 %v453_v37, 16  ;;  %v456_v52 = vld [vmem:[%s2026_s13 + $0x30] sm:$0xf] }
  0x22   : > { %v585_v47 = vpack.c.b16 %v579_v35, %v578_v34  ;;  %v526_v48 = vor.u32 %v525_v33, %v522_v32  ;;  %v543_v50 = vshll.u32 %v455_v40, 16  ;;  %v1773_v51 = vor.u32 %v1923_v42, %v1772_v41  ;;  %v458_v53 = vld [vmem:[%s2026_s13 + $0x38] sm:$0xf]  ;;  %v1096_v58 = vld [vmem:[%s2377_s1 + $0xc] sm:$0xc] }
  0x23   : > { %v540_v49 = vor.u32 %v539_v39, %v536_v38  ;;  %v531_v55 = vrot.slane %v529_v45, 5  ;;  %v548_v59 = vshrl.u32 %v456_v52, 16  ;;  %v551_v60 = vshll.u32 %v456_v52, 16  ;;  %v936_v62 = vld [vmem:[%s2377_s1 + $0x8] sm:$0xc] }
  0x24   : > { %v527_v54 = vrot.slane %v526_v48, 4  ;;  %v545_v57 = vrot.slane %v543_v50, 5  ;;  %v1118_v61 = vunpack.c.l.b16 %v1096_v58  ;;  %v1301_v63 = vld [vmem:[%s2377_s1 + $0x10] sm:$0x3]  ;;  %v562_v0 = vshrl.u32 %v458_v53, 16 }
  0x25   : > { %v541_v56 = vrot.slane %v540_v49, 4  ;;  %v565_v1 = vshll.u32 %v458_v53, 16  ;;  %v950_v2 = vunpack.c.l.b16 %v936_v62  ;;  %v1327_v3 = vsel %vm347_vm0, %v1301_v63, 0  ;;  %v457_v14 = vld [vmem:[%s2026_s13 + $0x34] sm:$0x1] }
  0x26   : > { %1810 = vmatmul.msk.bf16.vlgmr.msrb.gmra.mxu0 %vm334_vm1, %v1797_v7  ;;  %1750 = vmatmul.msk.bf16.vlgmr.msrb.gmra.mxu1 %vm334_vm1, %v1737_v8  ;;  %v1119_v4 = vpack.c.b16 %v1118_v61, %v1118_v61  ;;  %v532_v6 = vsel %vm2049_vm4, %v527_v54, %v531_v55  ;;  %v550_v8 = vrot.slane %v548_v59, 4  ;;  %v553_v10 = vrot.slane %v551_v60, 5  ;;  %v459_v15 = vld [vmem:[%s2026_s13 + $0x3c] sm:$0x1]  ;;  %v1804_v19 = vld [vmem:[%s2026_s13 + $0xf8] sm:$0xf] }
  0x27   : > { %1336 = vmatpush.bf16.msra.mxu0 %v1327_v3  ;;  %v951_v5 = vpack.c.b16 %v950_v2, %v950_v2  ;;  %v546_v7 = vsel %vm2049_vm4, %v541_v56, %v545_v57  ;;  %v580_v17 = vunpack.c.l.b16 %v532_v6  ;;  %v1928_v20 = vld [vmem:[%s2026_s13 + $0xfc] sm:$0xf0]  ;;  %v1916_v23 = vld [vmem:[%s2026_s13 + $0x24] sm:$0xf0]  ;;  %v1776_v24 = vld [vmem:[%s2026_s13 + $0xb0] sm:$0xf] }
  0x28   : > { %1782 = vmatmul.msk.bf16.vlgmr.msrb.gmra.mxu3 %vm334_vm1, %v1769_v12  ;;  %v1120_v9 = vrot.slane %v1119_v4, 2  ;;  %v567_v12 = vrot.slane %v565_v1, 5  ;;  %v581_v18 = vunpack.c.l.b16 %v546_v7  ;;  %v1744_v22 = vld [vmem:[%s2026_s13 + $0x20] sm:$0xf]  ;;  %v1924_v25 = vld [vmem:[%s2026_s13 + $0xb4] sm:$0xf0]  ;;  %v554_v26 = vor.u32 %v553_v10, %v550_v8 }
  0x29   : > { %1754 = vmatmul.msk.bf16.vlgmr.msrb.gmra.mxu2 %vm334_vm1, %v584_v11  ;;  %v564_v11 = vrot.slane %v562_v0, 4  ;;  %v952_v13 = vrot.slane %v951_v5, 2  ;;  %v557_v27 = vshll.u32 %v457_v14, 16  ;;  %v571_v29 = vshll.u32 %v459_v15, 16  ;;  %v1814_v38 = vld [vmem:[%s2026_s13 + $0x90] sm:$0xf] }
  0x2a   : > { %v1134_v16 = vsel %vm347_vm0, %v1120_v9, 0  ;;  %v1805_v30 = vor.u32 %v1928_v20, %v1804_v19  ;;  %v1745_v31 = vor.u32 %v1916_v23, %v1744_v22  ;;  %v586_v32 = vpack.c.b16 %v581_v18, %v580_v17  ;;  %v1816_v39 = vld [vmem:[%s2026_s13 + $0x98] sm:$0xf]  ;;  %v1890_v40 = vld [vmem:[%s2026_s13 + $0x8] sm:$0xf] }
  0x2b   : > { %1143 = vmatpush.bf16.msra.mxu3 %v1134_v16  ;;  %v966_v21 = vsel %vm347_vm0, %v952_v13, 0  ;;  %v568_v28 = vor.u32 %v567_v12, %v564_v11  ;;  %v1777_v33 = vor.u32 %v1924_v25, %v1776_v24  ;;  %v555_v34 = vrot.slane %v554_v26, 4  ;;  %v1892_v41 = vld [vmem:[%s2026_s13 + $0x10] sm:$0xf]  ;;  %v1917_v54 = vld [vmem:[%s2026_s13 + $0x34] sm:$0xf0] }
  0x2c   : > { %975 = vmatpush.bf16.msra.mxu1 %v966_v21  ;;  %v559_v35 = vrot.slane %v557_v27, 5  ;;  %v573_v37 = vrot.slane %v571_v29, 5  ;;  %v828_v45 = vshll.u32 %v1814_v38, 16  ;;  %v842_v48 = vshll.u32 %v1816_v39, 16  ;;  %v1748_v53 = vld [vmem:[%s2026_s13 + $0x30] sm:$0xf] }
  0x2d   : > { %v569_v36 = vrot.slane %v568_v28, 4  ;;  %v1190_v49 = vshrl.u32 %v1890_v40, 16  ;;  %v1193_v50 = vshll.u32 %v1890_v40, 16  ;;  %v1207_v52 = vshll.u32 %v1892_v41, 16  ;;  %v1808_v57 = vld [vmem:[%s2026_s13 + $0x108] sm:$0xf] }
  0x2e   : > { %v560_v42 = vsel %vm2049_vm4, %v555_v34, %v559_v35  ;;  %v1815_v58 = vld [vmem:[%s2026_s13 + $0x94] sm:$0x1]  ;;  %v1817_v59 = vld [vmem:[%s2026_s13 + $0x9c] sm:$0x1]  ;;  %v830_v61 = vrot.slane %v828_v45, 5  ;;  %v844_v63 = vrot.slane %v842_v48, 5  ;;  %v1749_v7 = vor.u32 %v1917_v54, %v1748_v53 }
  0x2f   : > { %v582_v55 = vunpack.c.l.b16 %v560_v42  ;;  %v1929_v0 = vld [vmem:[%s2026_s13 + $0x10c] sm:$0xf0]  ;;  %v1192_v1 = vrot.slane %v1190_v49, 4  ;;  %v1195_v2 = vrot.slane %v1193_v50, 5  ;;  %v1209_v4 = vrot.slane %v1207_v52, 5 }
  0x30   : > { %v1891_v5 = vld [vmem:[%s2026_s13 + $0xc] sm:$0x1]  ;;  %v1893_v6 = vld [vmem:[%s2026_s13 + $0x14] sm:$0x1]  ;;  %v1780_v8 = vld [vmem:[%s2026_s13 + $0xc0] sm:$0xf]  ;;  %v1809_v13 = vor.u32 %v1929_v0, %v1808_v57 }
  0x31   : > { %v1925_v9 = vld [vmem:[%s2026_s13 + $0xc4] sm:$0xf0]  ;;  %v834_v10 = vshll.u32 %v1815_v58, 16  ;;  %v848_v11 = vshll.u32 %v1817_v59, 16  ;;  %v1196_v16 = vor.u32 %v1195_v2, %v1192_v1  ;;  %v1199_v17 = vshll.u32 %v1891_v5, 16 }
  0x32   : > { %v1213_v19 = vshll.u32 %v1893_v6, 16  ;;  %v1781_v20 = vor.u32 %v1925_v9, %v1780_v8  ;;  %v1894_v25 = vld [vmem:[%s2026_s13 + $0x18] sm:$0xf]  ;;  %v1896_v26 = vld [vmem:[%s2026_s13 + $0x20] sm:$0xf]  ;;  %vm1438_vm5 = vcmask 130112  }
  0x33   : > { %v836_v21 = vrot.slane %v834_v10, 5  ;;  %v850_v22 = vrot.slane %v848_v11, 5  ;;  %v1197_v27 = vrot.slane %v1196_v16, 4  ;;  %v1201_v28 = vrot.slane %v1199_v17, 5  ;;  %v1895_v52 = vld [vmem:[%s2026_s13 + $0x1c] sm:$0x1] }
  0x34   : > { %v1221_v34 = vshll.u32 %v1894_v25, 16  ;;  %v1232_v35 = vshrl.u32 %v1896_v26, 16  ;;  %v1897_v53 = vld [vmem:[%s2026_s13 + $0x24] sm:$0x1]  ;;  %v1930_v57 = vld [vmem:[%s2026_s13 + $0xc] sm:$0xf0] }
  0x35   : > { %v1819_v58 = vld [vmem:[%s2026_s13 + $0xa4] sm:$0x1]  ;;  %v1821_v59 = vld [vmem:[%s2026_s13 + $0xac] sm:$0x1]  ;;  %v1872_v0 = vld [vmem:[%s2026_s13 + $0x50] sm:$0xf] }
  0x36   : > { %1811 = vmatmul.msk.bf16.gmra.mxu0 %vm334_vm1, %v1801_v44  ;;  %1751 = vmatmul.msk.bf16.gmra.mxu1 %vm334_vm1, %v1741_v43  ;;  %v574_v43 = vsel %vm2049_vm4, %v569_v36, %v573_v37  ;;  %v825_v44 = vshrl.u32 %v1814_v38, 16  ;;  %v1235_v36 = vshll.u32 %v1896_v26, 16  ;;  %v1234_v48 = vrot.slane %v1232_v35, 4  ;;  %v1934_v1 = vld [vmem:[%s2026_s13 + $0x54] sm:$0xf0] }
  0x37   : > { %v583_v56 = vunpack.c.l.b16 %v574_v43  ;;  %v1241_v5 = vshll.u32 %v1897_v53, 16  ;;  %v862_v9 = vshll.u32 %v1819_v58, 16  ;;  %v876_v10 = vshll.u32 %v1821_v59, 16  ;;  %v1899_v53 = vld [vmem:[%s2026_s13 + $0x2c] sm:$0x1] }
  0x38   : > { %1783 = vmatmul.msk.bf16.gmra.mxu3 %vm334_vm1, %v1773_v51  ;;  %v1204_v51 = vshrl.u32 %v1892_v41, 16  ;;  %v827_v60 = vrot.slane %v825_v44, 4  ;;  %v1237_v49 = vrot.slane %v1235_v36, 5  ;;  %v1873_v11 = vor.u32 %v1934_v1, %v1872_v0  ;;  %v1876_v58 = vld [vmem:[%s2026_s13 + $0x60] sm:$0xf] }
  0x39   : > { %1755 = vmatmul.msk.bf16.gmra.mxu2 %vm334_vm1, %v585_v47  ;;  %v839_v47 = vshrl.u32 %v1816_v39, 16  ;;  %v587_v12 = vpack.c.b16 %v583_v56, %v582_v55  ;;  %v1202_v39 = vsel %vm2049_vm4, %v1197_v27, %v1201_v28  ;;  %v1844_v56 = vld [vmem:[%s2026_s13 + $0x8] sm:$0xf]  ;;  %v1243_v17 = vrot.slane %v1241_v5, 5 }
  0x3a   : > { %v1206_v3 = vrot.slane %v1204_v51, 4  ;;  %v831_v14 = vor.u32 %v830_v61, %v827_v60  ;;  %v1302_v50 = vunpack.c.l.b16 %v1202_v39  ;;  %v1845_v8 = vor.u32 %v1930_v57, %v1844_v56  ;;  %v1931_v56 = vld [vmem:[%s2026_s13 + $0x1c] sm:$0xf0]  ;;  %v1935_v59 = vld [vmem:[%s2026_s13 + $0x64] sm:$0xf0] }
  0x3b   : > { %v841_v62 = vrot.slane %v839_v47, 4  ;;  %v1223_v47 = vrot.slane %v1221_v34, 5  ;;  %v1255_v1 = vshll.u32 %v1899_v53, 16  ;;  %vm1417_vm6 = vcmask 1040384  }
  0x3c   : > { %v1210_v18 = vor.u32 %v1209_v4, %v1206_v3  ;;  %v832_v23 = vrot.slane %v831_v14, 4  ;;  %v1227_v3 = vshll.u32 %v1895_v52, 16  ;;  %v1238_v4 = vor.u32 %v1237_v49, %v1234_v48 }
  0x3d   : > { %v845_v15 = vor.u32 %v844_v63, %v841_v62  ;;  %vm1429_vm7 = vcmask 60416   ;;  %vm1366_vm8 = vcmask 64512   ;;  %vm1419_vm9 = vcmask 58368  }
  0x3e   : > { %v1211_v29 = vrot.slane %v1210_v18, 4  ;;  %v837_v37 = vsel %vm2049_vm4, %v832_v23, %v836_v21  ;;  %v1239_v16 = vrot.slane %v1238_v4, 4  ;;  %v1822_v18 = vld [vmem:[%s2026_s13 + $0xb0] sm:$0xf]  ;;  %v878_v21 = vrot.slane %v876_v10, 5 }
  0x3f   : > { %v846_v24 = vrot.slane %v845_v15, 4  ;;  %v937_v54 = vunpack.c.l.b16 %v837_v37  ;;  %v1229_v15 = vrot.slane %v1227_v3, 5  ;;  %v1900_v23 = vld [vmem:[%s2026_s13 + $0x30] sm:$0xf]  ;;  %v881_v26 = vshrl.u32 %v1822_v18, 16 }
  0x40   : > { %v884_v27 = vshll.u32 %v1822_v18, 16  ;;  %v1260_v34 = vshrl.u32 %v1900_v23, 16  ;;  %v1263_v35 = vshll.u32 %v1900_v23, 16 }
  0x41   : > { %v851_v38 = vsel %vm2049_vm4, %v846_v24, %v850_v22  ;;  %v1898_v22 = vld [vmem:[%s2026_s13 + $0x28] sm:$0xf] }
  0x42   : > { %v938_v55 = vunpack.c.l.b16 %v851_v38  ;;  %v883_v38 = vrot.slane %v881_v26, 4  ;;  %v886_v39 = vrot.slane %v884_v27, 5  ;;  %v1262_v49 = vrot.slane %v1260_v34, 4  ;;  %v1932_v34 = vld [vmem:[%s2026_s13 + $0x2c] sm:$0xf0] }
  0x46   : > { %1812 = vmatmul.msk.bf16.gmra.mxu0 %vm334_vm1, %v1805_v30  ;;  %1752 = vmatmul.msk.bf16.gmra.mxu1 %vm334_vm1, %v1745_v31  ;;  %v1215_v30 = vrot.slane %v1213_v19, 5  ;;  %v1818_v31 = vld [vmem:[%s2026_s13 + $0xa0] sm:$0xf]  ;;  %v1824_v19 = vld [vmem:[%s2026_s13 + $0xb8] sm:$0xf] }
  0x47   : > { %v853_v41 = vshrl.u32 %v1818_v31, 16  ;;  %v856_v42 = vshll.u32 %v1818_v31, 16  ;;  %v898_v31 = vshll.u32 %v1824_v19, 16 }
  0x48   : > { %1784 = vmatmul.msk.bf16.gmra.mxu3 %vm334_vm1, %v1777_v33  ;;  %v1218_v33 = vshrl.u32 %v1894_v25, 16  ;;  %v1216_v40 = vsel %vm2049_vm4, %v1211_v29, %v1215_v30  ;;  %v1244_v29 = vsel %vm2049_vm4, %v1239_v16, %v1243_v17  ;;  %v895_v30 = vshrl.u32 %v1824_v19, 16  ;;  %v1902_v16 = vld [vmem:[%s2026_s13 + $0x38] sm:$0xf]  ;;  %v1904_v17 = vld [vmem:[%s2026_s13 + $0x40] sm:$0xf] }
  0x49   : > { %1756 = vmatmul.msk.bf16.gmra.mxu2 %vm334_vm1, %v586_v32  ;;  %v1820_v32 = vld [vmem:[%s2026_s13 + $0xa8] sm:$0xf]  ;;  %v1303_v51 = vunpack.c.l.b16 %v1216_v40  ;;  %v855_v60 = vrot.slane %v853_v41, 4  ;;  %v858_v61 = vrot.slane %v856_v42, 5  ;;  %v1305_v41 = vunpack.c.l.b16 %v1244_v29  ;;  %v1823_v42 = vld [vmem:[%s2026_s13 + $0xb4] sm:$0x1] }
  0x4a   : > { %v867_v43 = vshrl.u32 %v1820_v32, 16  ;;  %v870_v44 = vshll.u32 %v1820_v32, 16  ;;  %v1220_v45 = vrot.slane %v1218_v33, 4  ;;  %v1246_v32 = vshrl.u32 %v1898_v22, 16 }
  0x4b   : > { %v1310_v6 = vpack.c.b16 %v1303_v51, %v1302_v50  ;;  %v1249_v33 = vshll.u32 %v1898_v22, 16  ;;  %v1265_v50 = vrot.slane %v1263_v35, 5  ;;  %v890_v57 = vshll.u32 %v1823_v42, 16  ;;  %v1880_v35 = vld [vmem:[%s2026_s13 + $0x70] sm:$0xf] }
  0x4c   : > { %v869_v62 = vrot.slane %v867_v43, 4  ;;  %v872_v63 = vrot.slane %v870_v44, 5  ;;  %v1224_v2 = vor.u32 %v1223_v47, %v1220_v45  ;;  %v897_v43 = vrot.slane %v895_v30, 4  ;;  %v1825_v45 = vld [vmem:[%s2026_s13 + $0xbc] sm:$0x1] }
  0x4d   : > { %v900_v44 = vrot.slane %v898_v31, 5  ;;  %v1248_v47 = vrot.slane %v1246_v32, 4  ;;  %v1251_v48 = vrot.slane %v1249_v33, 5  ;;  %v1277_v26 = vshll.u32 %v1902_v16, 16  ;;  %v1852_v33 = vld [vmem:[%s2026_s13 + $0x28] sm:$0xf] }
  0x4e   : > { %v1225_v14 = vrot.slane %v1224_v2, 4  ;;  %v1266_v2 = vor.u32 %v1265_v50, %v1262_v49  ;;  %v1288_v27 = vshrl.u32 %v1904_v17, 16  ;;  %v1905_v49 = vld [vmem:[%s2026_s13 + $0x44] sm:$0x1]  ;;  %v1853_v53 = vor.u32 %v1932_v34, %v1852_v33 }
  0x4f   : > { %v1252_v0 = vor.u32 %v1251_v48, %v1248_v47  ;;  %v1279_v42 = vrot.slane %v1277_v26, 5  ;;  %v1903_v48 = vld [vmem:[%s2026_s13 + $0x3c] sm:$0x1]  ;;  %v1827_v50 = vld [vmem:[%s2026_s13 + $0xc4] sm:$0x1] }
  0x50   : > { %v1230_v28 = vsel %vm2049_vm4, %v1225_v14, %v1229_v15  ;;  %v1826_v15 = vld [vmem:[%s2026_s13 + $0xc0] sm:$0xf] }
  0x51   : > { %v1304_v40 = vunpack.c.l.b16 %v1230_v28  ;;  %v909_v23 = vshrl.u32 %v1826_v15, 16  ;;  %v1291_v28 = vshll.u32 %v1904_v17, 16  ;;  %v1933_v17 = vld [vmem:[%s2026_s13 + $0x3c] sm:$0xf0] }
  0x56   : > { %1813 = vmatmul.msk.bf16.gmra.mxu0 %vm334_vm1, %v1809_v13  ;;  %1753 = vmatmul.msk.bf16.gmra.mxu1 %vm334_vm1, %v1749_v7  ;;  %v945_v7 = vpack.c.b16 %v938_v55, %v937_v54  ;;  %v873_v13 = vor.u32 %v872_v63, %v869_v62  ;;  %v1901_v54 = vld [vmem:[%s2026_s13 + $0x34] sm:$0x1]  ;;  %v1848_v55 = vld [vmem:[%s2026_s13 + $0x18] sm:$0xf]  ;;  %v901_v62 = vor.u32 %v900_v44, %v897_v43  ;;  %v904_v63 = vshll.u32 %v1825_v45, 16 }
  0x57   : > { %v1269_v3 = vshll.u32 %v1901_v54, 16  ;;  %v1849_v5 = vor.u32 %v1931_v56, %v1848_v55  ;;  %v1290_v43 = vrot.slane %v1288_v27, 4  ;;  %v1293_v44 = vrot.slane %v1291_v28, 5 }
  0x58   : > { %1785 = vmatmul.msk.bf16.gmra.mxu3 %vm334_vm1, %v1781_v20  ;;  %v864_v20 = vrot.slane %v862_v9, 5  ;;  %v874_v25 = vrot.slane %v873_v13, 4  ;;  %v902_v9 = vrot.slane %v901_v62, 4  ;;  %v906_v10 = vrot.slane %v904_v63, 5 }
  0x59   : > { %1757 = vmatmul.msk.bf16.gmra.mxu2 %vm334_vm1, %v587_v12  ;;  %v859_v12 = vor.u32 %v858_v61, %v855_v60  ;;  %v1311_v60 = vpack.c.b16 %v1305_v41, %v1304_v40  ;;  %v887_v61 = vor.u32 %v886_v39, %v883_v38  ;;  %v1267_v13 = vrot.slane %v1266_v2, 4  ;;  %v1936_v40 = vld [vmem:[%s2026_s13 + $0x74] sm:$0xf0] }
  0x5a   : > { %v879_v37 = vsel %vm2049_vm4, %v874_v25, %v878_v21  ;;  %v1271_v14 = vrot.slane %v1269_v3, 5  ;;  %v907_v19 = vsel %vm2049_vm4, %v902_v9, %v906_v10  ;;  %v1274_v25 = vshrl.u32 %v1902_v16, 16  ;;  %v1856_v16 = vld [vmem:[%s2026_s13 + $0x38] sm:$0xf] }
  0x5b   : > { %v860_v24 = vrot.slane %v859_v12, 4  ;;  %v940_v52 = vunpack.c.l.b16 %v879_v37  ;;  %v1257_v12 = vrot.slane %v1255_v1, 5  ;;  %v942_v32 = vunpack.c.l.b16 %v907_v19  ;;  %v1937_v19 = vld [vmem:[%s2026_s13 + $0x84] sm:$0xf0] }
  0x5c   : > { %v1272_v22 = vsel %vm2049_vm4, %v1267_v13, %v1271_v14  ;;  %v911_v38 = vrot.slane %v909_v23, 4  ;;  %v1276_v41 = vrot.slane %v1274_v25, 4  ;;  %v1881_v54 = vor.u32 %v1936_v40, %v1880_v35 }
  0x5d   : > { %v865_v36 = vsel %vm2049_vm4, %v860_v24, %v864_v20  ;;  %v1828_v20 = vld [vmem:[%s2026_s13 + $0xc8] sm:$0xf]  ;;  %v912_v24 = vshll.u32 %v1826_v15, 16  ;;  %v1307_v37 = vunpack.c.l.b16 %v1272_v22  ;;  %v1857_v23 = vor.u32 %v1933_v17, %v1856_v16 }
  0x5e   : > { %v939_v51 = vunpack.c.l.b16 %v865_v36  ;;  %v923_v29 = vshrl.u32 %v1828_v20, 16  ;;  %v926_v30 = vshll.u32 %v1828_v20, 16  ;;  %v1280_v56 = vor.u32 %v1279_v42, %v1276_v41 }
  0x5f   : > { %v914_v39 = vrot.slane %v912_v24, 5 }
  0x60   : > { %v946_v4 = vpack.c.b16 %v940_v52, %v939_v51  ;;  %v925_v45 = vrot.slane %v923_v29, 4  ;;  %v928_v47 = vrot.slane %v926_v30, 5  ;;  %v1829_v51 = vld [vmem:[%s2026_s13 + $0xcc] sm:$0x1] }
  0x61   : > { %v932_v63 = vshll.u32 %v1829_v51, 16 }
  0x62   : > { %v929_v62 = vor.u32 %v928_v47, %v925_v45 }
  0x66   : > { %1906 = vmatmul.msk.bf16.vlgmr.msra.gmra.mxu0 %vm334_vm1, %v1310_v6  ;;  %1830 = vmatmul.msk.bf16.vlgmr.msra.gmra.mxu1 %vm334_vm1, %v945_v7  ;;  %v1877_v6 = vor.u32 %v1935_v59, %v1876_v58  ;;  %v888_v7 = vrot.slane %v887_v61, 4  ;;  %v1294_v58 = vor.u32 %v1293_v44, %v1290_v43  ;;  %v1297_v59 = vshll.u32 %v1905_v49, 16 }
  0x67   : > { %v918_v61 = vshll.u32 %v1827_v50, 16 }
  0x68   : > { %1886 = vmatmul.msk.bf16.vlgmr.msra.gmra.mxu3 %vm334_vm1, %v1873_v11  ;;  %v1253_v11 = vrot.slane %v1252_v0, 4  ;;  %v1281_v0 = vrot.slane %v1280_v56, 4  ;;  %v1295_v2 = vrot.slane %v1294_v58, 4  ;;  %v1299_v3 = vrot.slane %v1297_v59, 5 }
  0x69   : > { %1858 = vmatmul.msk.bf16.vlgmr.msra.gmra.mxu2 %vm334_vm1, %v1845_v8  ;;  %v892_v8 = vrot.slane %v890_v57, 5  ;;  %v1283_v57 = vshll.u32 %v1903_v48, 16 }
  0x6a   : > { %v1258_v21 = vsel %vm2049_vm4, %v1253_v11, %v1257_v12  ;;  %v1300_v9 = vsel %vm2049_vm4, %v1295_v2, %v1299_v3 }
  0x6b   : > { %v893_v18 = vsel %vm2049_vm4, %v888_v7, %v892_v8  ;;  %v1306_v36 = vunpack.c.l.b16 %v1258_v21  ;;  %v1285_v1 = vrot.slane %v1283_v57, 5  ;;  %v934_v7 = vrot.slane %v932_v63, 5 }
  0x6c   : > { %v941_v31 = vunpack.c.l.b16 %v893_v18  ;;  %v1309_v13 = vunpack.c.l.b16 %v1300_v9  ;;  %v1884_v18 = vld [vmem:[%s2026_s13 + $0x80] sm:$0xf]  ;;  %s289_s13 = scalar_lea.vmem %s2382_s6, %s1702_s8 }
  0x6d   : > { %v1312_v55 = vpack.c.b16 %v1307_v37, %v1306_v36  ;;  %v1286_v8 = vsel %vm2049_vm4, %v1281_v0, %v1285_v1  ;;  %v1885_v25 = vor.u32 %v1937_v19, %v1884_v18 }
  0x6e   : > { %v947_v52 = vpack.c.b16 %v942_v32, %v941_v31  ;;  %v1308_v12 = vunpack.c.l.b16 %v1286_v8 }
  0x70   : > { %v1313_v20 = vpack.c.b16 %v1309_v13, %v1308_v12 }
  0x76   : > { %1907 = vmatmul.msk.bf16.gmra.mxu0 %vm334_vm1, %v1311_v60  ;;  %1831 = vmatmul.msk.bf16.gmra.mxu1 %vm334_vm1, %v946_v4  ;;  %v915_v60 = vor.u32 %v914_v39, %v911_v38 }
  0x78   : > { %1887 = vmatmul.msk.bf16.gmra.mxu3 %vm334_vm1, %v1877_v6  ;;  %v916_v4 = vrot.slane %v915_v60, 4  ;;  %v930_v6 = vrot.slane %v929_v62, 4 }
  0x79   : > { %1859 = vmatmul.msk.bf16.gmra.mxu2 %vm334_vm1, %v1849_v5  ;;  %v920_v5 = vrot.slane %v918_v61, 5 }
  0x7a   : > { %v935_v11 = vsel %vm2049_vm4, %v930_v6, %v934_v7 }
  0x7b   : > { %v921_v10 = vsel %vm2049_vm4, %v916_v4, %v920_v5  ;;  %v944_v15 = vunpack.c.l.b16 %v935_v11 }
  0x7c   : > { %v943_v14 = vunpack.c.l.b16 %v921_v10 }
  0x7e   : > { %v948_v22 = vpack.c.b16 %v944_v15, %v943_v14 }
  0x86   : > { %1908 = vmatmul.msk.bf16.gmra.mxu0 %vm334_vm1, %v1312_v55  ;;  %1832 = vmatmul.msk.bf16.gmra.mxu1 %vm334_vm1, %v947_v52 }
  0x88   : > { %1888 = vmatmul.msk.bf16.gmra.mxu3 %vm334_vm1, %v1881_v54 }
  0x89   : > { %1860 = vmatmul.msk.bf16.gmra.mxu2 %vm334_vm1, %v1853_v53 }
  0x93   : > { %v360_v21 = vpop.f32.mrf.mxu0  ;;  %v365_v24 = vpop.f32.mrf.mxu1 }
  0x96   : > { %1909 = vmatmul.msk.bf16.gmra.mxu0 %vm334_vm1, %v1313_v20  ;;  %1833 = vmatmul.msk.bf16.gmra.mxu1 %vm334_vm1, %v948_v22 }
  0x98   : > { %1889 = vmatmul.msk.bf16.gmra.mxu3 %vm334_vm1, %v1885_v25 }
  0x99   : > { %1861 = vmatmul.msk.bf16.gmra.mxu2 %vm334_vm1, %v1857_v23 }
  0x9b   : > { %v362_v26 = vpop.f32.mrf.mxu0  ;;  %v2231_v27 = vpop.f32.mrf.mxu3 }
  0x9c   : > { %v370_v46 = vpop.f32.mrf.mxu2  ;;  %v367_v28 = vpop.f32.mrf.mxu1 }
  0xa3   : > { %v2235_v30 = vpop.f32.mrf.mxu3  ;;  %v780_v31 = vpop.f32.mrf.mxu0 }
  0xa4   : > { %v2233_v29 = vpop.f32.mrf.mxu2  ;;  %v424_v32 = vpop.f32.mrf.mxu1  ;;  %v1495_v33 = vpack.c.bf16 %v780_v31, %v780_v31  ;;  %v1460_v15 = vmul.f32 %v780_v31, %v780_v31  ;;  %v1439_v19 = vsel %vm1438_vm5, %v780_v31, 0.0 }
  0xa5   : > { %v425_v34 = vadd.f32 %v424_v32, %v360_v21 }
  0xa6   : > { %1511 = vrot.lane.b32.xlu0 %v1495_v33, %s1959_s24  ;;  %v1468_v25 = vsel %vm1438_vm5, %v1460_v15, 0.0 }
  0xab   : > { %v698_v37 = vpop.f32.mrf.mxu3  ;;  %v782_v38 = vpop.f32.mrf.mxu0 }
  0xac   : > { %v612_v35 = vpop.f32.mrf.mxu2  ;;  %v426_v39 = vpop.f32.mrf.mxu1  ;;  %v1496_v40 = vpack.c.bf16 %v782_v38, %v782_v38  ;;  %v1461_v12 = vmul.f32 %v782_v38, %v782_v38  ;;  %v1440_v16 = vsel %vm1438_vm5, %v782_v38, 0.0 }
  0xad   : > { %v632_v36 = vadd.f32 %v612_v35, %v425_v34  ;;  %v427_v43 = vadd.f32 %v426_v39, %v362_v26  ;;  %v1441_v23 = vadd.f32 %v1440_v16, %v1439_v19 }
  0xae   : > { %1513 = vrot.lane.b32.xlu1 %v1496_v40, %s1959_s24  ;;  %v1469_v20 = vsel %vm1438_vm5, %v1461_v12, 0.0 }
  0xaf   : > { %v718_v41 = vadd.f32 %v698_v37, %v632_v36  ;;  %v1470_v33 = vadd.f32 %v1469_v20, %v1468_v25 }
  0xb1   : > { %v2239_v42 = vadd.f32 %v780_v31, %v718_v41 }
  0xb3   : > { %v700_v47 = vpop.f32.mrf.mxu3  ;;  %v785_v48 = vpop.f32.mrf.mxu0 }
  0xb4   : > { %v614_v44 = vpop.f32.mrf.mxu2  ;;  %v429_v49 = vpop.f32.mrf.mxu1  ;;  %v1497_v50 = vpack.c.bf16 %v785_v48, %v785_v48  ;;  %v1462_v17 = vmul.f32 %v785_v48, %v785_v48  ;;  %v1442_v21 = vsel %vm1438_vm5, %v785_v48, 0.0 }
  0xb5   : > { %v633_v45 = vadd.f32 %v614_v44, %v427_v43  ;;  %v430_v52 = vadd.f32 %v429_v49, %v365_v24  ;;  %v1443_v34 = vadd.f32 %v1442_v21, %v1441_v23 }
  0xb6   : > { %1515 = vrot.lane.b32.xlu1 %v1497_v50, %s1959_s24 }
  0xb7   : > { %v719_v51 = vadd.f32 %v700_v47, %v633_v45 }
  0xb9   : > { %v2242_v53 = vadd.f32 %v782_v38, %v719_v51 }
  0xbb   : > { %v703_v56 = vpop.f32.mrf.mxu3  ;;  %v787_v57 = vpop.f32.mrf.mxu0 }
  0xbc   : > { %v617_v54 = vpop.f32.mrf.mxu2  ;;  %v431_v58 = vpop.f32.mrf.mxu1  ;;  %v1498_v59 = vpack.c.bf16 %v787_v57, %v787_v57  ;;  %v1463_v22 = vmul.f32 %v787_v57, %v787_v57  ;;  %v1444_v26 = vsel %vm1438_vm5, %v787_v57, 0.0 }
  0xbd   : > { %v634_v55 = vadd.f32 %v617_v54, %v430_v52  ;;  %v432_v61 = vadd.f32 %v431_v58, %v367_v28  ;;  %v1445_v43 = vadd.f32 %v1444_v26, %v1443_v34 }
  0xbe   : > { %1517 = vrot.lane.b32.xlu2 %v1498_v59, %s1959_s24  ;;  %v1473_v37 = vsel %vm1438_vm5, %v1463_v22, 0.0 }
  0xbf   : > { %v720_v60 = vadd.f32 %v703_v56, %v634_v55 }
  0xc1   : > { %v2245_v62 = vadd.f32 %v785_v48, %v720_v60 }
  0xc3   : > { %v705_v1 = vpop.f32.mrf.mxu3  ;;  %v790_v2 = vpop.f32.mrf.mxu0 }
  0xc4   : > { %v619_v63 = vpop.f32.mrf.mxu2  ;;  %v434_v3 = vpop.f32.mrf.mxu1  ;;  %v1499_v4 = vpack.c.bf16 %v790_v2, %v790_v2  ;;  %v1464_v28 = vmul.f32 %v790_v2, %v790_v2  ;;  %v1446_v38 = vsel %vm1438_vm5, %v790_v2, 0.0 }
  0xc5   : > { %v635_v0 = vadd.f32 %v619_v63, %v432_v61  ;;  %v435_v6 = vadd.f32 %v434_v3, %v370_v46  ;;  %v1471_v46 = vsel %vm1438_vm5, %v1462_v17, 0.0  ;;  %v1447_v50 = vadd.f32 %v1446_v38, %v1445_v43 }
  0xc6   : > { %1519 = vrot.lane.b32.xlu2 %v1499_v4, %s1959_s24  ;;  %v1472_v41 = vadd.f32 %v1471_v46, %v1470_v33  ;;  %v1475_v45 = vsel %vm1438_vm5, %v1464_v28, 0.0 }
  0xc7   : > { %v721_v5 = vadd.f32 %v705_v1, %v635_v0 }
  0xc8   : > { %v1474_v49 = vadd.f32 %v1473_v37, %v1472_v41 }
  0xc9   : > { %v2248_v7 = vadd.f32 %v787_v57, %v721_v5 }
  0xca   : > { %v1476_v55 = vadd.f32 %v1475_v45, %v1474_v49 }
  0xcb   : > { %v708_v10 = vpop.f32.mrf.mxu3  ;;  %v2250_v11 = vpop.f32.mrf.mxu0 }
  0xcc   : > { %v622_v8 = vpop.f32.mrf.mxu2  ;;  %v436_v13 = vpop.f32.mrf.mxu1  ;;  %v1448_v47 = vsel %vm1438_vm5, %v2250_v11, 0.0 }
  0xcd   : > { %v636_v9 = vadd.f32 %v622_v8, %v435_v6  ;;  %v437_v24 = vadd.f32 %v436_v13, %v2233_v29  ;;  %v1465_v29 = vmul.f32 %v2250_v11, %v2250_v11  ;;  %v1449_v56 = vadd.f32 %v1448_v47, %v1447_v50 }
  0xcf   : > { %v722_v14 = vadd.f32 %v708_v10, %v636_v9  ;;  %v1477_v52 = vsel %vm1438_vm5, %v1465_v29, 0.0 }
  0xd0   : > { %v1478_v60 = vadd.f32 %v1477_v52, %v1476_v55  ;;  %v1500_v52 = vpack.c.bf16 %v2250_v11, %v2250_v11 }
  0xd1   : > { %v2253_v18 = vadd.f32 %v790_v2, %v722_v14 }
  0xd3   : > { %v710_v31 = vpop.f32.mrf.mxu3  ;;  %v795_v36 = vpop.f32.mrf.mxu0 }
  0xd4   : > { %v624_v32 = vpop.f32.mrf.mxu2  ;;  %v439_v39 = vpop.f32.mrf.mxu1  ;;  %v1501_v40 = vpack.c.bf16 %v795_v36, %v795_v36  ;;  %v1466_v48 = vmul.f32 %v795_v36, %v795_v36  ;;  %v1450_v54 = vsel %vm1438_vm5, %v795_v36, 0.0 }
  0xd5   : > { %v637_v35 = vadd.f32 %v624_v32, %v437_v24  ;;  %v440_v57 = vadd.f32 %v439_v39, %v2231_v27  ;;  %v1451_v61 = vadd.f32 %v1450_v54, %v1449_v56 }
  0xd6   : > { %1523 = vrot.lane.b32.xlu1 %v1501_v40, %s1959_s24  ;;  %v1479_v58 = vsel %vm1438_vm5, %v1466_v48, 0.0 }
  0xd7   : > { %v723_v44 = vadd.f32 %v710_v31, %v637_v35  ;;  %v1480_v6 = vadd.f32 %v1479_v58, %v1478_v60 }
  0xd9   : > { %v2271_v51 = vadd.f32 %v2250_v11, %v723_v44 }
  0xdb   : > { %v713_v0 = vpop.f32.mrf.mxu3  ;;  %v797_v1 = vpop.f32.mrf.mxu0 }
  0xdc   : > { %v627_v59 = vpop.f32.mrf.mxu2  ;;  %v441_v2 = vpop.f32.mrf.mxu1  ;;  %v1452_v3 = vsel %vm1438_vm5, %v797_v1, 0.0  ;;  %v1467_v4 = vmul.f32 %v797_v1, %v797_v1  ;;  %v1502_v5 = vpack.c.bf16 %v797_v1, %v797_v1 }
  0xdd   : > { %v638_v63 = vadd.f32 %v627_v59, %v440_v57  ;;  %v1453_v9 = vadd.f32 %v1452_v3, %v1451_v61  ;;  %v442_v14 = vadd.f32 %v441_v2, %v2235_v30 }
  0xde   : > { %v1481_v10 = vsel %vm1438_vm5, %v1467_v4, 0.0  ;;  %1525 = vrot.lane.b32.xlu2 %v1502_v5, %s1959_s24 }
  0xdf   : > { %v724_v8 = vadd.f32 %v713_v0, %v638_v63  ;;  %v1454_v27 = vrot.slane %v1453_v9, 4  ;;  %v1482_v12 = vadd.f32 %v1481_v10, %v1480_v6 }
  0xe1   : > { %v2280_v13 = vadd.f32 %v795_v36, %v724_v8  ;;  %v1455_v15 = vadd.f32 %v1454_v27, %v1453_v9  ;;  %v1483_v16 = vrot.slane %v1482_v12, 4 }
  0xe3   : > { %v715_v20 = vpop.f32.mrf.mxu3  ;;  %v1338_v21 = vpop.f32.mrf.mxu0  ;;  %v1456_v22 = vrot.slane %v1455_v15, 2  ;;  %v1484_v23 = vadd.f32 %v1483_v16, %v1482_v12 }
  0xe4   : > { %v629_v17 = vpop.f32.mrf.mxu2  ;;  %v977_v24 = vpop.f32.mrf.mxu1 }
  0xe5   : > { %v639_v19 = vadd.f32 %v629_v17, %v442_v14  ;;  %v1457_v46 = vadd.f32 %v1456_v22, %v1455_v15  ;;  %v1485_v26 = vrot.slane %v1484_v23, 2  ;;  %v997_v30 = vadd.f32 %v977_v24, %v2239_v42 }
  0xe7   : > { %v725_v25 = vadd.f32 %v715_v20, %v639_v19  ;;  %v1458_v28 = vrot.slane %v1457_v46, 1  ;;  %v1486_v32 = vadd.f32 %v1485_v26, %v1484_v23 }
  0xe9   : > { %v2284_v33 = vadd.f32 %v797_v1, %v725_v25  ;;  %v1487_v34 = vrot.slane %v1486_v32, 1  ;;  %v1459_v37 = vadd.f32 %v1458_v28, %v1457_v46 }
  0xeb   : > { %v1145_v36 = vpop.f32.mrf.mxu3  ;;  %v1488_v38 = vadd.f32 %v1487_v34, %v1486_v32  ;;  %v1340_v29 = vpop.f32.mrf.mxu0 }
  0xec   : > { %v1059_v35 = vpop.f32.mrf.mxu2  ;;  %v979_v39 = vpop.f32.mrf.mxu1 }
  0xed   : > { %v1079_v31 = vadd.f32 %v1059_v35, %v997_v30  ;;  %v1489_v41 = vsel %vm1417_vm6, %v1459_v37, %v1488_v38  ;;  %v998_v43 = vadd.f32 %v979_v39, %v2242_v53 }
  0xee   : > { %1491 = vrot.lane.b32.xlu0 %v1489_v41, %s1959_s24 }
  0xef   : > { %v1165_v40 = vadd.f32 %v1145_v36, %v1079_v31 }
  0xf1   : > { %v1358_v42 = vadd.f32 %v1338_v21, %v1165_v40 }
  0xf3   : > { %v1421_v44 = vpack.c.bf16 %v1358_v42, %v1358_v42  ;;  %v1147_v48 = vpop.f32.mrf.mxu3  ;;  %v1343_v49 = vpop.f32.mrf.mxu0  ;;  %v1388_v55 = vmul.f32 %v1358_v42, %v1358_v42  ;;  %v1367_v53 = vsel %vm1366_vm8, %v1358_v42, 0.0 }
  0xf4   : > { %v1061_v45 = vpop.f32.mrf.mxu2  ;;  %v982_v50 = vpop.f32.mrf.mxu1 }
  0xf5   : > { %1430 = vst.msk [vmem:[%s2298_s28] sm:$0xf] %vm1429_vm7, %v1421_v44  ;;  %v1080_v47 = vadd.f32 %v1061_v45, %v998_v43  ;;  %v999_v57 = vadd.f32 %v982_v50, %v2245_v62  ;;  %v1396_v0 = vsel %vm1366_vm8, %v1388_v55, 0.0 }
  0xf6   : > { %1521 = vrot.lane.b32.xlu0 %v1500_v52, %s1959_s24 }
  0xf7   : > { %v1166_v54 = vadd.f32 %v1147_v48, %v1080_v47 }
  0xf9   : > { %v1359_v56 = vadd.f32 %v1340_v29, %v1166_v54 }
  0xfb   : > { %v1368_v58 = vsel %vm1366_vm8, %v1359_v56, 0.0  ;;  %v1389_v59 = vmul.f32 %v1359_v56, %v1359_v56  ;;  %v1422_v60 = vpack.c.bf16 %v1359_v56, %v1359_v56  ;;  %v1150_v2 = vpop.f32.mrf.mxu3  ;;  %v1345_v5 = vpop.f32.mrf.mxu0 }
  0xfc   : > { %v1369_v61 = vadd.f32 %v1368_v58, %v1367_v53  ;;  %v1064_v63 = vpop.f32.mrf.mxu2  ;;  %v984_v4 = vpop.f32.mrf.mxu1 }
  0xfd   : > { %v1397_v11 = vsel %vm1366_vm8, %v1389_v59, 0.0  ;;  %1431 = vst.msk [vmem:[%s2298_s28 + $0x4] sm:$0xf] %vm1429_vm7, %v1422_v60  ;;  %v1081_v1 = vadd.f32 %v1064_v63, %v999_v57  ;;  %v1000_v8 = vadd.f32 %v984_v4, %v2248_v7 }
  0xfe   : > { %v1398_v3 = vadd.f32 %v1397_v11, %v1396_v0 }
  0xff   : > { %v1167_v6 = vadd.f32 %v1150_v2, %v1081_v1 }
 0x101   : > { %v1360_v62 = vadd.f32 %v1343_v49, %v1167_v6 }
 0x103   : > { %v1370_v9 = vsel %vm1366_vm8, %v1360_v62, 0.0  ;;  %v1390_v10 = vmul.f32 %v1360_v62, %v1360_v62  ;;  %v1423_v27 = vpack.c.bf16 %v1360_v62, %v1360_v62  ;;  %v1152_v17 = vpop.f32.mrf.mxu3  ;;  %v1348_v22 = vpop.f32.mrf.mxu0 }
 0x104   : > { %v1371_v12 = vadd.f32 %v1370_v9, %v1369_v61  ;;  %v1066_v14 = vpop.f32.mrf.mxu2  ;;  %v987_v20 = vpop.f32.mrf.mxu1 }
 0x105   : > { %v1399_v15 = vsel %vm1366_vm8, %v1390_v10, 0.0  ;;  %1432 = vst.msk [vmem:[%s2298_s28 + $0x8] sm:$0xf] %vm1429_vm7, %v1423_v27  ;;  %v1082_v16 = vadd.f32 %v1066_v14, %v1000_v8  ;;  %v1001_v7 = vadd.f32 %v987_v20, %v2253_v18 }
 0x106   : > { %v1400_v19 = vadd.f32 %v1399_v15, %v1398_v3 }
 0x107   : > { %v1168_v21 = vadd.f32 %v1152_v17, %v1082_v16 }
 0x109   : > { %v1361_v23 = vadd.f32 %v1345_v5, %v1168_v21 }
 0x10b   : > { %v1372_v24 = vsel %vm1366_vm8, %v1361_v23, 0.0  ;;  %v1391_v25 = vmul.f32 %v1361_v23, %v1361_v23  ;;  %v1424_v46 = vpack.c.bf16 %v1361_v23, %v1361_v23  ;;  %v1155_v34 = vpop.f32.mrf.mxu3  ;;  %v1350_v38 = vpop.f32.mrf.mxu0 }
 0x10c   : > { %v1373_v26 = vadd.f32 %v1372_v24, %v1371_v12  ;;  %v1069_v28 = vpop.f32.mrf.mxu2  ;;  %v989_v31 = vpop.f32.mrf.mxu1 }
 0x10d   : > { %v1401_v32 = vsel %vm1366_vm8, %v1391_v25, 0.0  ;;  %1433 = vst.msk [vmem:[%s2298_s28 + $0xc] sm:$0xf] %vm1429_vm7, %v1424_v46  ;;  %v1083_v30 = vadd.f32 %v1069_v28, %v1001_v7  ;;  %v1002_v18 = vadd.f32 %v989_v31, %v2271_v51 }
 0x10e   : > { %v1402_v35 = vadd.f32 %v1401_v32, %v1400_v19 }
 0x10f   : > { %v1169_v36 = vadd.f32 %v1155_v34, %v1083_v30 }
 0x111   : > { %v1362_v37 = vadd.f32 %v1348_v22, %v1169_v36 }
 0x113   : > { %v1374_v29 = vsel %vm1366_vm8, %v1362_v37, 0.0  ;;  %v1392_v39 = vmul.f32 %v1362_v37, %v1362_v37  ;;  %v1425_v40 = vpack.c.bf16 %v1362_v37, %v1362_v37  ;;  %v1157_v45 = vpop.f32.mrf.mxu3  ;;  %v1353_v59 = vpop.f32.mrf.mxu0 }
 0x114   : > { %v1375_v41 = vadd.f32 %v1374_v29, %v1373_v26  ;;  %v1071_v42 = vpop.f32.mrf.mxu2  ;;  %v992_v48 = vpop.f32.mrf.mxu1 }
 0x115   : > { %v1403_v43 = vsel %vm1366_vm8, %v1392_v39, 0.0  ;;  %1434 = vst.msk [vmem:[%s2298_s28 + $0x10] sm:$0xf] %vm1429_vm7, %v1425_v40  ;;  %v1084_v44 = vadd.f32 %v1071_v42, %v1002_v18  ;;  %v1003_v54 = vadd.f32 %v992_v48, %v2280_v13 }
 0x116   : > { %v1404_v47 = vadd.f32 %v1403_v43, %v1402_v35 }
 0x117   : > { %v1170_v49 = vadd.f32 %v1157_v45, %v1084_v44 }
 0x118   : > { %v1512_v50 = vpop.permute.xlu0 %1511  ;;  %v1518_v52 = vpop.permute.xlu2 %1517 }
 0x119   : > { %v1363_v51 = vadd.f32 %v1350_v38, %v1170_v49  ;;  %1535 = vst.msk [vmem:[%s2333_s7] sm:$0xf] %vm1429_vm7, %v1512_v50 }
 0x11a   : > { %1538 = vst.msk [vmem:[%s2333_s7 + $0xc] sm:$0xf] %vm1429_vm7, %v1518_v52 }
 0x11b   : > { %v1376_v55 = vsel %vm1366_vm8, %v1363_v51, 0.0  ;;  %v1393_v56 = vmul.f32 %v1363_v51, %v1363_v51  ;;  %v1426_v53 = vpack.c.bf16 %v1363_v51, %v1363_v51  ;;  %v1160_v63 = vpop.f32.mrf.mxu3 }
 0x11c   : > { %v1377_v57 = vadd.f32 %v1376_v55, %v1375_v41  ;;  %v1074_v58 = vpop.f32.mrf.mxu2  ;;  %v994_v11 = vpop.f32.mrf.mxu1 }
 0x11d   : > { %v1405_v60 = vsel %vm1366_vm8, %v1393_v56, 0.0  ;;  %1435 = vst.msk [vmem:[%s2298_s28 + $0x14] sm:$0xf] %vm1429_vm7, %v1426_v53  ;;  %v1085_v61 = vadd.f32 %v1074_v58, %v1003_v54  ;;  %v1004_v4 = vadd.f32 %v994_v11, %v2284_v33  ;;  %v1355_v33 = vpop.f32.mrf.mxu0 }
 0x11e   : > { %v1406_v13 = vadd.f32 %v1405_v60, %v1404_v47 }
 0x11f   : > { %v1171_v0 = vadd.f32 %v1160_v63, %v1085_v61 }
 0x120   : > { %v1514_v2 = vpop.permute.xlu1 %1513  ;;  %v1520_v3 = vpop.permute.xlu2 %1519 }
 0x121   : > { %v1364_v1 = vadd.f32 %v1353_v59, %v1171_v0  ;;  %1536 = vst.msk [vmem:[%s2333_s7 + $0x4] sm:$0xf] %vm1429_vm7, %v1514_v2 }
 0x122   : > { %1539 = vst.msk [vmem:[%s2333_s7 + $0x10] sm:$0xf] %vm1429_vm7, %v1520_v3 }
 0x123   : > { %v1378_v5 = vsel %vm1366_vm8, %v1364_v1, 0.0  ;;  %v1394_v6 = vmul.f32 %v1364_v1, %v1364_v1  ;;  %v1427_v62 = vpack.c.bf16 %v1364_v1, %v1364_v1  ;;  %v1162_v12 = vpop.f32.mrf.mxu3 }
 0x124   : > { %v1379_v8 = vadd.f32 %v1378_v5, %v1377_v57  ;;  %v1076_v9 = vpop.f32.mrf.mxu2 }
 0x125   : > { %v1407_v10 = vsel %vm1366_vm8, %v1394_v6, 0.0  ;;  %1436 = vst.msk [vmem:[%s2298_s28 + $0x18] sm:$0xf] %vm1429_vm7, %v1427_v62  ;;  %v1086_v27 = vadd.f32 %v1076_v9, %v1004_v4 }
 0x126   : > { %v1408_v14 = vadd.f32 %v1407_v10, %v1406_v13 }
 0x127   : > { %v1172_v15 = vadd.f32 %v1162_v12, %v1086_v27 }
 0x128   : > { %v1516_v17 = vpop.permute.xlu1 %1515 }
 0x129   : > { %v1365_v16 = vadd.f32 %v1355_v33, %v1172_v15  ;;  %1537 = vst.msk [vmem:[%s2333_s7 + $0x8] sm:$0xf] %vm1429_vm7, %v1516_v17 }
 0x12b   : > { %v1380_v19 = vsel %vm1366_vm8, %v1365_v16, 0.0  ;;  %v1395_v20 = vmul.f32 %v1365_v16, %v1365_v16  ;;  %v1428_v21 = vpack.c.bf16 %v1365_v16, %v1365_v16 }
 0x12c   : > { %v1381_v22 = vadd.f32 %v1380_v19, %v1379_v8 }
 0x12d   : > { %v1409_v23 = vsel %vm1366_vm8, %v1395_v20, 0.0  ;;  %1437 = vst.msk [vmem:[%s2298_s28 + $0x1c] sm:$0xf] %vm1429_vm7, %v1428_v21 }
 0x12e   : > { %v1382_v7 = vrot.slane %v1381_v22, 4  ;;  %v1410_v24 = vadd.f32 %v1409_v23, %v1408_v14 }
 0x130   : > { %v1383_v25 = vadd.f32 %v1382_v7, %v1381_v22  ;;  %v1411_v46 = vrot.slane %v1410_v24, 4 }
 0x132   : > { %v1384_v26 = vrot.slane %v1383_v25, 2  ;;  %v1412_v28 = vadd.f32 %v1411_v46, %v1410_v24 }
 0x134   : > { %v1385_v32 = vadd.f32 %v1384_v26, %v1383_v25  ;;  %v1413_v30 = vrot.slane %v1412_v28, 2 }
 0x136   : > { %v1386_v34 = vrot.slane %v1385_v32, 1  ;;  %v1414_v35 = vadd.f32 %v1413_v30, %v1412_v28 }
 0x138   : > { %v1415_v31 = vrot.slane %v1414_v35, 1  ;;  %v1387_v36 = vadd.f32 %v1386_v34, %v1385_v32  ;;  %v1526_v37 = vpop.permute.xlu2 %1525 }
 0x139   : > { %1542 = vst.msk [vmem:[%s2333_s7 + $0x1c] sm:$0xf] %vm1429_vm7, %v1526_v37 }
 0x13a   : > { %v1416_v38 = vadd.f32 %v1415_v31, %v1414_v35 }
 0x13c   : > { %v1418_v18 = vsel %vm1417_vm6, %v1387_v36, %v1416_v38 }
 0x13d   : > { %1420 = vst.msk [vmem:[%s280_s11] sm:$0x3] %vm1419_vm9, %v1418_v18 }
 0x148   : > { %v1524_v29 = vpop.permute.xlu1 %1523 }
 0x149   : > { %1541 = vst.msk [vmem:[%s2333_s7 + $0x18] sm:$0xf] %vm1429_vm7, %v1524_v29 }
 0x160   : > { %v1492_v39 = vpop.permute.xlu0 %1491 }
 0x161   : > { %1494 = vst.msk [vmem:[%s289_s13] sm:$0x3] %vm1419_vm9, %v1492_v39 }
 0x168   : > { %v1522_v40 = vpop.permute.xlu0 %1521 }
 0x169   : > { %1540 = vst.msk [vmem:[%s2333_s7 + $0x14] sm:$0xf] %vm1429_vm7, %v1522_v40 }
 0x16a PF: > { %s17_s21 = sadd.s32 1, %s1957_s21  }
 0x16b   : > { %p14_p5 = scmp.ge.s32.totalorder %s17_s21, 4  }
 0x16d   :  { %16 = sbr.rel (!%p14_p5) target bundleno = 1 (0x1), region = 103 }

// kernel: basic_block_forward.4
= control target key start
LH: loop header
LB: loop body
LE: loop exit
PB: predicated region body
PF: predicated region fallthrough
CT: control target
= control target key end

     0   :  { %s2021_s18 = smov 0   ;;  %s2501_s0 = inlined_call_operand.vmem [shape: bf16[2,64,8], index: 0, kind: input, shape index: {}]   ;;  %s2502_s1 = inlined_call_operand.vmem [shape: f32[1,8], index: 1, kind: input, shape index: {}]   ;;  %s2503_s2 = inlined_call_operand.vmem [shape: f32[1,8], index: 2, kind: input, shape index: {}]   ;;  %s2504_s3 = inlined_call_operand.vmem [shape: bf16[72,8], index: 3, kind: input, shape index: {}]   ;;  %s2505_s4 = inlined_call_operand.vmem [shape: bf16[2,64,8], index: 4, kind: output, shape index: {0}]   ;;  %s2506_s5 = inlined_call_operand.vmem [shape: f32[2,2,8], index: 5, kind: output, shape index: {1}]  }
   0x1 LB: > { %s1815_s19 = sadd.s32 4294967295, %s1988_s18   ;;  %p1819_p0 = scmp.ge.s32.totalorder %s1988_s18, 1  ;;  %s1988_s18 = sphi %s2021_s18, %s16_s18  }
   0x2   : > { %p190_p1 = scmp.lt.s32.totalorder %s1988_s18, 3 }
   0x4   : > { %p191_p2 = pnand %p1819_p0, %p190_p1 }
   0x5   : > { %p222_p3 = scmp.lt.s32.totalorder (!%p191_p2), %s1815_s19, 1 }
   0x6   : > { %194 = sbr.rel (%p191_p2) target bundleno = 365 (0x16d), region = 36 }
   0xb   : > { %v620_v0 = vld [vmem:[%s2504_s3 + $0x4] sm:$0xf]  ;;  %vm646_vm0 = vcmask 1043456   ;;  %s2516_s19 = smov (!%p222_p3, %s1815_s19), 1  ;;  %v2044_v2 = vld [vmem:[%s2502_s1] ss:$0 sm:$0xff] }
   0xc   : > { %v648_v1 = vsel %vm646_vm0, %v620_v0, 0  ;;  %s1935_s22 = sshll.u32 %s2516_s19, 5  ;;  %v2049_v8 = vld [vmem:[%s2503_s2] ss:$0 sm:$0xff]  ;;  %vm466_vm1 = vcmask 60416   ;;  %vm381_vm2 = vcmask 1040384  }
   0xd   : > { %1968 = vmatpush.bf16.msra.mxu1 %v648_v1  ;;  %1969 = vmatpush.bf16.msra.mxu2 %v648_v1  ;;  %s226_s25 = scalar_lea.vmem %s2501_s0, %s1935_s22  ;;  %vm382_vm3 = vsmask.f32 256  ;;  %v1990_v31 = vmov 0   ;;  %vm392_vm4 = vcmask 1044480   ;;  %vm393_vm5 = vsmask.f32 4352  ;;  %s2437_s26 = scalar_lea.vmem %s2505_s4, %s1935_s22 }
   0xe   : > { %1970 = vmatpush.bf16.msra.mxu3 %v648_v1  ;;  %657 = vmatpush.bf16.msra.mxu0 %v648_v1  ;;  %v1950_v3 = vld [vmem:[%s226_s25] sm:$0xff]   ;;  %v1965_v4 = vld [vmem:[%s226_s25 + $0x8] sm:$0xff]   ;;  %v1966_v5 = vld [vmem:[%s226_s25 + $0x10] sm:$0xff]   ;;  %v412_v32 = vunpack.c.l.b16 %v1990_v31  ;;  %v413_v40 = vunpack.c.h.b16 %v1990_v31  ;;  %vm468_vm6 = vcmask 57344   ;;  %vm505_vm9 = vsmask.f32 3328 }
   0xf   : > { %v1952_v6 = vunpack.c.h.bf16 %v1950_v3  ;;  %v1955_v7 = vunpack.c.l.bf16 %v1965_v4  ;;  %v1956_v9 = vunpack.c.h.bf16 %v1965_v4  ;;  %v1959_v10 = vunpack.c.l.bf16 %v1966_v5  ;;  %v2051_v11 = vld [vmem:[%s226_s25 + $0x18] sm:$0xff]   ;;  %vm2074_vm7 = vmand %vm381_vm2, %vm382_vm3  ;;  %s1824_s22 = sshll.u32 %s2516_s19, 1 }
  0x10   : > { %v1960_v12 = vunpack.c.h.bf16 %v1966_v5  ;;  %v1963_v13 = vunpack.c.l.bf16 %v2051_v11  ;;  %v1951_v14 = vunpack.c.l.bf16 %v1950_v3  ;;  %v430_v48 = vpack.c.b16 %v412_v32, %v412_v32  ;;  %vm2080_vm8 = vmand %vm392_vm4, %vm393_vm5  ;;  %s235_s29 = scalar_lea.vmem %s2506_s5, %s1824_s22 }
  0x11   : > { %v258_v15 = vmul.f32 %v2044_v2, %v1952_v6  ;;  %v259_v16 = vmul.f32 %v2044_v2, %v1955_v7  ;;  %v260_v17 = vmul.f32 %v2044_v2, %v1956_v9  ;;  %v261_v18 = vmul.f32 %v2044_v2, %v1959_v10 }
  0x12   : > { %v262_v19 = vmul.f32 %v2044_v2, %v1960_v12  ;;  %v263_v20 = vmul.f32 %v2044_v2, %v1963_v13  ;;  %v257_v21 = vmul.f32 %v2044_v2, %v1951_v14  ;;  %v431_v55 = vpack.c.b16 %v413_v40, %v413_v40  ;;  %467 = vst.msk [vmem:[#allocation2] sm:$0xf] %vm466_vm1, %v430_v48 }
  0x13   : > { %v270_v22 = vadd.f32 %v2049_v8, %v258_v15  ;;  %v271_v23 = vadd.f32 %v2049_v8, %v259_v16  ;;  %v272_v24 = vadd.f32 %v2049_v8, %v260_v17  ;;  %v273_v25 = vadd.f32 %v2049_v8, %v261_v18  ;;  %486 = vst.msk [vmem:[#allocation2 + $0x48] sm:$0xf] %vm466_vm1, %v430_v48 }
  0x14   : > { %v274_v26 = vadd.f32 %v2049_v8, %v262_v19  ;;  %v275_v27 = vadd.f32 %v2049_v8, %v263_v20  ;;  %v269_v30 = vadd.f32 %v2049_v8, %v257_v21  ;;  %469 = vst.msk [vmem:[#allocation2 + $0x4] sm:$0x1] %vm468_vm6, %v431_v55  ;;  %vm506_vm10 = vsmask.f32 7440 }
  0x15   : > { %v278_v28 = vmax.f32 %v270_v22, 0.0  ;;  %v279_v29 = vmax.f32 %v271_v23, 0.0  ;;  %v280_v33 = vmax.f32 %v272_v24, 0.0  ;;  %v281_v34 = vmax.f32 %v273_v25, 0.0  ;;  %487 = vst.msk [vmem:[#allocation2 + $0x4c] sm:$0x1] %vm468_vm6, %v431_v55  ;;  %vm2147_vm12 = vmor %vm505_vm9, %vm506_vm10 }
  0x16   : > { %v282_v35 = vmax.f32 %v274_v26, 0.0  ;;  %v283_v36 = vmax.f32 %v275_v27, 0.0  ;;  %v277_v39 = vmax.f32 %v269_v30, 0.0  ;;  %vm633_vm11 = vcmask 64512  }
  0x17   : > { %v286_v37 = vpack.c.bf16 %v278_v28, %v278_v28  ;;  %v287_v38 = vpack.c.bf16 %v279_v29, %v279_v29  ;;  %v288_v41 = vpack.c.bf16 %v280_v33, %v280_v33  ;;  %v289_v42 = vpack.c.bf16 %v281_v34, %v281_v34 }
  0x18   : > { %v290_v43 = vpack.c.bf16 %v282_v35, %v282_v35  ;;  %v291_v44 = vpack.c.bf16 %v283_v36, %v283_v36  ;;  %v285_v47 = vpack.c.bf16 %v277_v39, %v277_v39  ;;  %vm767_vm13 = vcmask 1042432  }
  0x19   : > { %v302_v45 = vunpack.c.l.b16 %v286_v37  ;;  %v303_v46 = vunpack.c.l.b16 %v287_v38  ;;  %v304_v49 = vunpack.c.l.b16 %v288_v41  ;;  %v305_v50 = vunpack.c.l.b16 %v289_v42  ;;  %v488_v40 = vld [vmem:[#allocation2] sm:$0xf] }
  0x1a   : > { %v306_v51 = vunpack.c.l.b16 %v290_v43  ;;  %v307_v52 = vunpack.c.l.b16 %v291_v44  ;;  %v301_v4 = vunpack.c.l.b16 %v285_v47  ;;  %vm768_vm14 = vcmask 1046532  }
  0x1b   : > { %v310_v53 = vpack.c.b16 %v302_v45, %v302_v45  ;;  %v311_v54 = vpack.c.b16 %v303_v46, %v303_v46  ;;  %v312_v56 = vpack.c.b16 %v304_v49, %v304_v49  ;;  %v313_v57 = vpack.c.b16 %v305_v50, %v305_v50  ;;  %v2102_v49 = vld [vmem:[#allocation2 + $0x4] sm:$0x1]  ;;  %vm2199_vm15 = vmor %vm767_vm13, %vm768_vm14 }
  0x1c   : > { %v314_v58 = vpack.c.b16 %v306_v51, %v306_v51  ;;  %v315_v59 = vpack.c.b16 %v307_v52, %v307_v52  ;;  %v309_v27 = vpack.c.b16 %v301_v4, %v301_v4  ;;  %v512_v4 = vshll.u32 %v488_v40, 16 }
  0x1d   : > { %v325_v60 = vshrl.u32 %v310_v53, 16  ;;  %v328_v61 = vshll.u32 %v310_v53, 16  ;;  %v332_v62 = vshrl.u32 %v311_v54, 16  ;;  %v335_v63 = vshll.u32 %v311_v54, 16 }
  0x1e   : > { %v339_v0 = vshrl.u32 %v312_v56, 16  ;;  %v342_v1 = vshll.u32 %v312_v56, 16  ;;  %v346_v3 = vshrl.u32 %v313_v57, 16  ;;  %v349_v7 = vshll.u32 %v313_v57, 16  ;;  %v802_v57 = vld [vmem:[%s2504_s3 + $0x8] sm:$0xf] }
  0x1f   : > { %v327_v5 = vrot.slane %v325_v60, 7  ;;  %v334_v6 = vrot.slane %v332_v62, 7  ;;  %v353_v9 = vshrl.u32 %v314_v58, 16  ;;  %v356_v14 = vshll.u32 %v314_v58, 16 }
  0x20   : > { %v341_v12 = vrot.slane %v339_v0, 7  ;;  %v348_v13 = vrot.slane %v346_v3, 7  ;;  %v360_v15 = vshrl.u32 %v315_v59, 16  ;;  %v363_v23 = vshll.u32 %v315_v59, 16 }
  0x21   : > { %v330_v16 = vor.u32 %v328_v61, %v327_v5  ;;  %v337_v17 = vor.u32 %v335_v63, %v334_v6  ;;  %v355_v19 = vrot.slane %v353_v9, 7  ;;  %v318_v52 = vshrl.u32 %v309_v27, 16 }
  0x22   : > { %v344_v20 = vor.u32 %v342_v1, %v341_v12  ;;  %v351_v21 = vor.u32 %v349_v7, %v348_v13  ;;  %v362_v22 = vrot.slane %v360_v15, 7  ;;  %v509_v53 = vshrl.u32 %v488_v40, 16 }
  0x23   : > { %v385_v24 = vsel %vm2074_vm7, 0, %v330_v16  ;;  %v386_v25 = vsel %vm2074_vm7, 0, %v337_v17  ;;  %v358_v26 = vor.u32 %v356_v14, %v355_v19  ;;  %v321_v58 = vshll.u32 %v309_v27, 16 }
  0x24   : > { %v396_v28 = vsel %vm2080_vm8, %v385_v24, 0  ;;  %v397_v29 = vsel %vm2080_vm8, %v386_v25, 0  ;;  %v387_v30 = vsel %vm2074_vm7, 0, %v344_v20  ;;  %v388_v31 = vsel %vm2074_vm7, 0, %v351_v21 }
  0x25   : > { %v416_v32 = vunpack.c.l.b16 %v396_v28  ;;  %v417_v33 = vunpack.c.h.b16 %v396_v28  ;;  %v418_v34 = vunpack.c.l.b16 %v397_v29  ;;  %v419_v35 = vunpack.c.h.b16 %v397_v29 }
  0x26   : > { %v398_v36 = vsel %vm2080_vm8, %v387_v30, 0  ;;  %v399_v37 = vsel %vm2080_vm8, %v388_v31, 0  ;;  %v365_v38 = vor.u32 %v363_v23, %v362_v22  ;;  %v389_v39 = vsel %vm2074_vm7, 0, %v358_v26 }
  0x27   : > { %v434_v41 = vpack.c.b16 %v416_v32, %v416_v32  ;;  %v435_v42 = vpack.c.b16 %v417_v33, %v417_v33  ;;  %v436_v43 = vpack.c.b16 %v418_v34, %v418_v34  ;;  %v437_v44 = vpack.c.b16 %v419_v35, %v419_v35 }
  0x28   : > { %v420_v45 = vunpack.c.l.b16 %v398_v36  ;;  %v421_v46 = vunpack.c.h.b16 %v398_v36  ;;  %v422_v47 = vunpack.c.l.b16 %v399_v37  ;;  %v423_v48 = vunpack.c.h.b16 %v399_v37 }
  0x29   : > { %472 = vst.msk [vmem:[#allocation2 + $0x10] sm:$0xf] %vm466_vm1, %v434_v41  ;;  %v390_v50 = vsel %vm2074_vm7, 0, %v365_v38  ;;  %v400_v51 = vsel %vm2080_vm8, %v389_v39, 0  ;;  %v828_v62 = vsel %vm646_vm0, %v802_v57, 0  ;;  %v320_v1 = vrot.slane %v318_v52, 7 }
  0x2a   : > { %473 = vst.msk [vmem:[#allocation2 + $0x14] sm:$0x1] %vm468_vm6, %v435_v42  ;;  %v438_v54 = vpack.c.b16 %v420_v45, %v420_v45  ;;  %v439_v55 = vpack.c.b16 %v421_v46, %v421_v46  ;;  %v440_v56 = vpack.c.b16 %v422_v47, %v422_v47  ;;  %v401_v59 = vsel %vm2080_vm8, %v390_v50, 0  ;;  %837 = vmatpush.bf16.msrb.mxu2 %v828_v62 }
  0x2b   : > { %474 = vst.msk [vmem:[#allocation2 + $0x18] sm:$0xf] %vm466_vm1, %v436_v43  ;;  %v424_v60 = vunpack.c.l.b16 %v400_v51  ;;  %v425_v61 = vunpack.c.h.b16 %v400_v51  ;;  %v441_v63 = vpack.c.b16 %v423_v48, %v423_v48  ;;  %v426_v0 = vunpack.c.l.b16 %v401_v59 }
  0x2c   : > { %475 = vst.msk [vmem:[#allocation2 + $0x1c] sm:$0x1] %vm468_vm6, %v437_v44  ;;  %v518_v5 = vshll.u32 %v2102_v49, 16  ;;  %v427_v6 = vunpack.c.h.b16 %v401_v59  ;;  %v323_v9 = vor.u32 %v321_v58, %v320_v1  ;;  %v2122_v12 = vrot.slane %v509_v53, 4 }
  0x2d   : > { %476 = vst.msk [vmem:[#allocation2 + $0x20] sm:$0xf] %vm466_vm1, %v438_v54  ;;  %v442_v3 = vpack.c.b16 %v424_v60, %v424_v60  ;;  %v443_v7 = vpack.c.b16 %v425_v61, %v425_v61  ;;  %v2124_v13 = vrot.slane %v512_v4, 5  ;;  %v444_v16 = vpack.c.b16 %v426_v0, %v426_v0 }
  0x2e   : > { %477 = vst.msk [vmem:[#allocation2 + $0x24] sm:$0x1] %vm468_vm6, %v439_v55  ;;  %v2126_v14 = vrot.slane %v518_v5, 5  ;;  %v384_v17 = vsel %vm2074_vm7, 0, %v323_v9  ;;  %v772_v19 = vrot.slane %v2102_v49, 5  ;;  %v445_v25 = vpack.c.b16 %v427_v6, %v427_v6 }
  0x2f   : > { %478 = vst.msk [vmem:[#allocation2 + $0x28] sm:$0xf] %vm466_vm1, %v440_v56  ;;  %v395_v26 = vsel %vm2080_vm8, %v384_v17, 0  ;;  %v1473_v49 = vld [vmem:[%s2504_s3 + $0x1c] sm:$0xf] }
  0x30   : > { %v490_v15 = vld [vmem:[#allocation2 + $0x10] sm:$0xf]  ;;  %479 = vst.msk [vmem:[#allocation2 + $0x2c] sm:$0x1] %vm468_vm6, %v441_v63  ;;  %v414_v35 = vunpack.c.l.b16 %v395_v26  ;;  %v415_v36 = vunpack.c.h.b16 %v395_v26 }
  0x31   : > { %v2132_v20 = vld [vmem:[#allocation2 + $0x14] sm:$0x1]  ;;  %v537_v21 = vshrl.u32 %v490_v15, 16  ;;  %v540_v22 = vshll.u32 %v490_v15, 16  ;;  %480 = vst.msk [vmem:[#allocation2 + $0x30] sm:$0xf] %vm466_vm1, %v442_v3 }
  0x32   : > { %v491_v23 = vld [vmem:[#allocation2 + $0x18] sm:$0xf]  ;;  %v546_v24 = vshll.u32 %v2132_v20, 16  ;;  %481 = vst.msk [vmem:[#allocation2 + $0x34] sm:$0x1] %vm468_vm6, %v443_v7  ;;  %v432_v47 = vpack.c.b16 %v414_v35, %v414_v35  ;;  %v433_v63 = vpack.c.b16 %v415_v36, %v415_v36 }
  0x33   : > { %v2139_v27 = vld [vmem:[#allocation2 + $0x1c] sm:$0x1]  ;;  %v539_v28 = vrot.slane %v537_v21, 4  ;;  %v542_v29 = vrot.slane %v540_v22, 5  ;;  %v551_v30 = vshrl.u32 %v491_v23, 16  ;;  %v554_v31 = vshll.u32 %v491_v23, 16 }
  0x34   : > { %v548_v32 = vrot.slane %v546_v24, 5  ;;  %v560_v33 = vshll.u32 %v2139_v27, 16  ;;  %v492_v34 = vld [vmem:[#allocation2 + $0x20] sm:$0xf]  ;;  %482 = vst.msk [vmem:[#allocation2 + $0x38] sm:$0xf] %vm466_vm1, %v444_v16 }
  0x35   : > { %v543_v37 = vor.u32 %v542_v29, %v539_v28  ;;  %v553_v38 = vrot.slane %v551_v30, 4  ;;  %v556_v39 = vrot.slane %v554_v31, 5  ;;  %v2143_v40 = vld [vmem:[#allocation2 + $0x24] sm:$0x1]  ;;  %v565_v41 = vshrl.u32 %v492_v34, 16 }
  0x36   : > { %v562_v43 = vrot.slane %v560_v33, 5  ;;  %v493_v44 = vld [vmem:[#allocation2 + $0x28] sm:$0xf]  ;;  %v568_v45 = vshll.u32 %v492_v34, 16  ;;  %v574_v46 = vshll.u32 %v2143_v40, 16  ;;  %v515_v28 = vor.u32 %v2124_v13, %v2122_v12 }
  0x37   : > { %v544_v48 = vrot.slane %v543_v37, 4  ;;  %v557_v50 = vor.u32 %v556_v39, %v553_v38  ;;  %v2152_v51 = vld [vmem:[#allocation2 + $0x2c] sm:$0x1]  ;;  %v567_v52 = vrot.slane %v565_v41, 4  ;;  %v579_v53 = vshrl.u32 %v493_v44, 16 }
  0x38   : > { %v570_v54 = vrot.slane %v568_v45, 5  ;;  %v576_v55 = vrot.slane %v574_v46, 5  ;;  %v582_v56 = vshll.u32 %v493_v44, 16  ;;  %v588_v57 = vshll.u32 %v2152_v51, 16  ;;  %483 = vst.msk [vmem:[#allocation2 + $0x3c] sm:$0x1] %vm468_vm6, %v445_v25 }
  0x39   : > { %v549_v58 = vsel %vm2147_vm12, %v544_v48, %v548_v32  ;;  %v558_v59 = vrot.slane %v557_v50, 4  ;;  %v581_v60 = vrot.slane %v579_v53, 4  ;;  %v494_v61 = vld [vmem:[#allocation2 + $0x30] sm:$0xf]  ;;  %v2158_v62 = vld [vmem:[#allocation2 + $0x34] sm:$0x1] }
  0x3a   : > { %v623_v0 = vunpack.c.l.b16 %v549_v58  ;;  %v571_v1 = vor.u32 %v570_v54, %v567_v52  ;;  %v584_v3 = vrot.slane %v582_v56, 5  ;;  %v590_v4 = vrot.slane %v588_v57, 5  ;;  %470 = vst.msk [vmem:[#allocation2 + $0x8] sm:$0xf] %vm466_vm1, %v432_v47  ;;  %v876_v23 = vld [vmem:[%s2504_s3 + $0xc] sm:$0xf] }
  0x3b   : > { %v563_v5 = vsel %vm2147_vm12, %v558_v59, %v562_v43  ;;  %v495_v6 = vld [vmem:[#allocation2 + $0x38] sm:$0xf]  ;;  %v593_v7 = vshrl.u32 %v494_v61, 16  ;;  %v596_v9 = vshll.u32 %v494_v61, 16  ;;  %v602_v15 = vshll.u32 %v2158_v62, 16 }
  0x3c   : > { %v624_v16 = vunpack.c.l.b16 %v563_v5  ;;  %v572_v17 = vrot.slane %v571_v1, 4  ;;  %v585_v21 = vor.u32 %v584_v3, %v581_v60  ;;  %v607_v22 = vshrl.u32 %v495_v6, 16  ;;  %471 = vst.msk [vmem:[#allocation2 + $0xc] sm:$0x1] %vm468_vm6, %v433_v63  ;;  %v496_v29 = vld [vmem:[%s2504_s3] sm:$0xf] }
  0x3d   : > { %v595_v24 = vrot.slane %v593_v7, 4  ;;  %v598_v25 = vrot.slane %v596_v9, 5  ;;  %v610_v26 = vshll.u32 %v495_v6, 16  ;;  %v604_v37 = vrot.slane %v602_v15, 5  ;;  %v1077_v43 = vld [vmem:[%s2504_s3 + $0x10] sm:$0xf] }
  0x3e   : > { %v630_v30 = vpack.c.b16 %v624_v16, %v623_v0  ;;  %v577_v31 = vsel %vm2147_vm12, %v572_v17, %v576_v55  ;;  %v586_v32 = vrot.slane %v585_v21, 4  ;;  %v609_v33 = vrot.slane %v607_v22, 4  ;;  %v743_v50 = vld [vmem:[#allocation2] sm:$0xe]  ;;  %v1272_v55 = vld [vmem:[%s2504_s3 + $0x18] sm:$0xf] }
  0x3f   : > { %v625_v34 = vunpack.c.l.b16 %v577_v31  ;;  %v2175_v35 = vld [vmem:[#allocation2 + $0x3c] sm:$0x1]  ;;  %v599_v36 = vor.u32 %v598_v25, %v595_v24  ;;  %v612_v38 = vrot.slane %v610_v26, 5  ;;  %v910_v39 = vsel %vm646_vm0, %v876_v23, 0  ;;  %v951_v24 = vld [vmem:[#allocation2 + $0x10] sm:$0xf] }
  0x40   : > { %1826 = vmatmul.msk.bf16.vlgmr.msra.gmra.mxu1 %vm633_vm11, %v630_v30  ;;  %v591_v12 = vsel %vm2147_vm12, %v586_v32, %v590_v4  ;;  %v616_v13 = vshll.u32 %v2175_v35, 16  ;;  %v712_v41 = vsel %vm646_vm0, %v496_v29, 0  ;;  %v516_v48 = vrot.slane %v515_v28, 4  ;;  %919 = vmatpush.bf16.msrb.mxu3 %v910_v39  ;;  %v1831_v29 = vld [vmem:[#allocation2] sm:$0xf] }
  0x41   : > { %v626_v44 = vunpack.c.l.b16 %v591_v12  ;;  %v600_v45 = vrot.slane %v599_v36, 4  ;;  %v613_v46 = vor.u32 %v612_v38, %v609_v33  ;;  %v489_v47 = vld [vmem:[#allocation2 + $0x8] sm:$0xf]  ;;  %721 = vmatpush.bf16.msrb.mxu1 %v712_v41  ;;  %v1103_v60 = vsel %vm646_vm0, %v1077_v43, 0  ;;  %v1198_v43 = vld [vmem:[%s2504_s3 + $0x14] sm:$0xf] }
  0x42   : > { %v618_v52 = vrot.slane %v616_v13, 5  ;;  %v523_v53 = vshrl.u32 %v489_v47, 16  ;;  %v526_v54 = vshll.u32 %v489_v47, 16  ;;  %v744_v61 = vld [vmem:[#allocation2 + $0x8] sm:$0xe]  ;;  %1112 = vmatpush.bf16.msrb.mxu0 %v1103_v60  ;;  %v521_v6 = vsel %vm2147_vm12, %v516_v48, %v2126_v14 }
  0x43   : > { %v631_v56 = vpack.c.b16 %v626_v44, %v625_v34  ;;  %v605_v57 = vsel %vm2147_vm12, %v600_v45, %v604_v37  ;;  %v614_v58 = vrot.slane %v613_v46, 4  ;;  %v498_v59 = vld [vmem:[#allocation2 + $0xc] sm:$0x1]  ;;  %v949_v4 = vld [vmem:[#allocation2 + $0x8] sm:$0xf]  ;;  %v1849_v21 = vrot.slane %v743_v50, 9 }
  0x44   : > { %v627_v63 = vunpack.c.l.b16 %v605_v57  ;;  %v525_v0 = vrot.slane %v523_v53, 4  ;;  %v528_v1 = vrot.slane %v526_v54, 5  ;;  %v532_v3 = vshll.u32 %v498_v59, 16  ;;  %v2204_v14 = vld [vmem:[#allocation2 + $0xc] sm:$0x1] }
  0x45   : > { %1827 = vmatmul.msk.bf16.vlgmr.msra.gmra.mxu2 %vm633_vm11, %v631_v56  ;;  %v619_v5 = vsel %vm2147_vm12, %v614_v58, %v618_v52  ;;  %v776_v7 = vrot.slane %v498_v59, 5  ;;  %v1850_v22 = vrot.slane %v744_v61, 9  ;;  %v1306_v23 = vsel %vm646_vm0, %v1272_v55, 0  ;;  %v1937_v32 = vld [vmem:[#allocation2 + $0x4] sm:$0xf0] }
  0x46   : > { %v628_v9 = vunpack.c.l.b16 %v619_v5  ;;  %v529_v15 = vor.u32 %v528_v1, %v525_v0  ;;  %v534_v16 = vrot.slane %v532_v3, 5  ;;  %v966_v25 = vshrl.u32 %v949_v4, 16  ;;  %1315 = vmatpush.bf16.msra.mxu2 %v1306_v23  ;;  %v2210_v34 = vld [vmem:[#allocation2 + $0x14] sm:$0x1]  ;;  %v1594_v44 = vld [vmem:[%s2504_s3 + $0x20] sm:$0xf] }
  0x47   : > { %v969_v30 = vshll.u32 %v949_v4, 16  ;;  %v621_v31 = vunpack.c.l.b16 %v521_v6  ;;  %v773_v33 = vsel %vm2199_vm15, %v1849_v21, %v772_v19  ;;  %v777_v38 = vsel %vm2199_vm15, %v1850_v22, %v776_v7  ;;  %v955_v3 = vld [vmem:[#allocation2 + $0x20] sm:$0xf]  ;;  %v1863_v4 = vld [vmem:[#allocation2 + $0x8] sm:$0xf] }
  0x48   : > { %v632_v26 = vpack.c.b16 %v628_v9, %v627_v63  ;;  %v530_v28 = vrot.slane %v529_v15, 4  ;;  %v968_v36 = vrot.slane %v966_v25, 4  ;;  %v980_v13 = vshrl.u32 %v951_v24, 16  ;;  %v953_v63 = vld [vmem:[#allocation2 + $0x18] sm:$0xf] }
  0x49   : > { %v971_v12 = vrot.slane %v969_v30, 5  ;;  %v975_v19 = vshll.u32 %v2204_v14, 16  ;;  %v983_v41 = vshll.u32 %v951_v24, 16  ;;  %v1832_v45 = vor.u32 %v1937_v32, %v1831_v29  ;;  %v1941_v5 = vld [vmem:[#allocation2 + $0xc] sm:$0xf0] }
  0x4a   : > { %1828 = vmatmul.msk.bf16.vlgmr.msra.gmra.mxu3 %vm633_vm11, %v632_v26  ;;  %v535_v37 = vsel %vm2147_vm12, %v530_v28, %v534_v16  ;;  %v982_v47 = vrot.slane %v980_v13, 4  ;;  %v989_v48 = vshll.u32 %v2210_v34, 16  ;;  %v803_v52 = vunpack.c.l.b16 %v773_v33  ;;  %v745_v7 = vld [vmem:[#allocation2 + $0x10] sm:$0xe]  ;;  %v746_v9 = vld [vmem:[#allocation2 + $0x18] sm:$0xe] }
  0x4b   : > { %v622_v39 = vunpack.c.l.b16 %v535_v37  ;;  %v972_v46 = vor.u32 %v971_v12, %v968_v36  ;;  %v804_v53 = vunpack.c.l.b16 %v777_v38  ;;  %v985_v54 = vrot.slane %v983_v41, 5  ;;  %v1835_v32 = vld [vmem:[#allocation2 + $0x10] sm:$0xf]  ;;  %v1938_v33 = vld [vmem:[#allocation2 + $0x14] sm:$0xf0] }
  0x4c   : > { %v1499_v55 = vsel %vm646_vm0, %v1473_v49, 0  ;;  %v1224_v56 = vsel %vm646_vm0, %v1198_v43, 0  ;;  %v1620_v57 = vsel %vm646_vm0, %v1594_v44, 0  ;;  %v977_v59 = vrot.slane %v975_v19, 5  ;;  %v2240_v13 = vld [vmem:[#allocation2 + $0x1c] sm:$0x1] }
  0x4d   : > { %v629_v50 = vpack.c.b16 %v622_v39, %v621_v31  ;;  %v973_v58 = vrot.slane %v972_v46, 4  ;;  %v986_v60 = vor.u32 %v985_v54, %v982_v47  ;;  %1508 = vmatpush.bf16.msra.mxu3 %v1499_v55  ;;  %v991_v61 = vrot.slane %v989_v48, 5  ;;  %1233 = vmatpush.bf16.msra.mxu1 %v1224_v56  ;;  %v2242_v49 = vld [vmem:[#allocation2 + $0x24] sm:$0x1]  ;;  %v957_v56 = vld [vmem:[#allocation2 + $0x28] sm:$0xf] }
  0x4e   : > { %v811_v0 = vpack.c.b16 %v804_v53, %v803_v52  ;;  %v994_v15 = vshrl.u32 %v953_v63, 16  ;;  %v997_v21 = vshll.u32 %v953_v63, 16  ;;  %v1008_v22 = vshrl.u32 %v955_v3, 16  ;;  %v747_v63 = vld [vmem:[#allocation2 + $0x20] sm:$0xe] }
  0x4f   : > { %1825 = vmatmul.msk.bf16.vlgmr.msra.gmra.mxu0 %vm633_vm11, %v629_v50  ;;  %v987_v1 = vrot.slane %v986_v60, 4  ;;  %v978_v6 = vsel %vm2147_vm12, %v973_v58, %v977_v59  ;;  %v1011_v23 = vshll.u32 %v955_v3, 16  ;;  %v1864_v24 = vor.u32 %v1941_v5, %v1863_v4  ;;  %v959_v58 = vld [vmem:[#allocation2 + $0x30] sm:$0xf]  ;;  %v1867_v60 = vld [vmem:[#allocation2 + $0x18] sm:$0xf] }
  0x50   : > { %1845 = vmatmul.msk.bf16.vlgmr.msrb.gmra.mxu1 %vm633_vm11, %v1832_v45  ;;  %1629 = vmatpush.bf16.msra.mxu0 %v1620_v57  ;;  %v1851_v25 = vrot.slane %v745_v7, 9  ;;  %v780_v26 = vrot.slane %v2132_v20, 5  ;;  %v1852_v28 = vrot.slane %v746_v9, 9  ;;  %v784_v29 = vrot.slane %v2139_v27, 5 }
  0x51   : > { %v992_v16 = vsel %vm2147_vm12, %v987_v1, %v991_v61  ;;  %v1078_v30 = vunpack.c.l.b16 %v978_v6  ;;  %v996_v36 = vrot.slane %v994_v15, 4  ;;  %v999_v37 = vrot.slane %v997_v21, 5  ;;  %v1942_v61 = vld [vmem:[#allocation2 + $0x1c] sm:$0xf0] }
  0x52   : > { %v1079_v31 = vunpack.c.l.b16 %v992_v16  ;;  %v1010_v38 = vrot.slane %v1008_v22, 4  ;;  %v1013_v12 = vrot.slane %v1011_v23, 5  ;;  %v781_v20 = vsel %vm2199_vm15, %v1851_v25, %v780_v26  ;;  %v1939_v26 = vld [vmem:[#allocation2 + $0x24] sm:$0xf0] }
  0x53   : > { %v785_v27 = vsel %vm2199_vm15, %v1852_v28, %v784_v29  ;;  %v1836_v19 = vor.u32 %v1938_v33, %v1835_v32  ;;  %v1000_v41 = vor.u32 %v999_v37, %v996_v36  ;;  %v1003_v43 = vshll.u32 %v2240_v13, 16  ;;  %v2263_v32 = vld [vmem:[#allocation2 + $0x2c] sm:$0x1]  ;;  %v2265_v33 = vld [vmem:[#allocation2 + $0x34] sm:$0x1] }
  0x54   : > { %v1086_v39 = vpack.c.b16 %v1079_v31, %v1078_v30  ;;  %v1014_v44 = vor.u32 %v1013_v12, %v1010_v38  ;;  %v1017_v45 = vshll.u32 %v2242_v49, 16  ;;  %v805_v46 = vunpack.c.l.b16 %v781_v20 }
  0x55   : > { %1857 = vmatmul.msk.bf16.vlgmr.msrb.gmra.mxu2 %vm633_vm11, %v811_v0  ;;  %v806_v47 = vunpack.c.l.b16 %v785_v27  ;;  %v1964_v48 = vunpack.c.h.bf16 %v2051_v11  ;;  %v1001_v52 = vrot.slane %v1000_v41, 4  ;;  %v1005_v53 = vrot.slane %v1003_v43, 5  ;;  %v748_v0 = vld [vmem:[#allocation2 + $0x28] sm:$0xe] }
  0x56   : > { %v1015_v54 = vrot.slane %v1014_v44, 4  ;;  %v1019_v55 = vrot.slane %v1017_v45, 5  ;;  %v1022_v11 = vshrl.u32 %v957_v56, 16  ;;  %v1025_v1 = vshll.u32 %v957_v56, 16  ;;  %v750_v56 = vld [vmem:[#allocation2 + $0x38] sm:$0xe] }
  0x57   : > { %v264_v50 = vmul.f32 %v2044_v2, %v1964_v48  ;;  %v812_v57 = vpack.c.b16 %v806_v47, %v805_v46  ;;  %v1006_v2 = vsel %vm2147_vm12, %v1001_v52, %v1005_v53  ;;  %v1036_v5 = vshrl.u32 %v959_v58, 16  ;;  %v961_v46 = vld [vmem:[#allocation2 + $0x38] sm:$0xf] }
  0x58   : > { %v1020_v4 = vsel %vm2147_vm12, %v1015_v54, %v1019_v55  ;;  %v1039_v6 = vshll.u32 %v959_v58, 16  ;;  %v1868_v7 = vor.u32 %v1942_v61, %v1867_v60  ;;  %v788_v15 = vrot.slane %v2143_v40, 5  ;;  %v749_v54 = vld [vmem:[#allocation2 + $0x30] sm:$0xe]  ;;  %v1871_v61 = vld [vmem:[#allocation2 + $0x28] sm:$0xf] }
  0x59   : > { %v276_v59 = vadd.f32 %v2049_v8, %v264_v50  ;;  %v1853_v8 = vrot.slane %v747_v63, 9  ;;  %v1854_v16 = vrot.slane %v748_v0, 9  ;;  %v792_v21 = vrot.slane %v2152_v51, 5  ;;  %v1943_v63 = vld [vmem:[#allocation2 + $0x2c] sm:$0xf0] }
  0x5a   : > { %1877 = vmatmul.msk.bf16.vlgmr.msrb.gmra.mxu3 %vm633_vm11, %v1864_v24  ;;  %v1080_v22 = vunpack.c.l.b16 %v1006_v2  ;;  %v1081_v23 = vunpack.c.l.b16 %v1020_v4  ;;  %v1839_v24 = vld [vmem:[#allocation2 + $0x20] sm:$0xf]  ;;  %v1024_v28 = vrot.slane %v1022_v11, 4  ;;  %v1027_v29 = vrot.slane %v1025_v1, 5 }
  0x5b   : > { %v284_v3 = vmax.f32 %v276_v59, 0.0  ;;  %v1038_v30 = vrot.slane %v1036_v5, 4  ;;  %v1041_v31 = vrot.slane %v1039_v6, 5  ;;  %v789_v40 = vsel %vm2199_vm15, %v1853_v8, %v788_v15 }
  0x5c   : > { %v793_v51 = vsel %vm2199_vm15, %v1854_v16, %v792_v21  ;;  %v1087_v37 = vpack.c.b16 %v1081_v23, %v1080_v22  ;;  %v1840_v38 = vor.u32 %v1939_v26, %v1839_v24  ;;  %v1028_v27 = vor.u32 %v1027_v29, %v1024_v28  ;;  %v1843_v16 = vld [vmem:[#allocation2 + $0x30] sm:$0xf]  ;;  %v1940_v21 = vld [vmem:[#allocation2 + $0x34] sm:$0xf0] }
  0x5d   : > { %v292_v9 = vpack.c.bf16 %v284_v3, %v284_v3  ;;  %v1045_v41 = vshll.u32 %v2265_v33, 16  ;;  %v807_v43 = vunpack.c.l.b16 %v789_v40  ;;  %v808_v44 = vunpack.c.l.b16 %v793_v51  ;;  %v1345_v28 = vld [vmem:[#allocation2 + $0x10] sm:$0xf] }
  0x5e   : > { %v1029_v48 = vrot.slane %v1028_v27, 4  ;;  %v1050_v58 = vshrl.u32 %v961_v46, 16  ;;  %v1053_v59 = vshll.u32 %v961_v46, 16  ;;  %v796_v0 = vrot.slane %v2158_v62, 5  ;;  %v2287_v62 = vld [vmem:[#allocation2 + $0x3c] sm:$0x1] }
  0x5f   : > { %1881 = vmatmul.msk.bf16.vlgmr.msrb.gmra.mxu0 %vm633_vm11, %v1086_v39  ;;  %v308_v25 = vunpack.c.l.b16 %v292_v9  ;;  %v1031_v39 = vshll.u32 %v2263_v32, 16  ;;  %v1047_v53 = vrot.slane %v1045_v41, 5  ;;  %v813_v55 = vpack.c.b16 %v808_v44, %v807_v43 }
  0x60   : > { %1846 = vmatmul.msk.bf16.gmra.mxu1 %vm633_vm11, %v1836_v19  ;;  %v1042_v19 = vor.u32 %v1041_v31, %v1038_v30  ;;  %v800_v11 = vrot.slane %v2175_v35, 5  ;;  %v1855_v4 = vrot.slane %v749_v54, 9  ;;  %v1856_v5 = vrot.slane %v750_v56, 9 }
  0x61   : > { %v316_v36 = vpack.c.b16 %v308_v25, %v308_v25  ;;  %v1033_v50 = vrot.slane %v1031_v39, 5  ;;  %v1055_v9 = vrot.slane %v1053_v59, 5  ;;  %v1872_v8 = vor.u32 %v1943_v63, %v1871_v61 }
  0x62   : > { %v1043_v52 = vrot.slane %v1042_v19, 4  ;;  %v797_v22 = vsel %vm2199_vm15, %v1855_v4, %v796_v0  ;;  %v801_v23 = vsel %vm2199_vm15, %v1856_v5, %v800_v11  ;;  %v1059_v25 = vshll.u32 %v2287_v62, 16  ;;  %v1348_v0 = vld [vmem:[#allocation2 + $0x1c] sm:$0x1] }
  0x63   : > { %v367_v12 = vshrl.u32 %v316_v36, 16  ;;  %v370_v20 = vshll.u32 %v316_v36, 16  ;;  %v1034_v2 = vsel %vm2147_vm12, %v1029_v48, %v1033_v50  ;;  %v1844_v29 = vor.u32 %v1940_v21, %v1843_v16  ;;  %v1347_v36 = vld [vmem:[#allocation2 + $0x18] sm:$0xf] }
  0x64   : > { %v1048_v10 = vsel %vm2147_vm12, %v1043_v52, %v1047_v53  ;;  %v1082_v35 = vunpack.c.l.b16 %v1034_v2  ;;  %v809_v30 = vunpack.c.l.b16 %v797_v22  ;;  %v810_v31 = vunpack.c.l.b16 %v801_v23  ;;  %v1945_v16 = vld [vmem:[#allocation2 + $0x14] sm:$0xf0]  ;;  %v1349_v22 = vld [vmem:[#allocation2 + $0x20] sm:$0xf]  ;;  %v1351_v23 = vld [vmem:[#allocation2 + $0x28] sm:$0xf] }
  0x65   : > { %1858 = vmatmul.msk.bf16.gmra.mxu2 %vm633_vm11, %v812_v57  ;;  %v369_v45 = vrot.slane %v367_v12, 7  ;;  %v1083_v15 = vunpack.c.l.b16 %v1048_v10  ;;  %v1061_v51 = vrot.slane %v1059_v25, 5  ;;  %v1143_v12 = vld [vmem:[#allocation2 + $0x10] sm:$0xe]  ;;  %v1365_v27 = vshll.u32 %v1345_v28, 16 }
  0x66   : > { %v1376_v43 = vshrl.u32 %v1347_v36, 16  ;;  %v1379_v44 = vshll.u32 %v1347_v36, 16  ;;  %v1172_v46 = vrot.slane %v2210_v34, 5  ;;  %v1886_v54 = vrot.slane %v1143_v12, 9  ;;  %v1144_v36 = vld [vmem:[#allocation2 + $0x18] sm:$0xe] }
  0x67   : > { %v372_v47 = vor.u32 %v370_v20, %v369_v45  ;;  %v1088_v26 = vpack.c.b16 %v1083_v15, %v1082_v35  ;;  %v1362_v20 = vshrl.u32 %v1345_v28, 16  ;;  %v1168_v45 = vrot.slane %v2204_v14, 5  ;;  %v1899_v15 = vld [vmem:[#allocation2 + $0x10] sm:$0xf] }
  0x68   : > { %v1367_v59 = vrot.slane %v1365_v27, 5  ;;  %v1378_v61 = vrot.slane %v1376_v43, 4  ;;  %v1381_v63 = vrot.slane %v1379_v44, 5  ;;  %v1407_v12 = vshll.u32 %v1351_v23, 16 }
  0x69   : > { %v391_v57 = vsel %vm2074_vm7, 0, %v372_v47  ;;  %v814_v47 = vpack.c.b16 %v810_v31, %v809_v30  ;;  %v1539_v31 = vld [vmem:[#allocation2 + $0x18] sm:$0xe]  ;;  %vm1711_vm0 = vcmask 58368  }
  0x6a   : > { %1878 = vmatmul.msk.bf16.gmra.mxu3 %vm633_vm11, %v1868_v7  ;;  %v402_v60 = vsel %vm2080_vm8, %v391_v57, 0  ;;  %v1052_v7 = vrot.slane %v1050_v58, 4  ;;  %v2306_v57 = vld [vmem:[#allocation2 + $0x14] sm:$0x1]  ;;  %v1364_v58 = vrot.slane %v1362_v20, 4  ;;  %v1900_v20 = vor.u32 %v1945_v16, %v1899_v15 }
  0x6b   : > { %v428_v1 = vunpack.c.l.b16 %v402_v60  ;;  %v429_v3 = vunpack.c.h.b16 %v402_v60  ;;  %v1371_v4 = vshll.u32 %v2306_v57, 16  ;;  %v1922_v44 = vrot.slane %v1539_v31, 9  ;;  %v1903_v15 = vld [vmem:[#allocation2 + $0x20] sm:$0xf]  ;;  %v1946_v16 = vld [vmem:[#allocation2 + $0x24] sm:$0xf0] }
  0x6c   : > { %v1056_v24 = vor.u32 %v1055_v9, %v1052_v7  ;;  %v1385_v7 = vshll.u32 %v1348_v0, 16 }
  0x6d   : > { %v446_v18 = vpack.c.b16 %v428_v1, %v428_v1  ;;  %v447_v6 = vpack.c.b16 %v429_v3, %v429_v3  ;;  %v1173_v3 = vsel %vm2199_vm15, %v1886_v54, %v1172_v46  ;;  %v1373_v21 = vrot.slane %v1371_v4, 5 }
  0x6e   : > { %v1057_v40 = vrot.slane %v1056_v24, 4  ;;  %v1200_v35 = vunpack.c.l.b16 %v1173_v3  ;;  %v1387_v28 = vrot.slane %v1385_v7, 5  ;;  %v1887_v46 = vrot.slane %v1144_v36, 9 }
  0x6f   : > { %1882 = vmatmul.msk.bf16.gmra.mxu0 %vm633_vm11, %v1087_v37  ;;  %484 = vst.msk [vmem:[#allocation2 + $0x40] sm:$0xf] %vm466_vm1, %v446_v18  ;;  %v1142_v37 = vld [vmem:[#allocation2 + $0x8] sm:$0xe]  ;;  %v1368_v18 = vor.u32 %v1367_v59, %v1364_v58  ;;  %v1350_v58 = vld [vmem:[#allocation2 + $0x24] sm:$0x1]  ;;  %v1904_v36 = vor.u32 %v1946_v16, %v1903_v15 }
  0x70   : > { %1847 = vmatmul.msk.bf16.gmra.mxu1 %vm633_vm11, %v1840_v38  ;;  %485 = vst.msk [vmem:[#allocation2 + $0x44] sm:$0x1] %vm468_vm6, %v447_v6  ;;  %v1885_v53 = vrot.slane %v1142_v37, 9  ;;  %v1062_v56 = vsel %vm2147_vm12, %v1057_v40, %v1061_v51  ;;  %v1382_v6 = vor.u32 %v1381_v63, %v1378_v61  ;;  %v1145_v40 = vld [vmem:[#allocation2 + $0x20] sm:$0xe]  ;;  %v1390_v51 = vshrl.u32 %v1349_v22, 16 }
  0x71   : > { %v1084_v10 = vunpack.c.l.b16 %v1062_v56  ;;  %v1369_v25 = vrot.slane %v1368_v18, 4  ;;  %v1393_v37 = vshll.u32 %v1349_v22, 16  ;;  %v1352_v59 = vld [vmem:[#allocation2 + $0x2c] sm:$0x1]  ;;  %v1399_v61 = vshll.u32 %v1350_v58, 16 }
  0x72   : > { %v1169_v1 = vsel %vm2199_vm15, %v1885_v53, %v1168_v45  ;;  %v1568_v45 = vrot.slane %v1348_v0, 5  ;;  %v1413_v0 = vshll.u32 %v1352_v59, 16  ;;  %v1148_v15 = vld [vmem:[#allocation2 + $0x38] sm:$0xe] }
  0x73   : > { %v1395_v53 = vrot.slane %v1393_v37, 5 }
  0x75   : > { %1859 = vmatmul.msk.bf16.gmra.mxu2 %vm633_vm11, %v813_v55  ;;  %v1875_v55 = vld [vmem:[#allocation2 + $0x38] sm:$0xf] }
  0x76   : > { %v963_v38 = vld [vmem:[#allocation2 + $0x40] sm:$0xf] }
  0x77   : > { %v2298_v39 = vld [vmem:[#allocation2 + $0x44] sm:$0x1]  ;;  %v1064_v19 = vshrl.u32 %v963_v38, 16  ;;  %v1067_v41 = vshll.u32 %v963_v38, 16  ;;  %v1944_v14 = vld [vmem:[#allocation2 + $0x3c] sm:$0xf0] }
  0x78   : > { %v1073_v48 = vshll.u32 %v2298_v39, 16  ;;  %v1876_v2 = vor.u32 %v1944_v14, %v1875_v55  ;;  %v1404_v38 = vshrl.u32 %v1351_v23, 16  ;;  %v1409_v55 = vrot.slane %v1407_v12, 5  ;;  %v1149_v16 = vld [vmem:[#allocation2 + $0x40] sm:$0xe] }
  0x79   : > { %v1066_v50 = vrot.slane %v1064_v19, 4  ;;  %v1069_v52 = vrot.slane %v1067_v41, 5  ;;  %v1564_v19 = vrot.slane %v2306_v57, 5  ;;  %v1374_v41 = vsel %vm2147_vm12, %v1369_v25, %v1373_v21  ;;  %v1540_v21 = vld [vmem:[#allocation2 + $0x20] sm:$0xe] }
  0x7a   : > { %1879 = vmatmul.msk.bf16.gmra.mxu3 %vm633_vm11, %v1872_v8  ;;  %v1075_v34 = vrot.slane %v1073_v48, 5  ;;  %v1199_v8 = vunpack.c.l.b16 %v1169_v1  ;;  %v1888_v48 = vrot.slane %v1145_v40, 9  ;;  %v1406_v54 = vrot.slane %v1404_v38, 4  ;;  %v1146_v25 = vld [vmem:[#allocation2 + $0x28] sm:$0xe] }
  0x7b   : > { %v1070_v60 = vor.u32 %v1069_v52, %v1066_v50  ;;  %v1180_v50 = vrot.slane %v2242_v49, 5  ;;  %v1392_v52 = vrot.slane %v1390_v51, 4  ;;  %v1474_v56 = vunpack.c.l.b16 %v1374_v41 }
  0x7c   : > { %v1207_v30 = vpack.c.b16 %v1200_v35, %v1199_v8  ;;  %v1410_v63 = vor.u32 %v1409_v55, %v1406_v54  ;;  %v1355_v8 = vld [vmem:[#allocation2 + $0x38] sm:$0xf]  ;;  %v1923_v40 = vrot.slane %v1540_v21, 9  ;;  %v1572_v51 = vrot.slane %v1350_v58, 5 }
  0x7d   : > { %v1071_v11 = vrot.slane %v1070_v60, 4  ;;  %v1569_v60 = vsel %vm2199_vm15, %v1922_v44, %v1568_v45  ;;  %v1181_v49 = vsel %vm2199_vm15, %v1888_v48, %v1180_v50  ;;  %v1435_v31 = vshll.u32 %v1355_v8, 16  ;;  %v1354_v48 = vld [vmem:[#allocation2 + $0x34] sm:$0x1]  ;;  %v1356_v50 = vld [vmem:[#allocation2 + $0x3c] sm:$0x1] }
  0x7e   : > { %v1596_v3 = vunpack.c.l.b16 %v1569_v60  ;;  %v1411_v18 = vrot.slane %v1410_v63, 4  ;;  %v1441_v58 = vshll.u32 %v1356_v50, 16 }
  0x7f   : > { %1883 = vmatmul.msk.bf16.gmra.mxu0 %vm633_vm11, %v1088_v26  ;;  %v1076_v5 = vsel %vm2147_vm12, %v1071_v11, %v1075_v34  ;;  %v1383_v26 = vrot.slane %v1382_v6, 4  ;;  %v1396_v34 = vor.u32 %v1395_v53, %v1392_v52  ;;  %v1415_v6 = vrot.slane %v1413_v0, 5  ;;  %v1542_v0 = vld [vmem:[#allocation2 + $0x30] sm:$0xe] }
  0x80   : > { %1848 = vmatmul.msk.bf16.gmra.mxu1 %vm633_vm11, %v1844_v29  ;;  %v1085_v9 = vunpack.c.l.b16 %v1076_v5  ;;  %v1538_v29 = vld [vmem:[#allocation2 + $0x10] sm:$0xe]  ;;  %v1401_v5 = vrot.slane %v1399_v61, 5  ;;  %v1573_v52 = vsel %vm2199_vm15, %v1923_v40, %v1572_v51  ;;  %v1443_v63 = vrot.slane %v1441_v58, 5  ;;  %v1544_v58 = vld [vmem:[#allocation2 + $0x40] sm:$0xe] }
  0x81   : > { %v1921_v27 = vrot.slane %v1538_v29, 9  ;;  %v1388_v43 = vsel %vm2147_vm12, %v1383_v26, %v1387_v28  ;;  %v1397_v4 = vrot.slane %v1396_v34, 4  ;;  %v1416_v23 = vsel %vm2147_vm12, %v1411_v18, %v1415_v6  ;;  %v1147_v26 = vld [vmem:[#allocation2 + $0x30] sm:$0xe] }
  0x82   : > { %v1089_v24 = vpack.c.b16 %v1085_v9, %v1084_v10  ;;  %v1475_v57 = vunpack.c.l.b16 %v1388_v43  ;;  %v1202_v10 = vunpack.c.l.b16 %v1181_v49  ;;  %v1353_v9 = vld [vmem:[#allocation2 + $0x30] sm:$0xf]  ;;  %v1477_v38 = vunpack.c.l.b16 %v1416_v23 }
  0x83   : > { %v1565_v14 = vsel %vm2199_vm15, %v1921_v27, %v1564_v19  ;;  %v1402_v22 = vsel %vm2147_vm12, %v1397_v4, %v1401_v5  ;;  %v1418_v28 = vshrl.u32 %v1353_v9, 16  ;;  %v1421_v29 = vshll.u32 %v1353_v9, 16  ;;  %v1907_v4 = vld [vmem:[#allocation2 + $0x30] sm:$0xf]  ;;  %v1947_v5 = vld [vmem:[#allocation2 + $0x34] sm:$0xf0] }
  0x84   : > { %v1482_v11 = vpack.c.b16 %v1475_v57, %v1474_v56  ;;  %v1595_v1 = vunpack.c.l.b16 %v1565_v14  ;;  %v1476_v37 = vunpack.c.l.b16 %v1402_v22  ;;  %v1889_v27 = vrot.slane %v1146_v25, 9 }
  0x85   : > { %1860 = vmatmul.msk.bf16.gmra.mxu2 %vm633_vm11, %v814_v47  ;;  %v1176_v47 = vrot.slane %v2240_v13, 5  ;;  %v1184_v19 = vrot.slane %v2263_v32, 5  ;;  %v1890_v41 = vrot.slane %v1147_v26, 9  ;;  %v1188_v43 = vrot.slane %v2265_v33, 5 }
  0x86   : > { %v1603_v7 = vpack.c.b16 %v1596_v3, %v1595_v1  ;;  %v1420_v44 = vrot.slane %v1418_v28, 4  ;;  %v1423_v45 = vrot.slane %v1421_v29, 5  ;;  %v1483_v54 = vpack.c.b16 %v1477_v38, %v1476_v37  ;;  %v1543_v1 = vld [vmem:[#allocation2 + $0x38] sm:$0xe] }
  0x87   : > { %v1177_v13 = vsel %vm2199_vm15, %v1887_v46, %v1176_v47  ;;  %v1437_v47 = vrot.slane %v1435_v31, 5  ;;  %v1185_v32 = vsel %vm2199_vm15, %v1889_v27, %v1184_v19  ;;  %v1189_v33 = vsel %vm2199_vm15, %v1890_v41, %v1188_v43  ;;  %v1358_v27 = vld [vmem:[#allocation2 + $0x44] sm:$0x1]  ;;  %v1360_v19 = vld [vmem:[#allocation2 + $0x4c] sm:$0x1] }
  0x88   : > { %v1424_v55 = vor.u32 %v1423_v45, %v1420_v44  ;;  %v1427_v56 = vshll.u32 %v1354_v48, 16  ;;  %v1203_v60 = vunpack.c.l.b16 %v1185_v32  ;;  %v1925_v18 = vrot.slane %v1542_v0, 9 }
  0x89   : > { %v1580_v6 = vrot.slane %v1354_v48, 5  ;;  %v1908_v25 = vor.u32 %v1947_v5, %v1907_v4  ;;  %v1891_v26 = vrot.slane %v1148_v15, 9  ;;  %v1192_v28 = vrot.slane %v2287_v62, 5 }
  0x8a   : > { %1880 = vmatmul.msk.bf16.gmra.mxu3 %vm633_vm11, %v1876_v2  ;;  %v1201_v2 = vunpack.c.l.b16 %v1177_v13  ;;  %v1204_v13 = vunpack.c.l.b16 %v1189_v33  ;;  %v1425_v49 = vrot.slane %v1424_v55, 4  ;;  %v1429_v34 = vrot.slane %v1427_v56, 5 }
  0x8b   : > { %v1892_v29 = vrot.slane %v1149_v16, 9  ;;  %v1581_v40 = vsel %vm2199_vm15, %v1925_v18, %v1580_v6  ;;  %v1193_v62 = vsel %vm2199_vm15, %v1891_v26, %v1192_v28  ;;  %v1469_v48 = vshll.u32 %v1360_v19, 16 }
  0x8c   : > { %v1208_v35 = vpack.c.b16 %v1202_v10, %v1201_v2  ;;  %v1209_v3 = vpack.c.b16 %v1204_v13, %v1203_v60  ;;  %v1357_v2 = vld [vmem:[#allocation2 + $0x40] sm:$0xf]  ;;  %v1359_v10 = vld [vmem:[#allocation2 + $0x48] sm:$0xf]  ;;  %v1599_v43 = vunpack.c.l.b16 %v1581_v40  ;;  %v1592_v0 = vrot.slane %v1360_v19, 5 }
  0x8d   : > { %v1446_v21 = vshrl.u32 %v1357_v2, 16  ;;  %v1449_v22 = vshll.u32 %v1357_v2, 16  ;;  %v1460_v23 = vshrl.u32 %v1359_v10, 16  ;;  %v1471_v55 = vrot.slane %v1469_v48, 5  ;;  %v1948_v60 = vld [vmem:[#allocation2 + $0x44] sm:$0xf0] }
  0x8f   : > { %1884 = vmatmul.msk.bf16.gmra.mxu0 %vm633_vm11, %v1089_v24  ;;  %v1541_v24 = vld [vmem:[#allocation2 + $0x28] sm:$0xe]  ;;  %v1448_v37 = vrot.slane %v1446_v21, 4  ;;  %v1451_v38 = vrot.slane %v1449_v22, 5 }
  0x90   : > { %1893 = vmatmul.msk.bf16.vlgmr.msra.gmra.mxu1 %vm633_vm11, %v1207_v30  ;;  %v1432_v30 = vshrl.u32 %v1355_v8, 16  ;;  %v1924_v12 = vrot.slane %v1541_v24, 9  ;;  %v1926_v8 = vrot.slane %v1543_v1, 9  ;;  %v1463_v24 = vshll.u32 %v1359_v10, 16 }
  0x91   : > { %v1452_v45 = vor.u32 %v1451_v38, %v1448_v37 }
  0x92   : > { %v1434_v46 = vrot.slane %v1432_v30, 4  ;;  %v1196_v30 = vrot.slane %v2298_v39, 5 }
  0x94   : > { %v1438_v57 = vor.u32 %v1437_v47, %v1434_v46  ;;  %v1197_v39 = vsel %vm2199_vm15, %v1892_v29, %v1196_v30  ;;  %v1455_v46 = vshll.u32 %v1358_v27, 16 }
  0x95   : > { %1913 = vmatmul.msk.bf16.vlgmr.msra.gmra.mxu2 %vm633_vm11, %v1900_v20  ;;  %v1576_v20 = vrot.slane %v1352_v59, 5  ;;  %v1597_v59 = vunpack.c.l.b16 %v1573_v52  ;;  %v1206_v52 = vunpack.c.l.b16 %v1197_v39 }
  0x96   : > { %v1439_v61 = vrot.slane %v1438_v57, 4  ;;  %v1457_v32 = vrot.slane %v1455_v46, 5 }
  0x97   : > { %v1577_v53 = vsel %vm2199_vm15, %v1924_v12, %v1576_v20  ;;  %v1462_v12 = vrot.slane %v1460_v23, 4  ;;  %v1465_v20 = vrot.slane %v1463_v24, 5 }
  0x98   : > { %v1598_v14 = vunpack.c.l.b16 %v1577_v53  ;;  %v1444_v9 = vsel %vm2147_vm12, %v1439_v61, %v1443_v63  ;;  %v1588_v61 = vrot.slane %v1358_v27, 5 }
  0x99   : > { %v1466_v47 = vor.u32 %v1465_v20, %v1462_v12 }
  0x9a   : > { %1917 = vmatmul.msk.bf16.vlgmr.msra.gmra.mxu3 %vm633_vm11, %v1482_v11  ;;  %v1604_v11 = vpack.c.b16 %v1598_v14, %v1597_v59  ;;  %v1545_v59 = vld [vmem:[#allocation2 + $0x48] sm:$0xe]  ;;  %v1911_v14 = vld [vmem:[#allocation2 + $0x40] sm:$0xf] }
  0x9b   : > { %v1467_v33 = vrot.slane %v1466_v47, 4  ;;  %v1928_v63 = vrot.slane %v1545_v59, 9 }
  0x9d   : > { %v1593_v10 = vsel %vm2199_vm15, %v1928_v63, %v1592_v0 }
  0x9e   : > { %v1602_v18 = vunpack.c.l.b16 %v1593_v10 }
  0x9f   : > { %1929 = vmatmul.msk.bf16.vlgmr.msra.gmra.mxu0 %vm633_vm11, %v1603_v7  ;;  %v1430_v7 = vsel %vm2147_vm12, %v1425_v49, %v1429_v34  ;;  %v1472_v49 = vsel %vm2147_vm12, %v1467_v33, %v1471_v55  ;;  %v1927_v34 = vrot.slane %v1544_v58, 9 }
  0xa0   : > { %1894 = vmatmul.msk.bf16.gmra.mxu1 %vm633_vm11, %v1208_v35  ;;  %v1584_v35 = vrot.slane %v1356_v50, 5  ;;  %v1478_v31 = vunpack.c.l.b16 %v1430_v7  ;;  %v1205_v50 = vunpack.c.l.b16 %v1193_v62 }
  0xa1   : > { %v1589_v2 = vsel %vm2199_vm15, %v1927_v34, %v1588_v61 }
  0xa2   : > { %v1585_v51 = vsel %vm2199_vm15, %v1926_v8, %v1584_v35  ;;  %v1210_v56 = vpack.c.b16 %v1206_v52, %v1205_v50  ;;  %v1601_v5 = vunpack.c.l.b16 %v1589_v2 }
  0xa3   : > { %v1600_v44 = vunpack.c.l.b16 %v1585_v51 }
  0xa4   : > { %v1606_v7 = vpack.c.b16 %v1602_v18, %v1601_v5 }
  0xa5   : > { %1914 = vmatmul.msk.bf16.gmra.mxu2 %vm633_vm11, %v1904_v36  ;;  %v1479_v36 = vunpack.c.l.b16 %v1444_v9  ;;  %v1605_v53 = vpack.c.b16 %v1600_v44, %v1599_v43 }
  0xa7   : > { %v1484_v41 = vpack.c.b16 %v1479_v36, %v1478_v31 }
  0xaa   : > { %1918 = vmatmul.msk.bf16.gmra.mxu3 %vm633_vm11, %v1483_v54  ;;  %v1453_v54 = vrot.slane %v1452_v45, 4 }
  0xac   : > { %v1458_v13 = vsel %vm2147_vm12, %v1453_v54, %v1457_v32 }
  0xad   : > { %v1480_v1 = vunpack.c.l.b16 %v1458_v13 }
  0xaf   : > { %1930 = vmatmul.msk.bf16.gmra.mxu0 %vm633_vm11, %v1604_v11  ;;  %v1912_v11 = vor.u32 %v1948_v60, %v1911_v14 }
  0xb0   : > { %1895 = vmatmul.msk.bf16.gmra.mxu1 %vm633_vm11, %v1209_v3  ;;  %v1481_v3 = vunpack.c.l.b16 %v1472_v49 }
  0xb2   : > { %v1485_v42 = vpack.c.b16 %v1481_v3, %v1480_v1 }
  0xb5   : > { %1915 = vmatmul.msk.bf16.gmra.mxu2 %vm633_vm11, %v1908_v25 }
  0xba   : > { %1919 = vmatmul.msk.bf16.gmra.mxu3 %vm633_vm11, %v1484_v41 }
  0xbd   : > { %v2372_v57 = vpop.f32.mrf.mxu1 }
  0xbf   : > { %1931 = vmatmul.msk.bf16.gmra.mxu0 %vm633_vm11, %v1605_v53 }
  0xc0   : > { %1896 = vmatmul.msk.bf16.gmra.mxu1 %vm633_vm11, %v1210_v56 }
  0xc5   : > { %1916 = vmatmul.msk.bf16.gmra.mxu2 %vm633_vm11, %v1912_v11  ;;  %v2385_v4 = vpop.f32.mrf.mxu1 }
  0xc8   : > { %v2387_v6 = vpop.f32.mrf.mxu2 }
  0xca   : > { %1920 = vmatmul.msk.bf16.gmra.mxu3 %vm633_vm11, %v1485_v42 }
  0xcc   : > { %v659_v9 = vpop.f32.mrf.mxu0 }
  0xcd   : > { %v2390_v8 = vpop.f32.mrf.mxu3  ;;  %v723_v35 = vpop.f32.mrf.mxu1 }
  0xce   : > { %v724_v47 = vadd.f32 %v723_v35, %v659_v9 }
  0xcf   : > { %1932 = vmatmul.msk.bf16.gmra.mxu0 %vm633_vm11, %v1606_v7 }
  0xd0   : > { %v2393_v17 = vpop.f32.mrf.mxu2 }
  0xd4   : > { %v661_v15 = vpop.f32.mrf.mxu0 }
  0xd5   : > { %v2395_v16 = vpop.f32.mrf.mxu3  ;;  %v725_v21 = vpop.f32.mrf.mxu1 }
  0xd6   : > { %v726_v33 = vadd.f32 %v725_v21, %v661_v15 }
  0xd8   : > { %v839_v22 = vpop.f32.mrf.mxu2 }
  0xd9   : > { %v859_v53 = vadd.f32 %v839_v22, %v724_v47 }
  0xdc   : > { %v1114_v23 = vpop.f32.mrf.mxu0 }
  0xdd   : > { %v921_v24 = vpop.f32.mrf.mxu3  ;;  %v728_v25 = vpop.f32.mrf.mxu1 }
  0xde   : > { %v941_v32 = vadd.f32 %v921_v24, %v859_v53  ;;  %v729_v61 = vadd.f32 %v728_v25, %v2372_v57 }
  0xe0   : > { %v841_v26 = vpop.f32.mrf.mxu2  ;;  %v1134_v14 = vadd.f32 %v1114_v23, %v941_v32 }
  0xe1   : > { %v860_v59 = vadd.f32 %v841_v26, %v726_v33 }
  0xe4   : > { %v1116_v28 = vpop.f32.mrf.mxu0 }
  0xe5   : > { %v923_v29 = vpop.f32.mrf.mxu3  ;;  %v730_v30 = vpop.f32.mrf.mxu1 }
  0xe6   : > { %v942_v49 = vadd.f32 %v923_v29, %v860_v59  ;;  %v731_v57 = vadd.f32 %v730_v30, %v2385_v4 }
  0xe8   : > { %v844_v31 = vpop.f32.mrf.mxu2  ;;  %v1135_v2 = vadd.f32 %v1116_v28, %v942_v49 }
  0xe9   : > { %v861_v1 = vadd.f32 %v844_v31, %v729_v61 }
  0xec   : > { %v1119_v36 = vpop.f32.mrf.mxu0 }
  0xed   : > { %v926_v40 = vpop.f32.mrf.mxu3  ;;  %v2397_v51 = vpop.f32.mrf.mxu1 }
  0xee   : > { %v943_v18 = vadd.f32 %v926_v40, %v861_v1 }
  0xf0   : > { %v846_v37 = vpop.f32.mrf.mxu2  ;;  %v1136_v24 = vadd.f32 %v1119_v36, %v943_v18 }
  0xf1   : > { %v862_v15 = vadd.f32 %v846_v37, %v731_v57  ;;  %v734_v37 = vadd.f32 %v2397_v51, %v2387_v6 }
  0xf4   : > { %v2399_v38 = vpop.f32.mrf.mxu0 }
  0xf5   : > { %v928_v12 = vpop.f32.mrf.mxu3  ;;  %v2401_v20 = vpop.f32.mrf.mxu1 }
  0xf6   : > { %v944_v31 = vadd.f32 %v928_v12, %v862_v15 }
  0xf8   : > { %v2403_v27 = vpop.f32.mrf.mxu2 }
  0xf9   : > { %v863_v12 = vadd.f32 %v2403_v27, %v734_v37  ;;  %v736_v27 = vadd.f32 %v2401_v20, %v2393_v17 }
  0xfc   : > { %v2405_v19 = vpop.f32.mrf.mxu0 }
  0xfd   : > { %v2407_v62 = vpop.f32.mrf.mxu3  ;;  %v2409_v39 = vpop.f32.mrf.mxu1 }
  0xfe   : > { %v945_v51 = vadd.f32 %v2407_v62, %v863_v12 }
 0x100   : > { %v2411_v41 = vpop.f32.mrf.mxu2 }
 0x104   : > { %v2413_v43 = vpop.f32.mrf.mxu0 }
 0x105   : > { %v2415_v44 = vpop.f32.mrf.mxu3  ;;  %v2417_v45 = vpop.f32.mrf.mxu1 }
 0x108   : > { %v2419_v46 = vpop.f32.mrf.mxu2 }
 0x10c   : > { %v2421_v48 = vpop.f32.mrf.mxu0 }
 0x10d   : > { %v2423_v50 = vpop.f32.mrf.mxu3  ;;  %v1235_v52 = vpop.f32.mrf.mxu1 }
 0x10e   : > { %v1255_v60 = vadd.f32 %v1235_v52, %v1134_v14 }
 0x110   : > { %v2425_v54 = vpop.f32.mrf.mxu2 }
 0x114   : > { %v2427_v55 = vpop.f32.mrf.mxu0 }
 0x115   : > { %v2429_v56 = vpop.f32.mrf.mxu3  ;;  %v1237_v58 = vpop.f32.mrf.mxu1 }
 0x116   : > { %v1256_v42 = vadd.f32 %v1237_v58, %v1135_v2  ;;  %v864_v2 = vadd.f32 %v2411_v41, %v736_v27  ;;  %v739_v41 = vadd.f32 %v2409_v39, %v2390_v8 }
 0x118   : > { %v1317_v13 = vpop.f32.mrf.mxu2  ;;  %v946_v17 = vadd.f32 %v2415_v44, %v864_v2 }
 0x119   : > { %v1337_v34 = vadd.f32 %v1317_v13, %v1255_v60  ;;  %v1137_v60 = vadd.f32 %v2399_v38, %v944_v31 }
 0x11c   : > { %v1631_v63 = vpop.f32.mrf.mxu0 }
 0x11d   : > { %v1510_v0 = vpop.f32.mrf.mxu3  ;;  %v1240_v11 = vpop.f32.mrf.mxu1 }
 0x11e   : > { %v1530_v3 = vadd.f32 %v1510_v0, %v1337_v34  ;;  %v1257_v28 = vadd.f32 %v1240_v11, %v1136_v24  ;;  %v865_v24 = vadd.f32 %v2419_v46, %v739_v41  ;;  %v741_v46 = vadd.f32 %v2417_v45, %v2395_v16 }
 0x120   : > { %v1651_v10 = vadd.f32 %v1631_v63, %v1530_v3  ;;  %v1319_v5 = vpop.f32.mrf.mxu2 }
 0x121   : > { %v1338_v9 = vadd.f32 %v1319_v5, %v1256_v42  ;;  %v1138_v5 = vadd.f32 %v2405_v19, %v945_v51 }
 0x122   : > { %v1713_v7 = vpack.c.bf16 %v1651_v10, %v1651_v10  ;;  %v1680_v25 = vmul.f32 %v1651_v10, %v1651_v10  ;;  %v1659_v40 = vsel %vm633_vm11, %v1651_v10, 0.0 }
 0x124   : > { %1721 = vst.msk [vmem:[%s2437_s26] sm:$0xf] %vm466_vm1, %v1713_v7  ;;  %v1633_v35 = vpop.f32.mrf.mxu0  ;;  %v1688_v32 = vsel %vm633_vm11, %v1680_v25, 0.0 }
 0x125   : > { %v1512_v21 = vpop.f32.mrf.mxu3  ;;  %v1242_v22 = vpop.f32.mrf.mxu1 }
 0x126   : > { %v1531_v23 = vadd.f32 %v1512_v21, %v1338_v9  ;;  %v1258_v34 = vadd.f32 %v1242_v22, %v1137_v60 }
 0x128   : > { %v1652_v26 = vadd.f32 %v1633_v35, %v1531_v23  ;;  %v1322_v29 = vpop.f32.mrf.mxu2 }
 0x129   : > { %v1339_v30 = vadd.f32 %v1322_v29, %v1257_v28  ;;  %v1139_v28 = vadd.f32 %v2413_v43, %v946_v17 }
 0x12a   : > { %v1660_v47 = vsel %vm633_vm11, %v1652_v26, 0.0  ;;  %v1681_v52 = vmul.f32 %v1652_v26, %v1652_v26  ;;  %v1714_v4 = vpack.c.bf16 %v1652_v26, %v1652_v26 }
 0x12b   : > { %v1661_v53 = vadd.f32 %v1660_v47, %v1659_v40  ;;  %v947_v47 = vadd.f32 %v2423_v50, %v865_v24 }
 0x12c   : > { %v1689_v36 = vsel %vm633_vm11, %v1681_v52, 0.0  ;;  %1722 = vst.msk [vmem:[%s2437_s26 + $0x4] sm:$0xf] %vm466_vm1, %v1714_v4  ;;  %v1636_v33 = vpop.f32.mrf.mxu0 }
 0x12d   : > { %v1690_v58 = vadd.f32 %v1689_v36, %v1688_v32  ;;  %v1515_v59 = vpop.f32.mrf.mxu3  ;;  %v1245_v13 = vpop.f32.mrf.mxu1  ;;  %v866_v32 = vadd.f32 %v2425_v54, %v741_v46  ;;  %v1140_v12 = vadd.f32 %v2421_v48, %v947_v47 }
 0x12e   : > { %v1532_v14 = vadd.f32 %v1515_v59, %v1339_v30  ;;  %v1259_v7 = vadd.f32 %v1245_v13, %v1138_v5 }
 0x12f   : > { %v948_v60 = vadd.f32 %v2429_v56, %v866_v32 }
 0x130   : > { %v1653_v49 = vadd.f32 %v1636_v33, %v1532_v14  ;;  %v1324_v6 = vpop.f32.mrf.mxu2 }
 0x131   : > { %v1340_v11 = vadd.f32 %v1324_v6, %v1258_v34 }
 0x132   : > { %v1662_v61 = vsel %vm633_vm11, %v1653_v49, 0.0  ;;  %v1682_v63 = vmul.f32 %v1653_v49, %v1653_v49  ;;  %v1715_v0 = vpack.c.bf16 %v1653_v49, %v1653_v49 }
 0x133   : > { %v1663_v1 = vadd.f32 %v1662_v61, %v1661_v53 }
 0x134   : > { %v1691_v3 = vsel %vm633_vm11, %v1682_v63, 0.0  ;;  %1723 = vst.msk [vmem:[%s2437_s26 + $0x8] sm:$0xf] %vm466_vm1, %v1715_v0  ;;  %v1638_v38 = vpop.f32.mrf.mxu0  ;;  %v1141_v0 = vadd.f32 %v2427_v55, %v948_v60 }
 0x135   : > { %v1692_v10 = vadd.f32 %v1691_v3, %v1690_v58  ;;  %v1517_v42 = vpop.f32.mrf.mxu3  ;;  %v1247_v57 = vpop.f32.mrf.mxu1 }
 0x136   : > { %v1533_v62 = vadd.f32 %v1517_v42, %v1340_v11  ;;  %v1260_v31 = vadd.f32 %v1247_v57, %v1139_v28 }
 0x138   : > { %v1654_v18 = vadd.f32 %v1638_v38, %v1533_v62  ;;  %v1327_v9 = vpop.f32.mrf.mxu2 }
 0x139   : > { %v1341_v21 = vadd.f32 %v1327_v9, %v1259_v7 }
 0x13a   : > { %v1664_v20 = vsel %vm633_vm11, %v1654_v18, 0.0  ;;  %v1683_v35 = vmul.f32 %v1654_v18, %v1654_v18  ;;  %v1716_v15 = vpack.c.bf16 %v1654_v18, %v1654_v18 }
 0x13b   : > { %v1665_v22 = vadd.f32 %v1664_v20, %v1663_v1 }
 0x13c   : > { %v1693_v23 = vsel %vm633_vm11, %v1683_v35, 0.0  ;;  %1724 = vst.msk [vmem:[%s2437_s26 + $0xc] sm:$0xf] %vm466_vm1, %v1716_v15  ;;  %v1641_v19 = vpop.f32.mrf.mxu0 }
 0x13d   : > { %v1694_v25 = vadd.f32 %v1693_v23, %v1692_v10  ;;  %v1520_v26 = vpop.f32.mrf.mxu3  ;;  %v1250_v30 = vpop.f32.mrf.mxu1 }
 0x13e   : > { %v1534_v44 = vadd.f32 %v1520_v26, %v1341_v21  ;;  %v1261_v59 = vadd.f32 %v1250_v30, %v1140_v12 }
 0x140   : > { %v1655_v29 = vadd.f32 %v1641_v19, %v1534_v44  ;;  %v1329_v40 = vpop.f32.mrf.mxu2 }
 0x141   : > { %v1342_v4 = vadd.f32 %v1329_v40, %v1260_v31 }
 0x142   : > { %v1666_v8 = vsel %vm633_vm11, %v1655_v29, 0.0  ;;  %v1684_v39 = vmul.f32 %v1655_v29, %v1655_v29  ;;  %v1717_v52 = vpack.c.bf16 %v1655_v29, %v1655_v29 }
 0x143   : > { %v1667_v37 = vadd.f32 %v1666_v8, %v1665_v22 }
 0x144   : > { %v1695_v53 = vsel %vm633_vm11, %v1684_v39, 0.0  ;;  %1725 = vst.msk [vmem:[%s2437_s26 + $0x10] sm:$0xf] %vm466_vm1, %v1717_v52  ;;  %v1643_v43 = vpop.f32.mrf.mxu0 }
 0x145   : > { %v1696_v36 = vadd.f32 %v1695_v53, %v1694_v25  ;;  %v1522_v50 = vpop.f32.mrf.mxu3  ;;  %v1252_v54 = vpop.f32.mrf.mxu1 }
 0x146   : > { %v1535_v33 = vadd.f32 %v1522_v50, %v1342_v4  ;;  %v1262_v56 = vadd.f32 %v1252_v54, %v1141_v0 }
 0x148   : > { %v1656_v58 = vadd.f32 %v1643_v43, %v1535_v33  ;;  %v1332_v14 = vpop.f32.mrf.mxu2 }
 0x149   : > { %v1343_v49 = vadd.f32 %v1332_v14, %v1261_v59 }
 0x14a   : > { %v1668_v16 = vsel %vm633_vm11, %v1656_v58, 0.0  ;;  %v1685_v45 = vmul.f32 %v1656_v58, %v1656_v58  ;;  %v1718_v13 = vpack.c.bf16 %v1656_v58, %v1656_v58 }
 0x14b   : > { %v1669_v34 = vadd.f32 %v1668_v16, %v1667_v37 }
 0x14c   : > { %v1697_v6 = vsel %vm633_vm11, %v1685_v45, 0.0  ;;  %1726 = vst.msk [vmem:[%s2437_s26 + $0x14] sm:$0xf] %vm466_vm1, %v1718_v13  ;;  %v1646_v61 = vpop.f32.mrf.mxu0 }
 0x14d   : > { %v1698_v51 = vadd.f32 %v1697_v6, %v1696_v36  ;;  %v1525_v48 = vpop.f32.mrf.mxu3 }
 0x14e   : > { %v1536_v63 = vadd.f32 %v1525_v48, %v1343_v49 }
 0x150   : > { %v1657_v11 = vadd.f32 %v1646_v61, %v1536_v63  ;;  %v1334_v27 = vpop.f32.mrf.mxu2 }
 0x151   : > { %v1344_v2 = vadd.f32 %v1334_v27, %v1262_v56 }
 0x152   : > { %v1670_v1 = vsel %vm633_vm11, %v1657_v11, 0.0  ;;  %v1686_v3 = vmul.f32 %v1657_v11, %v1657_v11  ;;  %v1719_v38 = vpack.c.bf16 %v1657_v11, %v1657_v11 }
 0x153   : > { %v1671_v10 = vadd.f32 %v1670_v1, %v1669_v34 }
 0x154   : > { %v1699_v42 = vsel %vm633_vm11, %v1686_v3, 0.0  ;;  %1727 = vst.msk [vmem:[%s2437_s26 + $0x18] sm:$0xf] %vm466_vm1, %v1719_v38  ;;  %v1648_v7 = vpop.f32.mrf.mxu0 }
 0x155   : > { %v1700_v62 = vadd.f32 %v1699_v42, %v1698_v51  ;;  %v1527_v5 = vpop.f32.mrf.mxu3 }
 0x156   : > { %v1537_v18 = vadd.f32 %v1527_v5, %v1344_v2 }
 0x158   : > { %v1658_v9 = vadd.f32 %v1648_v7, %v1537_v18 }
 0x15a   : > { %v1672_v55 = vsel %vm633_vm11, %v1658_v9, 0.0  ;;  %v1687_v57 = vmul.f32 %v1658_v9, %v1658_v9  ;;  %v1720_v17 = vpack.c.bf16 %v1658_v9, %v1658_v9 }
 0x15b   : > { %v1673_v20 = vadd.f32 %v1672_v55, %v1671_v10 }
 0x15c   : > { %v1701_v35 = vsel %vm633_vm11, %v1687_v57, 0.0  ;;  %1728 = vst.msk [vmem:[%s2437_s26 + $0x1c] sm:$0xf] %vm466_vm1, %v1720_v17 }
 0x15d   : > { %v1674_v15 = vrot.slane %v1673_v20, 4  ;;  %v1702_v21 = vadd.f32 %v1701_v35, %v1700_v62 }
 0x15f   : > { %v1675_v41 = vadd.f32 %v1674_v15, %v1673_v20  ;;  %v1703_v22 = vrot.slane %v1702_v21, 4 }
 0x161   : > { %v1676_v23 = vrot.slane %v1675_v41, 2  ;;  %v1704_v19 = vadd.f32 %v1703_v22, %v1702_v21 }
 0x163   : > { %v1677_v24 = vadd.f32 %v1676_v23, %v1675_v41  ;;  %v1705_v25 = vrot.slane %v1704_v19, 2 }
 0x165   : > { %v1678_v26 = vrot.slane %v1677_v24, 1  ;;  %v1706_v44 = vadd.f32 %v1705_v25, %v1704_v19 }
 0x167   : > { %v1707_v28 = vrot.slane %v1706_v44, 1  ;;  %v1679_v29 = vadd.f32 %v1678_v26, %v1677_v24 }
 0x169   : > { %v1708_v31 = vadd.f32 %v1707_v28, %v1706_v44 }
 0x16b   : > { %v1710_v40 = vsel %vm381_vm2, %v1679_v29, %v1708_v31 }
 0x16c   : > { %1712 = vst.msk [vmem:[%s235_s29] sm:$0x3] %vm1711_vm0, %v1710_v40 }
 0x16d PF: > { %s16_s18 = sadd.s32 1, %s1988_s18  }
 0x16e   : > { %p13_p4 = scmp.ge.s32.totalorder %s16_s18, 4  }
 0x170   :  { %15 = sbr.rel (!%p13_p4) target bundleno = 1 (0x1), region = 80 }

</bundles_post_ra>
